<compile_context>
chip_gen: v6e
topology: v6e:2x2x1
jax: 0.10.0
libtpu: 0.0.40
codegen_flags: <defaults>
</compile_context>

<pallas_src>
import functools

import jax
import jax.numpy as jnp
from jax import lax
from jax.experimental import pallas as pl
from jax.experimental.pallas import tpu as pltpu

_C_CHUNK = 8                       # channels reduced per unrolled chunk (vreg bound)
_BLOCK_BUDGET = 4 * 1024 * 1024    # per input block; Pallas double-buffers it
_MAX_CT = 256                      # cap on channel tile (bounds unrolled trace)
_MAX_BT = 8                        # cap on batch tile


def _round_up(x, m):
    return ((x + m - 1) // m) * m


def _pick_tiles(N, C, HW, itemsize):
    """Pick (batch_tile, channel_tile) for the (N//bt, C//ct) grid.

    Uses the *padded* VMEM footprint (lane dim rounded up to 128, second-minor
    dim up to the dtype sublane tile) so the double-buffered block stays well
    inside the scoped VMEM limit on every generation (v7x: 64 MiB physical).
    """
    sub = {4: 8, 2: 16, 1: 32}.get(itemsize, 8)
    lane_hw = max(_round_up(HW, 128), 128)

    def block_bytes(bt, ct):
        return bt * _round_up(ct, sub) * lane_hw * itemsize

    # Channel tile: largest divisor of C that is a multiple of the sublane tile,
    # fits the budget at bt=1 and stays <= _MAX_CT; fall back to full C.
    ct_cands = sorted({d for d in range(sub, C + 1, sub) if C % d == 0} | {C})
    ct = ct_cands[0]
    for d in ct_cands:
        if d <= _MAX_CT and block_bytes(1, d) <= _BLOCK_BUDGET:
            ct = d

    # Batch tile: largest divisor of N (<= _MAX_BT) that fits the budget;
    # prefer leaving >= 2 batch grid steps when N > 1 (v7x has 2 TensorCores).
    bt_cands = [d for d in range(1, min(N, _MAX_BT) + 1) if N % d == 0]
    fits = [d for d in bt_cands if block_bytes(d, ct) <= _BLOCK_BUDGET] or [1]
    multi = [d for d in fits if N // d >= 2]
    bt = max(multi) if (N > 1 and multi) else max(fits)
    return bt, ct


def _spatial_attn_kernel(x_ref, w_ref, o_ref, sum_ref, max_ref, *,
                         total_c, width, ksize):
    # x_ref   : (BT, CT, HW) input tile (VMEM, native dtype), HW on lanes
    # w_ref   : (2*ksize*ksize,) conv weight, flattened, f32 (SMEM scalars)
    # o_ref   : (BT, 1, HW) output tile (VMEM)
    # sum/max : (BT, HW) f32 VMEM accumulators, resident across the C grid axis
    BT, CT, HW = x_ref.shape
    W = width
    pad = ksize // 2
    k = pl.program_id(1)
    nk = pl.num_programs(1)

    @pl.when(k == 0)
    def _init():
        sum_ref[...] = jnp.zeros_like(sum_ref)
        max_ref[...] = jnp.full_like(max_ref, -jnp.inf)

    # ---- chunked channel partial reduction (lane-dense, bounded vreg use) ----
    psum = None
    pmax = None
    c0 = 0
    while c0 < CT:                                   # static unroll over chunks
        cs = min(_C_CHUNK, CT - c0)
        xc = x_ref[:, c0:c0 + cs, :].astype(jnp.float32)     # (BT, cs, HW)
        s = jnp.sum(xc, axis=1)
        m = jnp.max(xc, axis=1)
        psum = s if psum is None else psum + s
        pmax = m if pmax is None else jnp.maximum(pmax, m)
        c0 += cs

    sum_ref[...] = sum_ref[...] + psum
    max_ref[...] = jnp.maximum(max_ref[...], pmax)

    # ---- last channel step: 2->1 ch ksize x ksize conv + sigmoid, lane-dense ----
    @pl.when(k == nk - 1)
    def _finish():
        avg = sum_ref[...] * (1.0 / total_c)                 # (BT, HW)
        mx = max_ref[...]

        # Read all weights once from SMEM (scalar splats into VPU multiplies).
        wts = [w_ref[i] for i in range(2 * ksize * ksize)]

        # Zero-pad pad*W+pad on each side of the flat map.  Each tap is then a
        # static lane-offset slice; row under/overflow lands in the zero pad,
        # column wrap across rows is killed by a per-kw lane mask (lane % W).
        fpad = pad * W + pad
        zpad = jnp.zeros((BT, fpad), jnp.float32)
        padded = [jnp.concatenate([zpad, f, zpad], axis=-1) for f in (avg, mx)]

        col = lax.broadcasted_iota(jnp.int32, (1, HW), 1) % W
        acc = jnp.zeros((BT, HW), jnp.float32)
        for kw in range(ksize):
            dw = kw - pad
            part = jnp.zeros((BT, HW), jnp.float32)
            for c in range(2):                       # channel 0 = avg, 1 = max
                p = padded[c]
                for kh in range(ksize):
                    off = kh * W + kw
                    w_s = wts[(c * ksize + kh) * ksize + kw]
                    part = part + p[:, off:off + HW] * w_s
            mask = jnp.logical_and(col + dw >= 0, col + dw < W).astype(jnp.float32)
            acc = acc + part * mask

        o_ref[:, 0, :] = jax.nn.sigmoid(acc).astype(o_ref.dtype)


@jax.jit
def spatial_attention_averagepool(x, weight):
    """x: (N, C, H, W); weight: (1, 2, k, k) -> (N, 1, H, W) (same dtype as x)."""
    N, C, H, W = x.shape
    ksize = weight.shape[-1]
    HW = H * W

    x2 = x.reshape(N, C, HW)                              # free metadata reshape
    w_flat = weight.reshape(-1).astype(jnp.float32)       # (2*k*k,) -> SMEM scalars
    bt, ct = _pick_tiles(N, C, HW, x.dtype.itemsize)

    kernel = functools.partial(_spatial_attn_kernel,
                               total_c=C, width=W, ksize=ksize)

    out2 = pl.pallas_call(
        kernel,
        out_shape=jax.ShapeDtypeStruct((N, 1, HW), x.dtype),
        grid_spec=pltpu.PrefetchScalarGridSpec(
            num_scalar_prefetch=0,
            grid=(N // bt, C // ct),                      # reduction (C) axis last
            in_specs=[
                pl.BlockSpec((bt, ct, HW), lambda n, k: (n, k, 0)),
                pl.BlockSpec(memory_space=pltpu.MemorySpace.SMEM),   # weights
            ],
            out_specs=pl.BlockSpec((bt, 1, HW), lambda n, k: (n, 0, 0)),
            scratch_shapes=[
                pltpu.VMEM((bt, HW), jnp.float32),        # channel-sum accumulator
                pltpu.VMEM((bt, HW), jnp.float32),        # channel-max accumulator
            ],
        ),
        compiler_params=pltpu.CompilerParams(
            dimension_semantics=("parallel", "arbitrary"),
            vmem_limit_bytes=48 * 1024 * 1024,
        ),
    )(x2, w_flat)

    return out2.reshape(N, 1, H, W)


def _reference(x, weight):
    """Pure-JAX reference mirroring the PyTorch module."""
    pad = weight.shape[-1] // 2
    avg_out = jnp.mean(x, axis=1, keepdims=True)
    max_out = jnp.max(x, axis=1, keepdims=True)
    feat = jnp.concatenate([avg_out, max_out], axis=1)        # (N, 2, H, W)
    y = lax.conv_general_dilated(
        feat, weight,
        window_strides=(1, 1),
        padding=((pad, pad), (pad, pad)),
        dimension_numbers=("NCHW", "OIHW", "NCHW"),
    )
    return jax.nn.sigmoid(y)


if __name__ == "__main__":
    key = jax.random.PRNGKey(0)
    kx, kw = jax.random.split(key)

    N, C, H, W = 2, 4, 16, 16
    KS = 7
    x = jax.random.normal(kx, (N, C, H, W), dtype=jnp.float32)

    # Deterministic conv weight (uniform, PyTorch-like default scale):
    fan_in = 2 * KS * KS
    bound = 1.0 / (fan_in ** 0.5)
    weight = jax.random.uniform(
        kw, (1, 2, KS, KS), dtype=jnp.float32, minval=-bound, maxval=bound
    )

    out = jax.block_until_ready(spatial_attention_averagepool(x, weight))
    ref = jax.block_until_ready(_reference(x, weight))

    assert out.shape == (N, 1, H, W), out.shape
    assert jnp.allclose(out, ref, atol=1e-5, rtol=1e-5), (
        float(jnp.max(jnp.abs(out - ref)))
    )

    print("KERNEL_OK")
</pallas_src>

<mosaic_0001>
module attributes {stable_mosaic.version = 11 : i64} {
  func.func @_spatial_attn_kernel(%arg0: i32, %arg1: i32, %arg2: memref<1x4x256xf32, #tpu.memory_space<vmem>>, %arg3: memref<98xf32, #tpu.memory_space<smem>>, %arg4: memref<1x1x256xf32, #tpu.memory_space<vmem>>, %arg5: memref<1x256xf32, #tpu.memory_space<vmem>>, %arg6: memref<1x256xf32, #tpu.memory_space<vmem>>) attributes {dimension_semantics = [#tpu.dimension_semantics<parallel>, #tpu.dimension_semantics<arbitrary>], iteration_bounds = array<i64: 2, 1>, scalar_prefetch = 0 : i64, scratch_operands = 2 : i64, tpu.core_type = #tpu.core_type<tc>, window_params = [{transform_indices = @transform_0, window_bounds = array<i64: 1, 4, 256>}, {transform_indices = @transform_1, window_bounds = array<i64: 98>}, {transform_indices = @transform_2, window_bounds = array<i64: 1, 1, 256>}]} {
    %c0_i32 = arith.constant 0 : i32
    %0 = arith.cmpi eq, %arg1, %c0_i32 : i32
    %1 = arith.extui %0 : i1 to i32
    %c0_i32_0 = arith.constant 0 : i32
    %2 = arith.cmpi ne, %1, %c0_i32_0 : i32
    scf.if %2 {
      %cst_14 = arith.constant 0.000000e+00 : f32
      %15 = vector.broadcast %cst_14 : f32 to vector<1x256xf32>
      %c0_15 = arith.constant 0 : index
      %c0_16 = arith.constant 0 : index
      %16 = vector.load %arg5[%c0_15, %c0_16] : memref<1x256xf32, #tpu.memory_space<vmem>>, vector<1x256xf32>
      tpu.vector_store %arg5[%c0_15, %c0_16], %15 {strides = array<i32>} : memref<1x256xf32, #tpu.memory_space<vmem>>, vector<1x256xf32>,
      %cst_17 = arith.constant 0xFF800000 : f32
      %17 = vector.broadcast %cst_17 : f32 to vector<1x256xf32>
      %c0_18 = arith.constant 0 : index
      %c0_19 = arith.constant 0 : index
      %18 = vector.load %arg6[%c0_18, %c0_19] : memref<1x256xf32, #tpu.memory_space<vmem>>, vector<1x256xf32>
      tpu.vector_store %arg6[%c0_18, %c0_19], %17 {strides = array<i32>} : memref<1x256xf32, #tpu.memory_space<vmem>>, vector<1x256xf32>,
    } else {
    }
    %c0 = arith.constant 0 : index
    %c0_1 = arith.constant 0 : index
    %c0_2 = arith.constant 0 : index
    %3 = vector.load %arg2[%c0, %c0_1, %c0_2] : memref<1x4x256xf32, #tpu.memory_space<vmem>>, vector<1x4x256xf32>
    %cst = arith.constant dense<0.000000e+00> : vector<1x256xf32>
    %4 = vector.multi_reduction <add>, %3, %cst [1] : vector<1x4x256xf32> to vector<1x256xf32>
    %cst_3 = arith.constant dense<0xFF800000> : vector<1x256xf32>
    %5 = vector.multi_reduction <maximumf>, %3, %cst_3 [1] : vector<1x4x256xf32> to vector<1x256xf32>
    %c0_4 = arith.constant 0 : index
    %c0_5 = arith.constant 0 : index
    %6 = vector.load %arg5[%c0_4, %c0_5] : memref<1x256xf32, #tpu.memory_space<vmem>>, vector<1x256xf32>
    %7 = arith.addf %6, %4 : vector<1x256xf32>
    %c0_6 = arith.constant 0 : index
    %c0_7 = arith.constant 0 : index
    %8 = vector.load %arg5[%c0_6, %c0_7] : memref<1x256xf32, #tpu.memory_space<vmem>>, vector<1x256xf32>
    tpu.vector_store %arg5[%c0_6, %c0_7], %7 {strides = array<i32>} : memref<1x256xf32, #tpu.memory_space<vmem>>, vector<1x256xf32>,
    %c0_8 = arith.constant 0 : index
    %c0_9 = arith.constant 0 : index
    %9 = vector.load %arg6[%c0_8, %c0_9] : memref<1x256xf32, #tpu.memory_space<vmem>>, vector<1x256xf32>
    %10 = arith.maximumf %9, %5 : vector<1x256xf32>
    %c0_10 = arith.constant 0 : index
    %c0_11 = arith.constant 0 : index
    %11 = vector.load %arg6[%c0_10, %c0_11] : memref<1x256xf32, #tpu.memory_space<vmem>>, vector<1x256xf32>
    tpu.vector_store %arg6[%c0_10, %c0_11], %10 {strides = array<i32>} : memref<1x256xf32, #tpu.memory_space<vmem>>, vector<1x256xf32>,
    %c0_i32_12 = arith.constant 0 : i32
    %12 = arith.cmpi eq, %arg1, %c0_i32_12 : i32
    %13 = arith.extui %12 : i1 to i32
    %c0_i32_13 = arith.constant 0 : i32
    %14 = arith.cmpi ne, %13, %c0_i32_13 : i32
    scf.if %14 {
      %c0_14 = arith.constant 0 : index
      %c0_15 = arith.constant 0 : index
      %15 = vector.load %arg5[%c0_14, %c0_15] : memref<1x256xf32, #tpu.memory_space<vmem>>, vector<1x256xf32>
      %cst_16 = arith.constant 2.500000e-01 : f32
      %16 = vector.broadcast %cst_16 : f32 to vector<1x256xf32>
      %17 = arith.mulf %15, %16 : vector<1x256xf32>
      %c0_17 = arith.constant 0 : index
      %c0_18 = arith.constant 0 : index
      %18 = vector.load %arg6[%c0_17, %c0_18] : memref<1x256xf32, #tpu.memory_space<vmem>>, vector<1x256xf32>
      %c0_19 = arith.constant 0 : index
      %19 = memref.load %arg3[%c0_19] : memref<98xf32, #tpu.memory_space<smem>>
      %c1 = arith.constant 1 : index
      %20 = memref.load %arg3[%c1] : memref<98xf32, #tpu.memory_space<smem>>
      %c2 = arith.constant 2 : index
      %21 = memref.load %arg3[%c2] : memref<98xf32, #tpu.memory_space<smem>>
      %c3 = arith.constant 3 : index
      %22 = memref.load %arg3[%c3] : memref<98xf32, #tpu.memory_space<smem>>
      %c4 = arith.constant 4 : index
      %23 = memref.load %arg3[%c4] : memref<98xf32, #tpu.memory_space<smem>>
      %c5 = arith.constant 5 : index
      %24 = memref.load %arg3[%c5] : memref<98xf32, #tpu.memory_space<smem>>
      %c6 = arith.constant 6 : index
      %25 = memref.load %arg3[%c6] : memref<98xf32, #tpu.memory_space<smem>>
      %c7 = arith.constant 7 : index
      %26 = memref.load %arg3[%c7] : memref<98xf32, #tpu.memory_space<smem>>
      %c8 = arith.constant 8 : index
      %27 = memref.load %arg3[%c8] : memref<98xf32, #tpu.memory_space<smem>>
      %c9 = arith.constant 9 : index
      %28 = memref.load %arg3[%c9] : memref<98xf32, #tpu.memory_space<smem>>
      %c10 = arith.constant 10 : index
      %29 = memref.load %arg3[%c10] : memref<98xf32, #tpu.memory_space<smem>>
      %c11 = arith.constant 11 : index
      %30 = memref.load %arg3[%c11] : memref<98xf32, #tpu.memory_space<smem>>
      %c12 = arith.constant 12 : index
      %31 = memref.load %arg3[%c12] : memref<98xf32, #tpu.memory_space<smem>>
      %c13 = arith.constant 13 : index
      %32 = memref.load %arg3[%c13] : memref<98xf32, #tpu.memory_space<smem>>
      %c14 = arith.constant 14 : index
      %33 = memref.load %arg3[%c14] : memref<98xf32, #tpu.memory_space<smem>>
      %c15 = arith.constant 15 : index
      %34 = memref.load %arg3[%c15] : memref<98xf32, #tpu.memory_space<smem>>
      %c16 = arith.constant 16 : index
      %35 = memref.load %arg3[%c16] : memref<98xf32, #tpu.memory_space<smem>>
      %c17 = arith.constant 17 : index
      %36 = memref.load %arg3[%c17] : memref<98xf32, #tpu.memory_space<smem>>
      %c18 = arith.constant 18 : index
      %37 = memref.load %arg3[%c18] : memref<98xf32, #tpu.memory_space<smem>>
      %c19 = arith.constant 19 : index
      %38 = memref.load %arg3[%c19] : memref<98xf32, #tpu.memory_space<smem>>
      %c20 = arith.constant 20 : index
      %39 = memref.load %arg3[%c20] : memref<98xf32, #tpu.memory_space<smem>>
      %c21 = arith.constant 21 : index
      %40 = memref.load %arg3[%c21] : memref<98xf32, #tpu.memory_space<smem>>
      %c22 = arith.constant 22 : index
      %41 = memref.load %arg3[%c22] : memref<98xf32, #tpu.memory_space<smem>>
      %c23 = arith.constant 23 : index
      %42 = memref.load %arg3[%c23] : memref<98xf32, #tpu.memory_space<smem>>
      %c24 = arith.constant 24 : index
      %43 = memref.load %arg3[%c24] : memref<98xf32, #tpu.memory_space<smem>>
      %c25 = arith.constant 25 : index
      %44 = memref.load %arg3[%c25] : memref<98xf32, #tpu.memory_space<smem>>
      %c26 = arith.constant 26 : index
      %45 = memref.load %arg3[%c26] : memref<98xf32, #tpu.memory_space<smem>>
      %c27 = arith.constant 27 : index
      %46 = memref.load %arg3[%c27] : memref<98xf32, #tpu.memory_space<smem>>
      %c28 = arith.constant 28 : index
      %47 = memref.load %arg3[%c28] : memref<98xf32, #tpu.memory_space<smem>>
      %c29 = arith.constant 29 : index
      %48 = memref.load %arg3[%c29] : memref<98xf32, #tpu.memory_space<smem>>
      %c30 = arith.constant 30 : index
      %49 = memref.load %arg3[%c30] : memref<98xf32, #tpu.memory_space<smem>>
      %c31 = arith.constant 31 : index
      %50 = memref.load %arg3[%c31] : memref<98xf32, #tpu.memory_space<smem>>
      %c32 = arith.constant 32 : index
      %51 = memref.load %arg3[%c32] : memref<98xf32, #tpu.memory_space<smem>>
      %c33 = arith.constant 33 : index
      %52 = memref.load %arg3[%c33] : memref<98xf32, #tpu.memory_space<smem>>
      %c34 = arith.constant 34 : index
      %53 = memref.load %arg3[%c34] : memref<98xf32, #tpu.memory_space<smem>>
      %c35 = arith.constant 35 : index
      %54 = memref.load %arg3[%c35] : memref<98xf32, #tpu.memory_space<smem>>
      %c36 = arith.constant 36 : index
      %55 = memref.load %arg3[%c36] : memref<98xf32, #tpu.memory_space<smem>>
      %c37 = arith.constant 37 : index
      %56 = memref.load %arg3[%c37] : memref<98xf32, #tpu.memory_space<smem>>
      %c38 = arith.constant 38 : index
      %57 = memref.load %arg3[%c38] : memref<98xf32, #tpu.memory_space<smem>>
      %c39 = arith.constant 39 : index
      %58 = memref.load %arg3[%c39] : memref<98xf32, #tpu.memory_space<smem>>
      %c40 = arith.constant 40 : index
      %59 = memref.load %arg3[%c40] : memref<98xf32, #tpu.memory_space<smem>>
      %c41 = arith.constant 41 : index
      %60 = memref.load %arg3[%c41] : memref<98xf32, #tpu.memory_space<smem>>
      %c42 = arith.constant 42 : index
      %61 = memref.load %arg3[%c42] : memref<98xf32, #tpu.memory_space<smem>>
      %c43 = arith.constant 43 : index
      %62 = memref.load %arg3[%c43] : memref<98xf32, #tpu.memory_space<smem>>
      %c44 = arith.constant 44 : index
      %63 = memref.load %arg3[%c44] : memref<98xf32, #tpu.memory_space<smem>>
      %c45 = arith.constant 45 : index
      %64 = memref.load %arg3[%c45] : memref<98xf32, #tpu.memory_space<smem>>
      %c46 = arith.constant 46 : index
      %65 = memref.load %arg3[%c46] : memref<98xf32, #tpu.memory_space<smem>>
      %c47 = arith.constant 47 : index
      %66 = memref.load %arg3[%c47] : memref<98xf32, #tpu.memory_space<smem>>
      %c48 = arith.constant 48 : index
      %67 = memref.load %arg3[%c48] : memref<98xf32, #tpu.memory_space<smem>>
      %c49 = arith.constant 49 : index
      %68 = memref.load %arg3[%c49] : memref<98xf32, #tpu.memory_space<smem>>
      %c50 = arith.constant 50 : index
      %69 = memref.load %arg3[%c50] : memref<98xf32, #tpu.memory_space<smem>>
      %c51 = arith.constant 51 : index
      %70 = memref.load %arg3[%c51] : memref<98xf32, #tpu.memory_space<smem>>
      %c52 = arith.constant 52 : index
      %71 = memref.load %arg3[%c52] : memref<98xf32, #tpu.memory_space<smem>>
      %c53 = arith.constant 53 : index
      %72 = memref.load %arg3[%c53] : memref<98xf32, #tpu.memory_space<smem>>
      %c54 = arith.constant 54 : index
      %73 = memref.load %arg3[%c54] : memref<98xf32, #tpu.memory_space<smem>>
      %c55 = arith.constant 55 : index
      %74 = memref.load %arg3[%c55] : memref<98xf32, #tpu.memory_space<smem>>
      %c56 = arith.constant 56 : index
      %75 = memref.load %arg3[%c56] : memref<98xf32, #tpu.memory_space<smem>>
      %c57 = arith.constant 57 : index
      %76 = memref.load %arg3[%c57] : memref<98xf32, #tpu.memory_space<smem>>
      %c58 = arith.constant 58 : index
      %77 = memref.load %arg3[%c58] : memref<98xf32, #tpu.memory_space<smem>>
      %c59 = arith.constant 59 : index
      %78 = memref.load %arg3[%c59] : memref<98xf32, #tpu.memory_space<smem>>
      %c60 = arith.constant 60 : index
      %79 = memref.load %arg3[%c60] : memref<98xf32, #tpu.memory_space<smem>>
      %c61 = arith.constant 61 : index
      %80 = memref.load %arg3[%c61] : memref<98xf32, #tpu.memory_space<smem>>
      %c62 = arith.constant 62 : index
      %81 = memref.load %arg3[%c62] : memref<98xf32, #tpu.memory_space<smem>>
      %c63 = arith.constant 63 : index
      %82 = memref.load %arg3[%c63] : memref<98xf32, #tpu.memory_space<smem>>
      %c64 = arith.constant 64 : index
      %83 = memref.load %arg3[%c64] : memref<98xf32, #tpu.memory_space<smem>>
      %c65 = arith.constant 65 : index
      %84 = memref.load %arg3[%c65] : memref<98xf32, #tpu.memory_space<smem>>
      %c66 = arith.constant 66 : index
      %85 = memref.load %arg3[%c66] : memref<98xf32, #tpu.memory_space<smem>>
      %c67 = arith.constant 67 : index
      %86 = memref.load %arg3[%c67] : memref<98xf32, #tpu.memory_space<smem>>
      %c68 = arith.constant 68 : index
      %87 = memref.load %arg3[%c68] : memref<98xf32, #tpu.memory_space<smem>>
      %c69 = arith.constant 69 : index
      %88 = memref.load %arg3[%c69] : memref<98xf32, #tpu.memory_space<smem>>
      %c70 = arith.constant 70 : index
      %89 = memref.load %arg3[%c70] : memref<98xf32, #tpu.memory_space<smem>>
      %c71 = arith.constant 71 : index
      %90 = memref.load %arg3[%c71] : memref<98xf32, #tpu.memory_space<smem>>
      %c72 = arith.constant 72 : index
      %91 = memref.load %arg3[%c72] : memref<98xf32, #tpu.memory_space<smem>>
      %c73 = arith.constant 73 : index
      %92 = memref.load %arg3[%c73] : memref<98xf32, #tpu.memory_space<smem>>
      %c74 = arith.constant 74 : index
      %93 = memref.load %arg3[%c74] : memref<98xf32, #tpu.memory_space<smem>>
      %c75 = arith.constant 75 : index
      %94 = memref.load %arg3[%c75] : memref<98xf32, #tpu.memory_space<smem>>
      %c76 = arith.constant 76 : index
      %95 = memref.load %arg3[%c76] : memref<98xf32, #tpu.memory_space<smem>>
      %c77 = arith.constant 77 : index
      %96 = memref.load %arg3[%c77] : memref<98xf32, #tpu.memory_space<smem>>
      %c78 = arith.constant 78 : index
      %97 = memref.load %arg3[%c78] : memref<98xf32, #tpu.memory_space<smem>>
      %c79 = arith.constant 79 : index
      %98 = memref.load %arg3[%c79] : memref<98xf32, #tpu.memory_space<smem>>
      %c80 = arith.constant 80 : index
      %99 = memref.load %arg3[%c80] : memref<98xf32, #tpu.memory_space<smem>>
      %c81 = arith.constant 81 : index
      %100 = memref.load %arg3[%c81] : memref<98xf32, #tpu.memory_space<smem>>
      %c82 = arith.constant 82 : index
      %101 = memref.load %arg3[%c82] : memref<98xf32, #tpu.memory_space<smem>>
      %c83 = arith.constant 83 : index
      %102 = memref.load %arg3[%c83] : memref<98xf32, #tpu.memory_space<smem>>
      %c84 = arith.constant 84 : index
      %103 = memref.load %arg3[%c84] : memref<98xf32, #tpu.memory_space<smem>>
      %c85 = arith.constant 85 : index
      %104 = memref.load %arg3[%c85] : memref<98xf32, #tpu.memory_space<smem>>
      %c86 = arith.constant 86 : index
      %105 = memref.load %arg3[%c86] : memref<98xf32, #tpu.memory_space<smem>>
      %c87 = arith.constant 87 : index
      %106 = memref.load %arg3[%c87] : memref<98xf32, #tpu.memory_space<smem>>
      %c88 = arith.constant 88 : index
      %107 = memref.load %arg3[%c88] : memref<98xf32, #tpu.memory_space<smem>>
      %c89 = arith.constant 89 : index
      %108 = memref.load %arg3[%c89] : memref<98xf32, #tpu.memory_space<smem>>
      %c90 = arith.constant 90 : index
      %109 = memref.load %arg3[%c90] : memref<98xf32, #tpu.memory_space<smem>>
      %c91 = arith.constant 91 : index
      %110 = memref.load %arg3[%c91] : memref<98xf32, #tpu.memory_space<smem>>
      %c92 = arith.constant 92 : index
      %111 = memref.load %arg3[%c92] : memref<98xf32, #tpu.memory_space<smem>>
      %c93 = arith.constant 93 : index
      %112 = memref.load %arg3[%c93] : memref<98xf32, #tpu.memory_space<smem>>
      %c94 = arith.constant 94 : index
      %113 = memref.load %arg3[%c94] : memref<98xf32, #tpu.memory_space<smem>>
      %c95 = arith.constant 95 : index
      %114 = memref.load %arg3[%c95] : memref<98xf32, #tpu.memory_space<smem>>
      %c96 = arith.constant 96 : index
      %115 = memref.load %arg3[%c96] : memref<98xf32, #tpu.memory_space<smem>>
      %c97 = arith.constant 97 : index
      %116 = memref.load %arg3[%c97] : memref<98xf32, #tpu.memory_space<smem>>
      %cst_20 = arith.constant 0.000000e+00 : f32
      %117 = vector.broadcast %cst_20 : f32 to vector<1x51xf32>
      %118 = tpu.concatenate %117, %17, %117 in 1 : vector<1x51xf32>, vector<1x256xf32>, vector<1x51xf32> -> vector<1x358xf32>
      %119 = tpu.concatenate %117, %18, %117 in 1 : vector<1x51xf32>, vector<1x256xf32>, vector<1x51xf32> -> vector<1x358xf32>
      %120 = tpu.iota {dimensions = array<i32: 1>} : vector<1x256xi32>
      %c16_i32 = arith.constant 16 : i32
      %c0_i32_21 = arith.constant 0 : i32
      %121 = arith.cmpi eq, %c16_i32, %c0_i32_21 : i32
      %c1_i32 = arith.constant 1 : i32
      %122 = arith.select %121, %c1_i32, %c16_i32 : i32
      %123 = vector.broadcast %122 : i32 to vector<1x256xi32>
      %124 = arith.remsi %120, %123 : vector<1x256xi32>
      %c0_i32_22 = arith.constant 0 : i32
      %125 = vector.broadcast %c0_i32_22 : i32 to vector<1x256xi32>
      %126 = arith.cmpi ne, %124, %125 : vector<1x256xi32>
      %c0_i32_23 = arith.constant 0 : i32
      %127 = vector.broadcast %c0_i32_23 : i32 to vector<1x256xi32>
      %128 = arith.cmpi slt, %124, %127 : vector<1x256xi32>
      %c0_i32_24 = arith.constant 0 : i32
      %129 = arith.cmpi slt, %122, %c0_i32_24 : i32
      %130 = vector.broadcast %129 : i1 to vector<1x256xi1>
      %131 = vector.broadcast %130 : vector<1x256xi1> to vector<1x256xi1>
      %132 = arith.xori %128, %131 : vector<1x256xi1>
      %133 = arith.andi %132, %126 : vector<1x256xi1>
      %134 = vector.broadcast %122 : i32 to vector<1x256xi32>
      %135 = arith.addi %124, %134 : vector<1x256xi32>
      %136 = arith.select %133, %135, %124 : vector<1x256xi1>, vector<1x256xi32>
      %cst_25 = arith.constant 0.000000e+00 : f32
      %137 = vector.broadcast %cst_25 : f32 to vector<1x256xf32>
      %cst_26 = arith.constant 0.000000e+00 : f32
      %138 = vector.broadcast %cst_26 : f32 to vector<1x256xf32>
      %139 = vector.extract_strided_slice %118 {offsets = [0, 0], sizes = [1, 256], strides = [1, 1]} : vector<1x358xf32> to vector<1x256xf32>
      %140 = vector.broadcast %19 : f32 to vector<1x256xf32>
      %141 = arith.mulf %139, %140 : vector<1x256xf32>
      %142 = arith.addf %138, %141 : vector<1x256xf32>
      %143 = vector.extract_strided_slice %118 {offsets = [0, 16], sizes = [1, 256], strides = [1, 1]} : vector<1x358xf32> to vector<1x256xf32>
      %144 = vector.broadcast %26 : f32 to vector<1x256xf32>
      %145 = arith.mulf %143, %144 : vector<1x256xf32>
      %146 = arith.addf %142, %145 : vector<1x256xf32>
      %147 = vector.extract_strided_slice %118 {offsets = [0, 32], sizes = [1, 256], strides = [1, 1]} : vector<1x358xf32> to vector<1x256xf32>
      %148 = vector.broadcast %33 : f32 to vector<1x256xf32>
      %149 = arith.mulf %147, %148 : vector<1x256xf32>
      %150 = arith.addf %146, %149 : vector<1x256xf32>
      %151 = vector.extract_strided_slice %118 {offsets = [0, 48], sizes = [1, 256], strides = [1, 1]} : vector<1x358xf32> to vector<1x256xf32>
      %152 = vector.broadcast %40 : f32 to vector<1x256xf32>
      %153 = arith.mulf %151, %152 : vector<1x256xf32>
      %154 = arith.addf %150, %153 : vector<1x256xf32>
      %155 = vector.extract_strided_slice %118 {offsets = [0, 64], sizes = [1, 256], strides = [1, 1]} : vector<1x358xf32> to vector<1x256xf32>
      %156 = vector.broadcast %47 : f32 to vector<1x256xf32>
      %157 = arith.mulf %155, %156 : vector<1x256xf32>
      %158 = arith.addf %154, %157 : vector<1x256xf32>
      %159 = vector.extract_strided_slice %118 {offsets = [0, 80], sizes = [1, 256], strides = [1, 1]} : vector<1x358xf32> to vector<1x256xf32>
      %160 = vector.broadcast %54 : f32 to vector<1x256xf32>
      %161 = arith.mulf %159, %160 : vector<1x256xf32>
      %162 = arith.addf %158, %161 : vector<1x256xf32>
      %163 = vector.extract_strided_slice %118 {offsets = [0, 96], sizes = [1, 256], strides = [1, 1]} : vector<1x358xf32> to vector<1x256xf32>
      %164 = vector.broadcast %61 : f32 to vector<1x256xf32>
      %165 = arith.mulf %163, %164 : vector<1x256xf32>
      %166 = arith.addf %162, %165 : vector<1x256xf32>
      %167 = vector.extract_strided_slice %119 {offsets = [0, 0], sizes = [1, 256], strides = [1, 1]} : vector<1x358xf32> to vector<1x256xf32>
      %168 = vector.broadcast %68 : f32 to vector<1x256xf32>
      %169 = arith.mulf %167, %168 : vector<1x256xf32>
      %170 = arith.addf %166, %169 : vector<1x256xf32>
      %171 = vector.extract_strided_slice %119 {offsets = [0, 16], sizes = [1, 256], strides = [1, 1]} : vector<1x358xf32> to vector<1x256xf32>
      %172 = vector.broadcast %75 : f32 to vector<1x256xf32>
      %173 = arith.mulf %171, %172 : vector<1x256xf32>
      %174 = arith.addf %170, %173 : vector<1x256xf32>
      %175 = vector.extract_strided_slice %119 {offsets = [0, 32], sizes = [1, 256], strides = [1, 1]} : vector<1x358xf32> to vector<1x256xf32>
      %176 = vector.broadcast %82 : f32 to vector<1x256xf32>
      %177 = arith.mulf %175, %176 : vector<1x256xf32>
      %178 = arith.addf %174, %177 : vector<1x256xf32>
      %179 = vector.extract_strided_slice %119 {offsets = [0, 48], sizes = [1, 256], strides = [1, 1]} : vector<1x358xf32> to vector<1x256xf32>
      %180 = vector.broadcast %89 : f32 to vector<1x256xf32>
      %181 = arith.mulf %179, %180 : vector<1x256xf32>
      %182 = arith.addf %178, %181 : vector<1x256xf32>
      %183 = vector.extract_strided_slice %119 {offsets = [0, 64], sizes = [1, 256], strides = [1, 1]} : vector<1x358xf32> to vector<1x256xf32>
      %184 = vector.broadcast %96 : f32 to vector<1x256xf32>
      %185 = arith.mulf %183, %184 : vector<1x256xf32>
      %186 = arith.addf %182, %185 : vector<1x256xf32>
      %187 = vector.extract_strided_slice %119 {offsets = [0, 80], sizes = [1, 256], strides = [1, 1]} : vector<1x358xf32> to vector<1x256xf32>
      %188 = vector.broadcast %103 : f32 to vector<1x256xf32>
      %189 = arith.mulf %187, %188 : vector<1x256xf32>
      %190 = arith.addf %186, %189 : vector<1x256xf32>
      %191 = vector.extract_strided_slice %119 {offsets = [0, 96], sizes = [1, 256], strides = [1, 1]} : vector<1x358xf32> to vector<1x256xf32>
      %192 = vector.broadcast %110 : f32 to vector<1x256xf32>
      %193 = arith.mulf %191, %192 : vector<1x256xf32>
      %194 = arith.addf %190, %193 : vector<1x256xf32>
      %c-3_i32 = arith.constant -3 : i32
      %195 = vector.broadcast %c-3_i32 : i32 to vector<1x256xi32>
      %196 = arith.addi %136, %195 : vector<1x256xi32>
      %c0_i32_27 = arith.constant 0 : i32
      %197 = vector.broadcast %c0_i32_27 : i32 to vector<1x256xi32>
      %198 = arith.cmpi sge, %196, %197 : vector<1x256xi32>
      %c-3_i32_28 = arith.constant -3 : i32
      %199 = vector.broadcast %c-3_i32_28 : i32 to vector<1x256xi32>
      %200 = arith.addi %136, %199 : vector<1x256xi32>
      %c16_i32_29 = arith.constant 16 : i32
      %201 = vector.broadcast %c16_i32_29 : i32 to vector<1x256xi32>
      %202 = arith.cmpi slt, %200, %201 : vector<1x256xi32>
      %203 = arith.andi %198, %202 : vector<1x256xi1>
      %204 = arith.extui %203 : vector<1x256xi1> to vector<1x256xi32>
      %205 = arith.sitofp %204 : vector<1x256xi32> to vector<1x256xf32>
      %206 = arith.mulf %194, %205 : vector<1x256xf32>
      %207 = arith.addf %137, %206 : vector<1x256xf32>
      %cst_30 = arith.constant 0.000000e+00 : f32
      %208 = vector.broadcast %cst_30 : f32 to vector<1x256xf32>
      %209 = vector.extract_strided_slice %118 {offsets = [0, 1], sizes = [1, 256], strides = [1, 1]} : vector<1x358xf32> to vector<1x256xf32>
      %210 = vector.broadcast %20 : f32 to vector<1x256xf32>
      %211 = arith.mulf %209, %210 : vector<1x256xf32>
      %212 = arith.addf %208, %211 : vector<1x256xf32>
      %213 = vector.extract_strided_slice %118 {offsets = [0, 17], sizes = [1, 256], strides = [1, 1]} : vector<1x358xf32> to vector<1x256xf32>
      %214 = vector.broadcast %27 : f32 to vector<1x256xf32>
      %215 = arith.mulf %213, %214 : vector<1x256xf32>
      %216 = arith.addf %212, %215 : vector<1x256xf32>
      %217 = vector.extract_strided_slice %118 {offsets = [0, 33], sizes = [1, 256], strides = [1, 1]} : vector<1x358xf32> to vector<1x256xf32>
      %218 = vector.broadcast %34 : f32 to vector<1x256xf32>
      %219 = arith.mulf %217, %218 : vector<1x256xf32>
      %220 = arith.addf %216, %219 : vector<1x256xf32>
      %221 = vector.extract_strided_slice %118 {offsets = [0, 49], sizes = [1, 256], strides = [1, 1]} : vector<1x358xf32> to vector<1x256xf32>
      %222 = vector.broadcast %41 : f32 to vector<1x256xf32>
      %223 = arith.mulf %221, %222 : vector<1x256xf32>
      %224 = arith.addf %220, %223 : vector<1x256xf32>
      %225 = vector.extract_strided_slice %118 {offsets = [0, 65], sizes = [1, 256], strides = [1, 1]} : vector<1x358xf32> to vector<1x256xf32>
      %226 = vector.broadcast %48 : f32 to vector<1x256xf32>
      %227 = arith.mulf %225, %226 : vector<1x256xf32>
      %228 = arith.addf %224, %227 : vector<1x256xf32>
      %229 = vector.extract_strided_slice %118 {offsets = [0, 81], sizes = [1, 256], strides = [1, 1]} : vector<1x358xf32> to vector<1x256xf32>
      %230 = vector.broadcast %55 : f32 to vector<1x256xf32>
      %231 = arith.mulf %229, %230 : vector<1x256xf32>
      %232 = arith.addf %228, %231 : vector<1x256xf32>
      %233 = vector.extract_strided_slice %118 {offsets = [0, 97], sizes = [1, 256], strides = [1, 1]} : vector<1x358xf32> to vector<1x256xf32>
      %234 = vector.broadcast %62 : f32 to vector<1x256xf32>
      %235 = arith.mulf %233, %234 : vector<1x256xf32>
      %236 = arith.addf %232, %235 : vector<1x256xf32>
      %237 = vector.extract_strided_slice %119 {offsets = [0, 1], sizes = [1, 256], strides = [1, 1]} : vector<1x358xf32> to vector<1x256xf32>
      %238 = vector.broadcast %69 : f32 to vector<1x256xf32>
      %239 = arith.mulf %237, %238 : vector<1x256xf32>
      %240 = arith.addf %236, %239 : vector<1x256xf32>
      %241 = vector.extract_strided_slice %119 {offsets = [0, 17], sizes = [1, 256], strides = [1, 1]} : vector<1x358xf32> to vector<1x256xf32>
      %242 = vector.broadcast %76 : f32 to vector<1x256xf32>
      %243 = arith.mulf %241, %242 : vector<1x256xf32>
      %244 = arith.addf %240, %243 : vector<1x256xf32>
      %245 = vector.extract_strided_slice %119 {offsets = [0, 33], sizes = [1, 256], strides = [1, 1]} : vector<1x358xf32> to vector<1x256xf32>
      %246 = vector.broadcast %83 : f32 to vector<1x256xf32>
      %247 = arith.mulf %245, %246 : vector<1x256xf32>
      %248 = arith.addf %244, %247 : vector<1x256xf32>
      %249 = vector.extract_strided_slice %119 {offsets = [0, 49], sizes = [1, 256], strides = [1, 1]} : vector<1x358xf32> to vector<1x256xf32>
      %250 = vector.broadcast %90 : f32 to vector<1x256xf32>
      %251 = arith.mulf %249, %250 : vector<1x256xf32>
      %252 = arith.addf %248, %251 : vector<1x256xf32>
      %253 = vector.extract_strided_slice %119 {offsets = [0, 65], sizes = [1, 256], strides = [1, 1]} : vector<1x358xf32> to vector<1x256xf32>
      %254 = vector.broadcast %97 : f32 to vector<1x256xf32>
      %255 = arith.mulf %253, %254 : vector<1x256xf32>
      %256 = arith.addf %252, %255 : vector<1x256xf32>
      %257 = vector.extract_strided_slice %119 {offsets = [0, 81], sizes = [1, 256], strides = [1, 1]} : vector<1x358xf32> to vector<1x256xf32>
      %258 = vector.broadcast %104 : f32 to vector<1x256xf32>
      %259 = arith.mulf %257, %258 : vector<1x256xf32>
      %260 = arith.addf %256, %259 : vector<1x256xf32>
      %261 = vector.extract_strided_slice %119 {offsets = [0, 97], sizes = [1, 256], strides = [1, 1]} : vector<1x358xf32> to vector<1x256xf32>
      %262 = vector.broadcast %111 : f32 to vector<1x256xf32>
      %263 = arith.mulf %261, %262 : vector<1x256xf32>
      %264 = arith.addf %260, %263 : vector<1x256xf32>
      %c-2_i32 = arith.constant -2 : i32
      %265 = vector.broadcast %c-2_i32 : i32 to vector<1x256xi32>
      %266 = arith.addi %136, %265 : vector<1x256xi32>
      %c0_i32_31 = arith.constant 0 : i32
      %267 = vector.broadcast %c0_i32_31 : i32 to vector<1x256xi32>
      %268 = arith.cmpi sge, %266, %267 : vector<1x256xi32>
      %c-2_i32_32 = arith.constant -2 : i32
      %269 = vector.broadcast %c-2_i32_32 : i32 to vector<1x256xi32>
      %270 = arith.addi %136, %269 : vector<1x256xi32>
      %c16_i32_33 = arith.constant 16 : i32
      %271 = vector.broadcast %c16_i32_33 : i32 to vector<1x256xi32>
      %272 = arith.cmpi slt, %270, %271 : vector<1x256xi32>
      %273 = arith.andi %268, %272 : vector<1x256xi1>
      %274 = arith.extui %273 : vector<1x256xi1> to vector<1x256xi32>
      %275 = arith.sitofp %274 : vector<1x256xi32> to vector<1x256xf32>
      %276 = arith.mulf %264, %275 : vector<1x256xf32>
      %277 = arith.addf %207, %276 : vector<1x256xf32>
      %cst_34 = arith.constant 0.000000e+00 : f32
      %278 = vector.broadcast %cst_34 : f32 to vector<1x256xf32>
      %279 = vector.extract_strided_slice %118 {offsets = [0, 2], sizes = [1, 256], strides = [1, 1]} : vector<1x358xf32> to vector<1x256xf32>
      %280 = vector.broadcast %21 : f32 to vector<1x256xf32>
      %281 = arith.mulf %279, %280 : vector<1x256xf32>
      %282 = arith.addf %278, %281 : vector<1x256xf32>
      %283 = vector.extract_strided_slice %118 {offsets = [0, 18], sizes = [1, 256], strides = [1, 1]} : vector<1x358xf32> to vector<1x256xf32>
      %284 = vector.broadcast %28 : f32 to vector<1x256xf32>
      %285 = arith.mulf %283, %284 : vector<1x256xf32>
      %286 = arith.addf %282, %285 : vector<1x256xf32>
      %287 = vector.extract_strided_slice %118 {offsets = [0, 34], sizes = [1, 256], strides = [1, 1]} : vector<1x358xf32> to vector<1x256xf32>
      %288 = vector.broadcast %35 : f32 to vector<1x256xf32>
      %289 = arith.mulf %287, %288 : vector<1x256xf32>
      %290 = arith.addf %286, %289 : vector<1x256xf32>
      %291 = vector.extract_strided_slice %118 {offsets = [0, 50], sizes = [1, 256], strides = [1, 1]} : vector<1x358xf32> to vector<1x256xf32>
      %292 = vector.broadcast %42 : f32 to vector<1x256xf32>
      %293 = arith.mulf %291, %292 : vector<1x256xf32>
      %294 = arith.addf %290, %293 : vector<1x256xf32>
      %295 = vector.extract_strided_slice %118 {offsets = [0, 66], sizes = [1, 256], strides = [1, 1]} : vector<1x358xf32> to vector<1x256xf32>
      %296 = vector.broadcast %49 : f32 to vector<1x256xf32>
      %297 = arith.mulf %295, %296 : vector<1x256xf32>
      %298 = arith.addf %294, %297 : vector<1x256xf32>
      %299 = vector.extract_strided_slice %118 {offsets = [0, 82], sizes = [1, 256], strides = [1, 1]} : vector<1x358xf32> to vector<1x256xf32>
      %300 = vector.broadcast %56 : f32 to vector<1x256xf32>
      %301 = arith.mulf %299, %300 : vector<1x256xf32>
      %302 = arith.addf %298, %301 : vector<1x256xf32>
      %303 = vector.extract_strided_slice %118 {offsets = [0, 98], sizes = [1, 256], strides = [1, 1]} : vector<1x358xf32> to vector<1x256xf32>
      %304 = vector.broadcast %63 : f32 to vector<1x256xf32>
      %305 = arith.mulf %303, %304 : vector<1x256xf32>
      %306 = arith.addf %302, %305 : vector<1x256xf32>
      %307 = vector.extract_strided_slice %119 {offsets = [0, 2], sizes = [1, 256], strides = [1, 1]} : vector<1x358xf32> to vector<1x256xf32>
      %308 = vector.broadcast %70 : f32 to vector<1x256xf32>
      %309 = arith.mulf %307, %308 : vector<1x256xf32>
      %310 = arith.addf %306, %309 : vector<1x256xf32>
      %311 = vector.extract_strided_slice %119 {offsets = [0, 18], sizes = [1, 256], strides = [1, 1]} : vector<1x358xf32> to vector<1x256xf32>
      %312 = vector.broadcast %77 : f32 to vector<1x256xf32>
      %313 = arith.mulf %311, %312 : vector<1x256xf32>
      %314 = arith.addf %310, %313 : vector<1x256xf32>
      %315 = vector.extract_strided_slice %119 {offsets = [0, 34], sizes = [1, 256], strides = [1, 1]} : vector<1x358xf32> to vector<1x256xf32>
      %316 = vector.broadcast %84 : f32 to vector<1x256xf32>
      %317 = arith.mulf %315, %316 : vector<1x256xf32>
      %318 = arith.addf %314, %317 : vector<1x256xf32>
      %319 = vector.extract_strided_slice %119 {offsets = [0, 50], sizes = [1, 256], strides = [1, 1]} : vector<1x358xf32> to vector<1x256xf32>
      %320 = vector.broadcast %91 : f32 to vector<1x256xf32>
      %321 = arith.mulf %319, %320 : vector<1x256xf32>
      %322 = arith.addf %318, %321 : vector<1x256xf32>
      %323 = vector.extract_strided_slice %119 {offsets = [0, 66], sizes = [1, 256], strides = [1, 1]} : vector<1x358xf32> to vector<1x256xf32>
      %324 = vector.broadcast %98 : f32 to vector<1x256xf32>
      %325 = arith.mulf %323, %324 : vector<1x256xf32>
      %326 = arith.addf %322, %325 : vector<1x256xf32>
      %327 = vector.extract_strided_slice %119 {offsets = [0, 82], sizes = [1, 256], strides = [1, 1]} : vector<1x358xf32> to vector<1x256xf32>
      %328 = vector.broadcast %105 : f32 to vector<1x256xf32>
      %329 = arith.mulf %327, %328 : vector<1x256xf32>
      %330 = arith.addf %326, %329 : vector<1x256xf32>
      %331 = vector.extract_strided_slice %119 {offsets = [0, 98], sizes = [1, 256], strides = [1, 1]} : vector<1x358xf32> to vector<1x256xf32>
      %332 = vector.broadcast %112 : f32 to vector<1x256xf32>
      %333 = arith.mulf %331, %332 : vector<1x256xf32>
      %334 = arith.addf %330, %333 : vector<1x256xf32>
      %c-1_i32 = arith.constant -1 : i32
      %335 = vector.broadcast %c-1_i32 : i32 to vector<1x256xi32>
      %336 = arith.addi %136, %335 : vector<1x256xi32>
      %c0_i32_35 = arith.constant 0 : i32
      %337 = vector.broadcast %c0_i32_35 : i32 to vector<1x256xi32>
      %338 = arith.cmpi sge, %336, %337 : vector<1x256xi32>
      %c-1_i32_36 = arith.constant -1 : i32
      %339 = vector.broadcast %c-1_i32_36 : i32 to vector<1x256xi32>
      %340 = arith.addi %136, %339 : vector<1x256xi32>
      %c16_i32_37 = arith.constant 16 : i32
      %341 = vector.broadcast %c16_i32_37 : i32 to vector<1x256xi32>
      %342 = arith.cmpi slt, %340, %341 : vector<1x256xi32>
      %343 = arith.andi %338, %342 : vector<1x256xi1>
      %344 = arith.extui %343 : vector<1x256xi1> to vector<1x256xi32>
      %345 = arith.sitofp %344 : vector<1x256xi32> to vector<1x256xf32>
      %346 = arith.mulf %334, %345 : vector<1x256xf32>
      %347 = arith.addf %277, %346 : vector<1x256xf32>
      %cst_38 = arith.constant 0.000000e+00 : f32
      %348 = vector.broadcast %cst_38 : f32 to vector<1x256xf32>
      %349 = vector.extract_strided_slice %118 {offsets = [0, 3], sizes = [1, 256], strides = [1, 1]} : vector<1x358xf32> to vector<1x256xf32>
      %350 = vector.broadcast %22 : f32 to vector<1x256xf32>
      %351 = arith.mulf %349, %350 : vector<1x256xf32>
      %352 = arith.addf %348, %351 : vector<1x256xf32>
      %353 = vector.extract_strided_slice %118 {offsets = [0, 19], sizes = [1, 256], strides = [1, 1]} : vector<1x358xf32> to vector<1x256xf32>
      %354 = vector.broadcast %29 : f32 to vector<1x256xf32>
      %355 = arith.mulf %353, %354 : vector<1x256xf32>
      %356 = arith.addf %352, %355 : vector<1x256xf32>
      %357 = vector.extract_strided_slice %118 {offsets = [0, 35], sizes = [1, 256], strides = [1, 1]} : vector<1x358xf32> to vector<1x256xf32>
      %358 = vector.broadcast %36 : f32 to vector<1x256xf32>
      %359 = arith.mulf %357, %358 : vector<1x256xf32>
      %360 = arith.addf %356, %359 : vector<1x256xf32>
      %361 = vector.extract_strided_slice %118 {offsets = [0, 51], sizes = [1, 256], strides = [1, 1]} : vector<1x358xf32> to vector<1x256xf32>
      %362 = vector.broadcast %43 : f32 to vector<1x256xf32>
      %363 = arith.mulf %361, %362 : vector<1x256xf32>
      %364 = arith.addf %360, %363 : vector<1x256xf32>
      %365 = vector.extract_strided_slice %118 {offsets = [0, 67], sizes = [1, 256], strides = [1, 1]} : vector<1x358xf32> to vector<1x256xf32>
      %366 = vector.broadcast %50 : f32 to vector<1x256xf32>
      %367 = arith.mulf %365, %366 : vector<1x256xf32>
      %368 = arith.addf %364, %367 : vector<1x256xf32>
      %369 = vector.extract_strided_slice %118 {offsets = [0, 83], sizes = [1, 256], strides = [1, 1]} : vector<1x358xf32> to vector<1x256xf32>
      %370 = vector.broadcast %57 : f32 to vector<1x256xf32>
      %371 = arith.mulf %369, %370 : vector<1x256xf32>
      %372 = arith.addf %368, %371 : vector<1x256xf32>
      %373 = vector.extract_strided_slice %118 {offsets = [0, 99], sizes = [1, 256], strides = [1, 1]} : vector<1x358xf32> to vector<1x256xf32>
      %374 = vector.broadcast %64 : f32 to vector<1x256xf32>
      %375 = arith.mulf %373, %374 : vector<1x256xf32>
      %376 = arith.addf %372, %375 : vector<1x256xf32>
      %377 = vector.extract_strided_slice %119 {offsets = [0, 3], sizes = [1, 256], strides = [1, 1]} : vector<1x358xf32> to vector<1x256xf32>
      %378 = vector.broadcast %71 : f32 to vector<1x256xf32>
      %379 = arith.mulf %377, %378 : vector<1x256xf32>
      %380 = arith.addf %376, %379 : vector<1x256xf32>
      %381 = vector.extract_strided_slice %119 {offsets = [0, 19], sizes = [1, 256], strides = [1, 1]} : vector<1x358xf32> to vector<1x256xf32>
      %382 = vector.broadcast %78 : f32 to vector<1x256xf32>
      %383 = arith.mulf %381, %382 : vector<1x256xf32>
      %384 = arith.addf %380, %383 : vector<1x256xf32>
      %385 = vector.extract_strided_slice %119 {offsets = [0, 35], sizes = [1, 256], strides = [1, 1]} : vector<1x358xf32> to vector<1x256xf32>
      %386 = vector.broadcast %85 : f32 to vector<1x256xf32>
      %387 = arith.mulf %385, %386 : vector<1x256xf32>
      %388 = arith.addf %384, %387 : vector<1x256xf32>
      %389 = vector.extract_strided_slice %119 {offsets = [0, 51], sizes = [1, 256], strides = [1, 1]} : vector<1x358xf32> to vector<1x256xf32>
      %390 = vector.broadcast %92 : f32 to vector<1x256xf32>
      %391 = arith.mulf %389, %390 : vector<1x256xf32>
      %392 = arith.addf %388, %391 : vector<1x256xf32>
      %393 = vector.extract_strided_slice %119 {offsets = [0, 67], sizes = [1, 256], strides = [1, 1]} : vector<1x358xf32> to vector<1x256xf32>
      %394 = vector.broadcast %99 : f32 to vector<1x256xf32>
      %395 = arith.mulf %393, %394 : vector<1x256xf32>
      %396 = arith.addf %392, %395 : vector<1x256xf32>
      %397 = vector.extract_strided_slice %119 {offsets = [0, 83], sizes = [1, 256], strides = [1, 1]} : vector<1x358xf32> to vector<1x256xf32>
      %398 = vector.broadcast %106 : f32 to vector<1x256xf32>
      %399 = arith.mulf %397, %398 : vector<1x256xf32>
      %400 = arith.addf %396, %399 : vector<1x256xf32>
      %401 = vector.extract_strided_slice %119 {offsets = [0, 99], sizes = [1, 256], strides = [1, 1]} : vector<1x358xf32> to vector<1x256xf32>
      %402 = vector.broadcast %113 : f32 to vector<1x256xf32>
      %403 = arith.mulf %401, %402 : vector<1x256xf32>
      %404 = arith.addf %400, %403 : vector<1x256xf32>
      %c0_i32_39 = arith.constant 0 : i32
      %405 = vector.broadcast %c0_i32_39 : i32 to vector<1x256xi32>
      %406 = arith.addi %136, %405 : vector<1x256xi32>
      %c0_i32_40 = arith.constant 0 : i32
      %407 = vector.broadcast %c0_i32_40 : i32 to vector<1x256xi32>
      %408 = arith.cmpi sge, %406, %407 : vector<1x256xi32>
      %c0_i32_41 = arith.constant 0 : i32
      %409 = vector.broadcast %c0_i32_41 : i32 to vector<1x256xi32>
      %410 = arith.addi %136, %409 : vector<1x256xi32>
      %c16_i32_42 = arith.constant 16 : i32
      %411 = vector.broadcast %c16_i32_42 : i32 to vector<1x256xi32>
      %412 = arith.cmpi slt, %410, %411 : vector<1x256xi32>
      %413 = arith.andi %408, %412 : vector<1x256xi1>
      %414 = arith.extui %413 : vector<1x256xi1> to vector<1x256xi32>
      %415 = arith.sitofp %414 : vector<1x256xi32> to vector<1x256xf32>
      %416 = arith.mulf %404, %415 : vector<1x256xf32>
      %417 = arith.addf %347, %416 : vector<1x256xf32>
      %cst_43 = arith.constant 0.000000e+00 : f32
      %418 = vector.broadcast %cst_43 : f32 to vector<1x256xf32>
      %419 = vector.extract_strided_slice %118 {offsets = [0, 4], sizes = [1, 256], strides = [1, 1]} : vector<1x358xf32> to vector<1x256xf32>
      %420 = vector.broadcast %23 : f32 to vector<1x256xf32>
      %421 = arith.mulf %419, %420 : vector<1x256xf32>
      %422 = arith.addf %418, %421 : vector<1x256xf32>
      %423 = vector.extract_strided_slice %118 {offsets = [0, 20], sizes = [1, 256], strides = [1, 1]} : vector<1x358xf32> to vector<1x256xf32>
      %424 = vector.broadcast %30 : f32 to vector<1x256xf32>
      %425 = arith.mulf %423, %424 : vector<1x256xf32>
      %426 = arith.addf %422, %425 : vector<1x256xf32>
      %427 = vector.extract_strided_slice %118 {offsets = [0, 36], sizes = [1, 256], strides = [1, 1]} : vector<1x358xf32> to vector<1x256xf32>
      %428 = vector.broadcast %37 : f32 to vector<1x256xf32>
      %429 = arith.mulf %427, %428 : vector<1x256xf32>
      %430 = arith.addf %426, %429 : vector<1x256xf32>
      %431 = vector.extract_strided_slice %118 {offsets = [0, 52], sizes = [1, 256], strides = [1, 1]} : vector<1x358xf32> to vector<1x256xf32>
      %432 = vector.broadcast %44 : f32 to vector<1x256xf32>
      %433 = arith.mulf %431, %432 : vector<1x256xf32>
      %434 = arith.addf %430, %433 : vector<1x256xf32>
      %435 = vector.extract_strided_slice %118 {offsets = [0, 68], sizes = [1, 256], strides = [1, 1]} : vector<1x358xf32> to vector<1x256xf32>
      %436 = vector.broadcast %51 : f32 to vector<1x256xf32>
      %437 = arith.mulf %435, %436 : vector<1x256xf32>
      %438 = arith.addf %434, %437 : vector<1x256xf32>
      %439 = vector.extract_strided_slice %118 {offsets = [0, 84], sizes = [1, 256], strides = [1, 1]} : vector<1x358xf32> to vector<1x256xf32>
      %440 = vector.broadcast %58 : f32 to vector<1x256xf32>
      %441 = arith.mulf %439, %440 : vector<1x256xf32>
      %442 = arith.addf %438, %441 : vector<1x256xf32>
      %443 = vector.extract_strided_slice %118 {offsets = [0, 100], sizes = [1, 256], strides = [1, 1]} : vector<1x358xf32> to vector<1x256xf32>
      %444 = vector.broadcast %65 : f32 to vector<1x256xf32>
      %445 = arith.mulf %443, %444 : vector<1x256xf32>
      %446 = arith.addf %442, %445 : vector<1x256xf32>
      %447 = vector.extract_strided_slice %119 {offsets = [0, 4], sizes = [1, 256], strides = [1, 1]} : vector<1x358xf32> to vector<1x256xf32>
      %448 = vector.broadcast %72 : f32 to vector<1x256xf32>
      %449 = arith.mulf %447, %448 : vector<1x256xf32>
      %450 = arith.addf %446, %449 : vector<1x256xf32>
      %451 = vector.extract_strided_slice %119 {offsets = [0, 20], sizes = [1, 256], strides = [1, 1]} : vector<1x358xf32> to vector<1x256xf32>
      %452 = vector.broadcast %79 : f32 to vector<1x256xf32>
      %453 = arith.mulf %451, %452 : vector<1x256xf32>
      %454 = arith.addf %450, %453 : vector<1x256xf32>
      %455 = vector.extract_strided_slice %119 {offsets = [0, 36], sizes = [1, 256], strides = [1, 1]} : vector<1x358xf32> to vector<1x256xf32>
      %456 = vector.broadcast %86 : f32 to vector<1x256xf32>
      %457 = arith.mulf %455, %456 : vector<1x256xf32>
      %458 = arith.addf %454, %457 : vector<1x256xf32>
      %459 = vector.extract_strided_slice %119 {offsets = [0, 52], sizes = [1, 256], strides = [1, 1]} : vector<1x358xf32> to vector<1x256xf32>
      %460 = vector.broadcast %93 : f32 to vector<1x256xf32>
      %461 = arith.mulf %459, %460 : vector<1x256xf32>
      %462 = arith.addf %458, %461 : vector<1x256xf32>
      %463 = vector.extract_strided_slice %119 {offsets = [0, 68], sizes = [1, 256], strides = [1, 1]} : vector<1x358xf32> to vector<1x256xf32>
      %464 = vector.broadcast %100 : f32 to vector<1x256xf32>
      %465 = arith.mulf %463, %464 : vector<1x256xf32>
      %466 = arith.addf %462, %465 : vector<1x256xf32>
      %467 = vector.extract_strided_slice %119 {offsets = [0, 84], sizes = [1, 256], strides = [1, 1]} : vector<1x358xf32> to vector<1x256xf32>
      %468 = vector.broadcast %107 : f32 to vector<1x256xf32>
      %469 = arith.mulf %467, %468 : vector<1x256xf32>
      %470 = arith.addf %466, %469 : vector<1x256xf32>
      %471 = vector.extract_strided_slice %119 {offsets = [0, 100], sizes = [1, 256], strides = [1, 1]} : vector<1x358xf32> to vector<1x256xf32>
      %472 = vector.broadcast %114 : f32 to vector<1x256xf32>
      %473 = arith.mulf %471, %472 : vector<1x256xf32>
      %474 = arith.addf %470, %473 : vector<1x256xf32>
      %c1_i32_44 = arith.constant 1 : i32
      %475 = vector.broadcast %c1_i32_44 : i32 to vector<1x256xi32>
      %476 = arith.addi %136, %475 : vector<1x256xi32>
      %c0_i32_45 = arith.constant 0 : i32
      %477 = vector.broadcast %c0_i32_45 : i32 to vector<1x256xi32>
      %478 = arith.cmpi sge, %476, %477 : vector<1x256xi32>
      %c1_i32_46 = arith.constant 1 : i32
      %479 = vector.broadcast %c1_i32_46 : i32 to vector<1x256xi32>
      %480 = arith.addi %136, %479 : vector<1x256xi32>
      %c16_i32_47 = arith.constant 16 : i32
      %481 = vector.broadcast %c16_i32_47 : i32 to vector<1x256xi32>
      %482 = arith.cmpi slt, %480, %481 : vector<1x256xi32>
      %483 = arith.andi %478, %482 : vector<1x256xi1>
      %484 = arith.extui %483 : vector<1x256xi1> to vector<1x256xi32>
      %485 = arith.sitofp %484 : vector<1x256xi32> to vector<1x256xf32>
      %486 = arith.mulf %474, %485 : vector<1x256xf32>
      %487 = arith.addf %417, %486 : vector<1x256xf32>
      %cst_48 = arith.constant 0.000000e+00 : f32
      %488 = vector.broadcast %cst_48 : f32 to vector<1x256xf32>
      %489 = vector.extract_strided_slice %118 {offsets = [0, 5], sizes = [1, 256], strides = [1, 1]} : vector<1x358xf32> to vector<1x256xf32>
      %490 = vector.broadcast %24 : f32 to vector<1x256xf32>
      %491 = arith.mulf %489, %490 : vector<1x256xf32>
      %492 = arith.addf %488, %491 : vector<1x256xf32>
      %493 = vector.extract_strided_slice %118 {offsets = [0, 21], sizes = [1, 256], strides = [1, 1]} : vector<1x358xf32> to vector<1x256xf32>
      %494 = vector.broadcast %31 : f32 to vector<1x256xf32>
      %495 = arith.mulf %493, %494 : vector<1x256xf32>
      %496 = arith.addf %492, %495 : vector<1x256xf32>
      %497 = vector.extract_strided_slice %118 {offsets = [0, 37], sizes = [1, 256], strides = [1, 1]} : vector<1x358xf32> to vector<1x256xf32>
      %498 = vector.broadcast %38 : f32 to vector<1x256xf32>
      %499 = arith.mulf %497, %498 : vector<1x256xf32>
      %500 = arith.addf %496, %499 : vector<1x256xf32>
      %501 = vector.extract_strided_slice %118 {offsets = [0, 53], sizes = [1, 256], strides = [1, 1]} : vector<1x358xf32> to vector<1x256xf32>
      %502 = vector.broadcast %45 : f32 to vector<1x256xf32>
      %503 = arith.mulf %501, %502 : vector<1x256xf32>
      %504 = arith.addf %500, %503 : vector<1x256xf32>
      %505 = vector.extract_strided_slice %118 {offsets = [0, 69], sizes = [1, 256], strides = [1, 1]} : vector<1x358xf32> to vector<1x256xf32>
      %506 = vector.broadcast %52 : f32 to vector<1x256xf32>
      %507 = arith.mulf %505, %506 : vector<1x256xf32>
      %508 = arith.addf %504, %507 : vector<1x256xf32>
      %509 = vector.extract_strided_slice %118 {offsets = [0, 85], sizes = [1, 256], strides = [1, 1]} : vector<1x358xf32> to vector<1x256xf32>
      %510 = vector.broadcast %59 : f32 to vector<1x256xf32>
      %511 = arith.mulf %509, %510 : vector<1x256xf32>
      %512 = arith.addf %508, %511 : vector<1x256xf32>
      %513 = vector.extract_strided_slice %118 {offsets = [0, 101], sizes = [1, 256], strides = [1, 1]} : vector<1x358xf32> to vector<1x256xf32>
      %514 = vector.broadcast %66 : f32 to vector<1x256xf32>
      %515 = arith.mulf %513, %514 : vector<1x256xf32>
      %516 = arith.addf %512, %515 : vector<1x256xf32>
      %517 = vector.extract_strided_slice %119 {offsets = [0, 5], sizes = [1, 256], strides = [1, 1]} : vector<1x358xf32> to vector<1x256xf32>
      %518 = vector.broadcast %73 : f32 to vector<1x256xf32>
      %519 = arith.mulf %517, %518 : vector<1x256xf32>
      %520 = arith.addf %516, %519 : vector<1x256xf32>
      %521 = vector.extract_strided_slice %119 {offsets = [0, 21], sizes = [1, 256], strides = [1, 1]} : vector<1x358xf32> to vector<1x256xf32>
      %522 = vector.broadcast %80 : f32 to vector<1x256xf32>
      %523 = arith.mulf %521, %522 : vector<1x256xf32>
      %524 = arith.addf %520, %523 : vector<1x256xf32>
      %525 = vector.extract_strided_slice %119 {offsets = [0, 37], sizes = [1, 256], strides = [1, 1]} : vector<1x358xf32> to vector<1x256xf32>
      %526 = vector.broadcast %87 : f32 to vector<1x256xf32>
      %527 = arith.mulf %525, %526 : vector<1x256xf32>
      %528 = arith.addf %524, %527 : vector<1x256xf32>
      %529 = vector.extract_strided_slice %119 {offsets = [0, 53], sizes = [1, 256], strides = [1, 1]} : vector<1x358xf32> to vector<1x256xf32>
      %530 = vector.broadcast %94 : f32 to vector<1x256xf32>
      %531 = arith.mulf %529, %530 : vector<1x256xf32>
      %532 = arith.addf %528, %531 : vector<1x256xf32>
      %533 = vector.extract_strided_slice %119 {offsets = [0, 69], sizes = [1, 256], strides = [1, 1]} : vector<1x358xf32> to vector<1x256xf32>
      %534 = vector.broadcast %101 : f32 to vector<1x256xf32>
      %535 = arith.mulf %533, %534 : vector<1x256xf32>
      %536 = arith.addf %532, %535 : vector<1x256xf32>
      %537 = vector.extract_strided_slice %119 {offsets = [0, 85], sizes = [1, 256], strides = [1, 1]} : vector<1x358xf32> to vector<1x256xf32>
      %538 = vector.broadcast %108 : f32 to vector<1x256xf32>
      %539 = arith.mulf %537, %538 : vector<1x256xf32>
      %540 = arith.addf %536, %539 : vector<1x256xf32>
      %541 = vector.extract_strided_slice %119 {offsets = [0, 101], sizes = [1, 256], strides = [1, 1]} : vector<1x358xf32> to vector<1x256xf32>
      %542 = vector.broadcast %115 : f32 to vector<1x256xf32>
      %543 = arith.mulf %541, %542 : vector<1x256xf32>
      %544 = arith.addf %540, %543 : vector<1x256xf32>
      %c2_i32 = arith.constant 2 : i32
      %545 = vector.broadcast %c2_i32 : i32 to vector<1x256xi32>
      %546 = arith.addi %136, %545 : vector<1x256xi32>
      %c0_i32_49 = arith.constant 0 : i32
      %547 = vector.broadcast %c0_i32_49 : i32 to vector<1x256xi32>
      %548 = arith.cmpi sge, %546, %547 : vector<1x256xi32>
      %c2_i32_50 = arith.constant 2 : i32
      %549 = vector.broadcast %c2_i32_50 : i32 to vector<1x256xi32>
      %550 = arith.addi %136, %549 : vector<1x256xi32>
      %c16_i32_51 = arith.constant 16 : i32
      %551 = vector.broadcast %c16_i32_51 : i32 to vector<1x256xi32>
      %552 = arith.cmpi slt, %550, %551 : vector<1x256xi32>
      %553 = arith.andi %548, %552 : vector<1x256xi1>
      %554 = arith.extui %553 : vector<1x256xi1> to vector<1x256xi32>
      %555 = arith.sitofp %554 : vector<1x256xi32> to vector<1x256xf32>
      %556 = arith.mulf %544, %555 : vector<1x256xf32>
      %557 = arith.addf %487, %556 : vector<1x256xf32>
      %cst_52 = arith.constant 0.000000e+00 : f32
      %558 = vector.broadcast %cst_52 : f32 to vector<1x256xf32>
      %559 = vector.extract_strided_slice %118 {offsets = [0, 6], sizes = [1, 256], strides = [1, 1]} : vector<1x358xf32> to vector<1x256xf32>
      %560 = vector.broadcast %25 : f32 to vector<1x256xf32>
      %561 = arith.mulf %559, %560 : vector<1x256xf32>
      %562 = arith.addf %558, %561 : vector<1x256xf32>
      %563 = vector.extract_strided_slice %118 {offsets = [0, 22], sizes = [1, 256], strides = [1, 1]} : vector<1x358xf32> to vector<1x256xf32>
      %564 = vector.broadcast %32 : f32 to vector<1x256xf32>
      %565 = arith.mulf %563, %564 : vector<1x256xf32>
      %566 = arith.addf %562, %565 : vector<1x256xf32>
      %567 = vector.extract_strided_slice %118 {offsets = [0, 38], sizes = [1, 256], strides = [1, 1]} : vector<1x358xf32> to vector<1x256xf32>
      %568 = vector.broadcast %39 : f32 to vector<1x256xf32>
      %569 = arith.mulf %567, %568 : vector<1x256xf32>
      %570 = arith.addf %566, %569 : vector<1x256xf32>
      %571 = vector.extract_strided_slice %118 {offsets = [0, 54], sizes = [1, 256], strides = [1, 1]} : vector<1x358xf32> to vector<1x256xf32>
      %572 = vector.broadcast %46 : f32 to vector<1x256xf32>
      %573 = arith.mulf %571, %572 : vector<1x256xf32>
      %574 = arith.addf %570, %573 : vector<1x256xf32>
      %575 = vector.extract_strided_slice %118 {offsets = [0, 70], sizes = [1, 256], strides = [1, 1]} : vector<1x358xf32> to vector<1x256xf32>
      %576 = vector.broadcast %53 : f32 to vector<1x256xf32>
      %577 = arith.mulf %575, %576 : vector<1x256xf32>
      %578 = arith.addf %574, %577 : vector<1x256xf32>
      %579 = vector.extract_strided_slice %118 {offsets = [0, 86], sizes = [1, 256], strides = [1, 1]} : vector<1x358xf32> to vector<1x256xf32>
      %580 = vector.broadcast %60 : f32 to vector<1x256xf32>
      %581 = arith.mulf %579, %580 : vector<1x256xf32>
      %582 = arith.addf %578, %581 : vector<1x256xf32>
      %583 = vector.extract_strided_slice %118 {offsets = [0, 102], sizes = [1, 256], strides = [1, 1]} : vector<1x358xf32> to vector<1x256xf32>
      %584 = vector.broadcast %67 : f32 to vector<1x256xf32>
      %585 = arith.mulf %583, %584 : vector<1x256xf32>
      %586 = arith.addf %582, %585 : vector<1x256xf32>
      %587 = vector.extract_strided_slice %119 {offsets = [0, 6], sizes = [1, 256], strides = [1, 1]} : vector<1x358xf32> to vector<1x256xf32>
      %588 = vector.broadcast %74 : f32 to vector<1x256xf32>
      %589 = arith.mulf %587, %588 : vector<1x256xf32>
      %590 = arith.addf %586, %589 : vector<1x256xf32>
      %591 = vector.extract_strided_slice %119 {offsets = [0, 22], sizes = [1, 256], strides = [1, 1]} : vector<1x358xf32> to vector<1x256xf32>
      %592 = vector.broadcast %81 : f32 to vector<1x256xf32>
      %593 = arith.mulf %591, %592 : vector<1x256xf32>
      %594 = arith.addf %590, %593 : vector<1x256xf32>
      %595 = vector.extract_strided_slice %119 {offsets = [0, 38], sizes = [1, 256], strides = [1, 1]} : vector<1x358xf32> to vector<1x256xf32>
      %596 = vector.broadcast %88 : f32 to vector<1x256xf32>
      %597 = arith.mulf %595, %596 : vector<1x256xf32>
      %598 = arith.addf %594, %597 : vector<1x256xf32>
      %599 = vector.extract_strided_slice %119 {offsets = [0, 54], sizes = [1, 256], strides = [1, 1]} : vector<1x358xf32> to vector<1x256xf32>
      %600 = vector.broadcast %95 : f32 to vector<1x256xf32>
      %601 = arith.mulf %599, %600 : vector<1x256xf32>
      %602 = arith.addf %598, %601 : vector<1x256xf32>
      %603 = vector.extract_strided_slice %119 {offsets = [0, 70], sizes = [1, 256], strides = [1, 1]} : vector<1x358xf32> to vector<1x256xf32>
      %604 = vector.broadcast %102 : f32 to vector<1x256xf32>
      %605 = arith.mulf %603, %604 : vector<1x256xf32>
      %606 = arith.addf %602, %605 : vector<1x256xf32>
      %607 = vector.extract_strided_slice %119 {offsets = [0, 86], sizes = [1, 256], strides = [1, 1]} : vector<1x358xf32> to vector<1x256xf32>
      %608 = vector.broadcast %109 : f32 to vector<1x256xf32>
      %609 = arith.mulf %607, %608 : vector<1x256xf32>
      %610 = arith.addf %606, %609 : vector<1x256xf32>
      %611 = vector.extract_strided_slice %119 {offsets = [0, 102], sizes = [1, 256], strides = [1, 1]} : vector<1x358xf32> to vector<1x256xf32>
      %612 = vector.broadcast %116 : f32 to vector<1x256xf32>
      %613 = arith.mulf %611, %612 : vector<1x256xf32>
      %614 = arith.addf %610, %613 : vector<1x256xf32>
      %c3_i32 = arith.constant 3 : i32
      %615 = vector.broadcast %c3_i32 : i32 to vector<1x256xi32>
      %616 = arith.addi %136, %615 : vector<1x256xi32>
      %c0_i32_53 = arith.constant 0 : i32
      %617 = vector.broadcast %c0_i32_53 : i32 to vector<1x256xi32>
      %618 = arith.cmpi sge, %616, %617 : vector<1x256xi32>
      %c3_i32_54 = arith.constant 3 : i32
      %619 = vector.broadcast %c3_i32_54 : i32 to vector<1x256xi32>
      %620 = arith.addi %136, %619 : vector<1x256xi32>
      %c16_i32_55 = arith.constant 16 : i32
      %621 = vector.broadcast %c16_i32_55 : i32 to vector<1x256xi32>
      %622 = arith.cmpi slt, %620, %621 : vector<1x256xi32>
      %623 = arith.andi %618, %622 : vector<1x256xi1>
      %624 = arith.extui %623 : vector<1x256xi1> to vector<1x256xi32>
      %625 = arith.sitofp %624 : vector<1x256xi32> to vector<1x256xf32>
      %626 = arith.mulf %614, %625 : vector<1x256xf32>
      %627 = arith.addf %557, %626 : vector<1x256xf32>
      %628 = arith.negf %627 : vector<1x256xf32>
      %629 = math.exp %628 : vector<1x256xf32>
      %cst_56 = arith.constant 1.000000e+00 : f32
      %630 = vector.broadcast %cst_56 : f32 to vector<1x256xf32>
      %631 = arith.addf %630, %629 : vector<1x256xf32>
      %632 = arith.divf %630, %631 : vector<1x256xf32>
      %c0_57 = arith.constant 0 : index
      %c0_58 = arith.constant 0 : index
      %c0_59 = arith.constant 0 : index
      %633 = vector.load %arg4[%c0_57, %c0_58, %c0_59] : memref<1x1x256xf32, #tpu.memory_space<vmem>>, vector<1x1x256xf32>
      %634 = vector.shape_cast %633 : vector<1x1x256xf32> to vector<1x256xf32>
      %635 = vector.shape_cast %632 : vector<1x256xf32> to vector<1x1x256xf32>
      tpu.vector_store %arg4[%c0_57, %c0_58, %c0_59], %635 {strides = array<i32>} : memref<1x1x256xf32, #tpu.memory_space<vmem>>, vector<1x1x256xf32>,
    } else {
    }
    return
  }
  func.func @transform_0(%arg0: i32, %arg1: i32) -> (i32, i32, i32) {
    %c0_i32 = arith.constant 0 : i32
    %c0_i32_0 = arith.constant 0 : i32
    return %arg0, %arg1, %c0_i32 : i32, i32, i32
  }
  func.func @transform_1(%arg0: i32, %arg1: i32) -> i32 {
    %c0_i32 = arith.constant 0 : i32
    %c0_i32_0 = arith.constant 0 : i32
    return %c0_i32 : i32
  }
  func.func @transform_2(%arg0: i32, %arg1: i32) -> (i32, i32, i32) {
    %c0_i32 = arith.constant 0 : i32
    %c0_i32_0 = arith.constant 0 : i32
    %c0_i32_1 = arith.constant 0 : i32
    return %arg0, %c0_i32, %c0_i32_0 : i32, i32, i32
  }
}

</mosaic_0001>

<bundles_post_ra>
// kernel: spatial_attention_averagepool.1
= control target key start
LH: loop header
LB: loop body
LE: loop exit
PB: predicated region body
PF: predicated region fallthrough
CT: control target
= control target key end

     0   :  { %7 = vsyncpa [#allocation5], 0  ;;  %s2964_s9 = smov 0   ;;  %s2966_s10 = smov 0   ;;  %s4285_s0 = inlined_call_operand.vmem [shape: f32[2,4,256], index: 0, kind: input, shape index: {}]   ;;  %s4286_s1 = inlined_call_operand.vmem [shape: f32[98], index: 1, kind: input, shape index: {}]   ;;  %s4287_s2 = inlined_call_operand.vmem [shape: f32[2,1,256], index: 2, kind: output, shape index: {}]  }
   0x1   :  { %s2968_s11 = smov 0  }
   0x2 LB: > { %s2661_s12 = sadd.s32 4294967295, %s2923_s11   ;;  %s25_s13 = sadd.s32 1, %s2919_s10  ;;  %s2923_s11 = sphi %s2968_s11, %s13_s11   ;;  %s2919_s10 = sphi %s2966_s10, %s4395_s10   ;;  %s2915_s9 = sphi %s2964_s9, %s4394_s9  }
   0x3   : > { %p27_p0 = scmp.ge.s32.totalorder %s25_s13, 2  ;;  %p2663_p1 = scmp.ge.s32.totalorder %s2923_s11, 1 }
   0x4   : > { %p105_p2 = scmp.lt.s32.totalorder %s2923_s11, 3  ;;  %p2989_p4 = scmp.eq.s32.totalorder %s2661_s12, 0 }
   0x5   : > { %s4397_s13 = smov (%p27_p0, %s25_s13), 0  ;;  %s118_s18 = sshll.u32 %s4286_s1, 4  ;;  %s119_s18 = int_to_ptr.vmem [resolvable:$true] %s118_s18 }
   0x6   : > { %p2985_p3 = pnand %p2663_p1, %p105_p2  ;;  %s2882_s19 = scalar_lea.vmem %s119_s18, 16 }
   0x7   : > { %p2883_p7 = scmp.ne.s32.totalorder %s119_s18, %s2882_s19  ;;  %p2890_p11 = scmp.lt.s32.totalorder %s119_s18, %s119_s18 }
   0x8   : > { %p2789_p5 = pneg %p2985_p3  ;;  %p2891_p12 = scmp.lt.s32.totalorder %s2882_s19, %s2882_s19 }
   0xa   : > { %p2790_p6 = pnand %p2989_p4, %p2789_p5  ;;  %p2892_p13 = por %p2891_p12, %p2890_p11 }
   0xc   : > { %p2884_p8 = pneg %p2790_p6 }
   0xe   : > { %p2885_p9 = pnand %p2884_p8, %p2883_p7 }
  0x10   : > { %p2886_p10 = pneg %p2885_p9 }
  0x12   : > { %p2893_p0 = pnand %p2892_p13, %p2886_p10 }
  0x14   : > { %2896 = shalt.err (!%p2893_p0)
}
  0x15   : > { %s2925_s20 = smov [#allocation4]   ;;  %143 = sbr.rel (%p2985_p3) target bundleno = 1157 (0x485), region = 28 }
  0x16   : > { %2792 = dma.vmem_to_smem (!%p2790_p6), %s119_s18, 16, %s2925_s20, [#allocation5]  }
  0x1a   : > { %2910 = dma.done.wait (%p2989_p4), [#allocation5], 16  }
  0x1b   : > { %2912 = vsyncadd (%p2989_p4), [#allocation5], 4294967280 }
  0x1c   : > { %149 = sfence }
  0x1d   : > { %p169_p1 = scmp.lt.s32.totalorder %s2915_s9, 1  ;;  %v186_v0 = vlaneseq  ;;  %v4310_v1 = vmov 0  ;;  %v4288_v3 = vmov 0.0   ;;  %v2927_v4 = vmov -inf   ;;  %s2929_s25 = smov 1  }
  0x1e   : > { %vm196_vm1 = vcmask 1043456   ;;  %v2928_v22 = vmov 1966171168   ;;  %s2930_s26 = smov 51   ;;  %s2726_s27 = sld [smem:[#allocation4 + $0x38]]  ;;  %vm388_vm4 = vcmask 416768  }
  0x1f   : > { %s4399_s9 = smov (!%p169_p1, %s2915_s9), 1  ;;  %vm3010_vm0 = vcmp.lt.s32.totalorder %v186_v0, 256  ;;  %v415_v2 = vand.u32 127, %v186_v0  ;;  %v230_v23 = vunpack.c.l.s4 %v2928_v22  ;;  %v233_v35 = vshrl.u32 %v186_v0, 7  ;;  %s2733_s28 = sld [smem:[#allocation4 + $0x3f]] }
  0x20   : > { %v4311_v1 = vsel %vm3010_vm0, 4294967295, %v4310_v1  ;;  %190 = vst.msk [vmem:[#allocation2] sm:$0x3] %vm3010_vm0, %v4288_v3  ;;  %191 = vst.msk [vmem:[#allocation3] sm:$0x3] %vm3010_vm0, %v2927_v4  ;;  %s2784_s21 = sshll.u32 %s4399_s9, 3 }
  0x21   : > { %4312 = vst [vmem:[#allocation7_spill] sm:$0xff] %v4311_v1  ;;  %v416_v5 = vadd.s32 128, %v415_v2  ;;  %s177_s24 = scalar_lea.vmem %s4285_s0, %s2784_s21  ;;  %v3023_v6 = vand.u32 15, %v415_v2  ;;  %v231_v34 = vunpack.c.0.s8 %v230_v23  ;;  %v378_v58 = vsub.s32 0, %v233_v35  ;;  %s2740_s29 = sld [smem:[#allocation4 + $0x46]] }
  0x22   : > { %v192_v7 = vld [vmem:[%s177_s24] sm:$0xff]  ;;  %v382_v59 = vsub.s32 1, %v233_v35  ;;  %s2931_s30 = smov 112   ;;  %s2747_s3 = sld [smem:[#allocation4 + $0x4d]]  ;;  %vm459_vm7 = vcmask 916480   ;;  %vm479_vm8 = vcmask 785408  }
  0x23   : > { %v3025_v8 = vand.u32 15, %v416_v5  ;;  %v194_v9 = vcombine.high %v192_v7, %v192_v7  ;;  %v197_v10 = vsel %vm196_vm1, %v192_v7, 0.0  ;;  %v211_v11 = vsel %vm196_vm1, %v192_v7, -inf  ;;  %s2932_s4 = smov 96   ;;  %s2754_s5 = sld [smem:[#allocation4 + $0x54]] }
  0x24   : > { %v967_v12 = vadd.s32 4294967294, %v3023_v6  ;;  %v198_v13 = vrot.slane %v197_v10, 4  ;;  %v212_v14 = vrot.slane %v211_v11, 4  ;;  %v3031_v46 = vsub.s32 %v231_v34, %v233_v35  ;;  %s2933_s6 = smov 80   ;;  %s2761_s7 = sld [smem:[#allocation4 + $0x5b]] }
  0x25   : > { %4313 = vst [vmem:[#allocation8_spill] sm:$0xff] %v3025_v8  ;;  %v968_v15 = vadd.s32 4294967294, %v3025_v8  ;;  %v218_v16 = vsel %vm196_vm1, %v194_v9, -inf  ;;  %v204_v17 = vsel %vm196_vm1, %v194_v9, 0.0  ;;  %v571_v5 = vstv %s2726_s27  ;;  %s2934_s8 = smov 64   ;;  %s2727_s12 = sld [smem:[#allocation4 + $0x39]] }
  0x26   : > { %vm969_vm2 = vcmp.ge.s32.totalorder %v967_v12, 0  ;;  %v199_v18 = vadd.f32 %v198_v13, %v197_v10  ;;  %v213_v19 = vmax.f32 %v211_v11, %v212_v14  ;;  %v219_v20 = vrot.slane %v218_v16, 4  ;;  %4314 = vst [vmem:[#allocation9_spill] sm:$0xff] %v3031_v46  ;;  %s2935_s14 = smov 48   ;;  %s2734_s15 = sld [smem:[#allocation4 + $0x40]] }
  0x27   : > { %v205_v21 = vrot.slane %v204_v17, 4  ;;  %vm970_vm3 = vcmp.ge.s32.totalorder %v968_v15, 0  ;;  %v2770_v24 = vsel %vm969_vm2, 1.0, %v4288_v3  ;;  %v225_v52 = vld [vmem:[#allocation2] sm:$0x3]  ;;  %s2936_s16 = smov 32  }
  0x28   : > { %v200_v25 = vrot.slane %v199_v18, 2  ;;  %v214_v26 = vrot.slane %v213_v19, 2  ;;  %v220_v27 = vmax.f32 %v218_v16, %v219_v20  ;;  %v2771_v29 = vsel %vm970_vm3, 1.0, %v4288_v3  ;;  %v250_v53 = vld [vmem:[#allocation3] sm:$0x3]  ;;  %s2741_s17 = sld [smem:[#allocation4 + $0x47]] }
  0x29   : > { %v206_v28 = vadd.f32 %v205_v21, %v204_v17  ;;  %v2843_v36 = vpack.i.bf16 %v2771_v29, %v2770_v24  ;;  %v590_v16 = vstv %s2733_s28  ;;  %v628_v24 = vstv %s2747_s3  ;;  %s2748_s18 = sld [smem:[#allocation4 + $0x4e]] }
  0x2a   : > { %v201_v30 = vadd.f32 %v200_v25, %v199_v18  ;;  %v215_v31 = vmax.f32 %v213_v19, %v214_v26  ;;  %v221_v32 = vrot.slane %v220_v27, 2  ;;  %v609_v19 = vstv %s2740_s29  ;;  %s2755_s19 = sld [smem:[#allocation4 + $0x55]] }
  0x2b   : > { %v207_v33 = vrot.slane %v206_v28, 2  ;;  %2844 = vrot.lane.b32.xlu0 %v2843_v36, %s2929_s25  ;;  %v841_v35 = vstv %s2727_s12  ;;  %s2762_s20 = sld [smem:[#allocation4 + $0x5c]]  ;;  %v1276_v3 = vadd.s32 4294967295, %v3025_v8  ;;  %vm499_vm9 = vcmask 654336  }
  0x2c   : > { %v202_v37 = vrot.slane %v201_v30, 1  ;;  %v216_v38 = vrot.slane %v215_v31, 1  ;;  %v222_v39 = vmax.f32 %v220_v27, %v221_v32  ;;  %v647_v27 = vstv %s2754_s5  ;;  %s2677_s21 = sld [smem:[#allocation4 + $0x7]] }
  0x2d   : > { %v208_v40 = vadd.f32 %v207_v33, %v206_v28  ;;  %v666_v32 = vstv %s2761_s7  ;;  %s2684_s22 = sld [smem:[#allocation4 + $0xe]]  ;;  %vm1278_vm6 = vcmp.ge.s32.totalorder %v1276_v3, 0  ;;  %vm519_vm10 = vcmask 523264  }
  0x2e   : > { %v203_v41 = vadd.f32 %v202_v37, %v201_v30  ;;  %v217_v42 = vmax.f32 %v215_v31, %v216_v38  ;;  %v223_v43 = vrot.slane %v222_v39, 1  ;;  %s2691_s23 = sld [smem:[#allocation4 + $0x15]]  ;;  %vm539_vm11 = vcmask 392192  }
  0x2f   : > { %v209_v44 = vrot.slane %v208_v40, 1  ;;  %s2698_s24 = sld [smem:[#allocation4 + $0x1c]]  ;;  %vm559_vm12 = vcmask 261120   ;;  %vm985_vm13 = vcmask 7168   ;;  %vm1293_vm14 = vcmask 15360  }
  0x30   : > { %v224_v45 = vmax.f32 %v222_v39, %v223_v43  ;;  %v883_v43 = vstv %s2741_s17  ;;  %s2705_s25 = sld [smem:[#allocation4 + $0x23]]  ;;  %vm1599_vm15 = vcmask 23552  }
  0x31   : > { %v210_v47 = vadd.f32 %v209_v44, %v208_v40  ;;  %v862_v40 = vstv %s2734_s15  ;;  %s2678_s27 = sld [smem:[#allocation4 + $0x8]] }
  0x32   : > { %v253_v48 = vcombine.low %v217_v42, %v224_v45  ;;  %s2685_s28 = sld [smem:[#allocation4 + $0xf]] }
  0x33   : > { %v228_v49 = vcombine.low %v203_v41, %v210_v47  ;;  %s2692_s29 = sld [smem:[#allocation4 + $0x16]] }
  0x34   : > { %v260_v50 = vrot.slane %v253_v48, %v3031_v46  ;;  %s2699_s3 = sld [smem:[#allocation4 + $0x1d]] }
  0x35   : > { %v235_v51 = vrot.slane %v228_v49, %v3031_v46  ;;  %v904_v49 = vstv %s2748_s18  ;;  %s2706_s5 = sld [smem:[#allocation4 + $0x24]] }
  0x36   : > { %v267_v54 = vrot.slane %v260_v50, %v3031_v46  ;;  %s2713_s7 = sld [smem:[#allocation4 + $0x2b]] }
  0x37   : > { %v242_v55 = vrot.slane %v235_v51, %v3031_v46  ;;  %s2679_s12 = sld [smem:[#allocation4 + $0x9]] }
  0x38   : > { %v269_v56 = vmax.f32 %v250_v53, %v267_v54  ;;  %s2686_s15 = sld [smem:[#allocation4 + $0x10]] }
  0x39   : > { %v244_v57 = vadd.f32 %v242_v55, %v225_v52  ;;  %v925_v52 = vstv %s2755_s19  ;;  %s2693_s17 = sld [smem:[#allocation4 + $0x17]] }
  0x3a   : > { %270 = vst.msk [vmem:[#allocation3] sm:$0x3] %vm3010_vm0, %v269_v56  ;;  %s2700_s18 = sld [smem:[#allocation4 + $0x1e]] }
  0x3b   : > { %249 = vst.msk [vmem:[#allocation2] sm:$0x3] %vm3010_vm0, %v244_v57  ;;  %s2707_s19 = sld [smem:[#allocation4 + $0x25]] }
  0x41   : > { %v276_v60 = vld [vmem:[#allocation3] sm:$0x3] }
  0x42   : > { %v274_v61 = vld [vmem:[#allocation2] sm:$0x3]  ;;  %v399_v62 = vrot.slane %v276_v60, %v378_v58  ;;  %v403_v0 = vrot.slane %v276_v60, %v382_v59 }
  0x43   : > { %v275_v63 = vmul.f32 0.25, %v274_v61  ;;  %v446_v61 = vstv %s2677_s21  ;;  %s2728_s21 = sld [smem:[#allocation4 + $0x3a]] }
  0x44   : > { %404 = vrot.lane.b32.xlu1 %v399_v62, %s2930_s26 }
  0x45   : > { %v379_v2 = vrot.slane %v275_v63, %v378_v58  ;;  %v383_v4 = vrot.slane %v275_v63, %v382_v59  ;;  %v946_v59 = vstv %s2762_s20  ;;  %s2714_s20 = sld [smem:[#allocation4 + $0x2c]] }
  0x47   : > { %384 = vrot.lane.b32.xlu0 %v379_v2, %s2930_s26 }
  0x48   : > { %406 = vrot.lane.b32.xlu1 %v403_v0, %s2930_s26 }
  0x4b   : > { %386 = vrot.lane.b32.xlu0 %v383_v4, %s2930_s26  ;;  %s2712_s26 = sld [smem:[#allocation4 + $0x2a]] }
  0x9d   : > { %v3108_v53 = vpop.permute.xlu0 %2844 }
  0xb6   : > { %v405_v7 = vpop.permute.xlu1 %404 }
  0xb7   : > { %v3042_v9 = vsel %vm388_vm4, 0.0, %v405_v7 }
  0xb8   : > { %v572_v10 = vmul.f32 %v571_v5, %v3042_v9  ;;  %v591_v17 = vmul.f32 %v590_v16, %v3042_v9  ;;  %v610_v21 = vmul.f32 %v609_v19, %v3042_v9  ;;  %v629_v25 = vmul.f32 %v628_v24, %v3042_v9 }
  0xb9   : > { %v648_v29 = vmul.f32 %v647_v27, %v3042_v9  ;;  %v667_v33 = vmul.f32 %v666_v32, %v3042_v9  ;;  %v842_v37 = vmul.f32 %v841_v35, %v3042_v9  ;;  %v863_v41 = vmul.f32 %v862_v40, %v3042_v9  ;;  %v385_v58 = vpop.permute.xlu0 %384 }
  0xba   : > { %v407_v11 = vpop.permute.xlu1 %406  ;;  %578 = vrot.lane.b32.xlu0 %v572_v10, %s2931_s30  ;;  %v884_v45 = vmul.f32 %v883_v43, %v3042_v9  ;;  %v905_v50 = vmul.f32 %v904_v49, %v3042_v9  ;;  %v926_v55 = vmul.f32 %v925_v52, %v3042_v9  ;;  %v3119_v60 = vsel %vm388_vm4, 0.0, %v385_v58 }
  0xbb   : > { %v3047_v12 = vsel %vm388_vm4, %v405_v7, %v407_v11  ;;  %v3050_v13 = vsel %vm388_vm4, %v407_v11, 0.0  ;;  %v947_v62 = vmul.f32 %v946_v59, %v3042_v9  ;;  %v447_v2 = vmul.f32 %v446_v61, %v3119_v60 }
  0xbc   : > { %v573_v14 = vmul.f32 %v571_v5, %v3047_v12  ;;  %v574_v15 = vmul.f32 %v571_v5, %v3050_v13  ;;  %v592_v18 = vmul.f32 %v590_v16, %v3047_v12  ;;  %v593_v20 = vmul.f32 %v590_v16, %v3050_v13 }
  0xbd   : > { %v611_v22 = vmul.f32 %v609_v19, %v3047_v12  ;;  %v612_v23 = vmul.f32 %v609_v19, %v3050_v13  ;;  %v630_v26 = vmul.f32 %v628_v24, %v3047_v12  ;;  %v631_v28 = vmul.f32 %v628_v24, %v3050_v13  ;;  %v387_v0 = vpop.permute.xlu0 %386 }
  0xbe   : > { %580 = vrot.lane.b32.xlu1 %v573_v14, %s2931_s30  ;;  %582 = vrot.lane.b32.xlu0 %v574_v15, %s2931_s30  ;;  %v649_v30 = vmul.f32 %v647_v27, %v3047_v12  ;;  %v650_v31 = vmul.f32 %v647_v27, %v3050_v13  ;;  %v668_v34 = vmul.f32 %v666_v32, %v3047_v12  ;;  %v3127_v4 = vsel %vm388_vm4, %v387_v0, 0.0 }
  0xbf   : > { %v669_v36 = vmul.f32 %v666_v32, %v3050_v13  ;;  %v843_v38 = vmul.f32 %v841_v35, %v3047_v12  ;;  %v844_v39 = vmul.f32 %v841_v35, %v3050_v13  ;;  %v864_v42 = vmul.f32 %v862_v40, %v3047_v12 }
  0xc0   : > { %v865_v44 = vmul.f32 %v862_v40, %v3050_v13  ;;  %v885_v47 = vmul.f32 %v883_v43, %v3047_v12  ;;  %v886_v48 = vmul.f32 %v883_v43, %v3050_v13  ;;  %v906_v51 = vmul.f32 %v904_v49, %v3047_v12 }
  0xc1   : > { %v907_v54 = vmul.f32 %v904_v49, %v3050_v13  ;;  %v927_v56 = vmul.f32 %v925_v52, %v3047_v12  ;;  %v928_v57 = vmul.f32 %v925_v52, %v3050_v13  ;;  %v948_v63 = vmul.f32 %v946_v59, %v3047_v12 }
  0xc2   : > { %597 = vrot.lane.b32.xlu1 %v591_v17, %s2932_s4  ;;  %599 = vrot.lane.b32.xlu0 %v592_v18, %s2932_s4  ;;  %v949_v5 = vmul.f32 %v946_v59, %v3050_v13  ;;  %v3131_v7 = vsel %vm388_vm4, %v385_v58, %v387_v0  ;;  %v449_v10 = vmul.f32 %v446_v61, %v3127_v4  ;;  %v466_v14 = vstv %s2684_s22  ;;  %s2735_s22 = sld [smem:[#allocation4 + $0x41]] }
  0xc3   : > { %v448_v11 = vmul.f32 %v446_v61, %v3131_v7  ;;  %v468_v15 = vmul.f32 %v466_v14, %v3131_v7  ;;  %v467_v16 = vmul.f32 %v466_v14, %v3119_v60  ;;  %v486_v17 = vstv %s2691_s23  ;;  %s2742_s23 = sld [smem:[#allocation4 + $0x48]] }
  0xc4   : > { %v487_v18 = vmul.f32 %v486_v17, %v3119_v60  ;;  %v469_v19 = vmul.f32 %v466_v14, %v3127_v4  ;;  %v771_v52 = vstv %s2699_s3  ;;  %v792_v58 = vstv %s2706_s5  ;;  %s2694_s3 = sld [smem:[#allocation4 + $0x18]] }
  0xc5   : > { %s2701_s5 = sld [smem:[#allocation4 + $0x1f]] }
  0xc6   : > { %601 = vrot.lane.b32.xlu1 %v593_v20, %s2932_s4  ;;  %616 = vrot.lane.b32.xlu0 %v610_v21, %s2933_s6  ;;  %v489_v20 = vmul.f32 %v486_v17, %v3127_v4  ;;  %v488_v21 = vmul.f32 %v486_v17, %v3131_v7 }
  0xca   : > { %618 = vrot.lane.b32.xlu1 %v611_v22, %s2933_s6  ;;  %620 = vrot.lane.b32.xlu0 %v612_v23, %s2933_s6  ;;  %v506_v22 = vstv %s2698_s24  ;;  %s2749_s24 = sld [smem:[#allocation4 + $0x4f]] }
  0xcb   : > { %v508_v23 = vmul.f32 %v506_v22, %v3131_v7  ;;  %v507_v24 = vmul.f32 %v506_v22, %v3119_v60  ;;  %v509_v27 = vmul.f32 %v506_v22, %v3127_v4 }
  0xce   : > { %635 = vrot.lane.b32.xlu1 %v629_v25, %s2934_s8  ;;  %637 = vrot.lane.b32.xlu0 %v630_v26, %s2934_s8  ;;  %v526_v25 = vstv %s2705_s25  ;;  %s2756_s25 = sld [smem:[#allocation4 + $0x56]] }
  0xcf   : > { %v527_v26 = vmul.f32 %v526_v25, %v3119_v60 }
  0xd2   : > { %639 = vrot.lane.b32.xlu1 %v631_v28, %s2934_s8  ;;  %654 = vrot.lane.b32.xlu0 %v648_v29, %s2935_s14  ;;  %v529_v28 = vmul.f32 %v526_v25, %v3127_v4  ;;  %v528_v29 = vmul.f32 %v526_v25, %v3131_v7 }
  0xd6   : > { %656 = vrot.lane.b32.xlu1 %v649_v30, %s2935_s14  ;;  %658 = vrot.lane.b32.xlu0 %v650_v31, %s2935_s14  ;;  %v546_v30 = vstv %s2712_s26  ;;  %s2763_s26 = sld [smem:[#allocation4 + $0x5d]] }
  0xd7   : > { %v548_v31 = vmul.f32 %v546_v30, %v3131_v7  ;;  %v547_v32 = vmul.f32 %v546_v30, %v3119_v60  ;;  %v549_v35 = vmul.f32 %v546_v30, %v3127_v4 }
  0xda   : > { %673 = vrot.lane.b32.xlu1 %v667_v33, %s2936_s16  ;;  %675 = vrot.lane.b32.xlu0 %v668_v34, %s2936_s16  ;;  %v708_v33 = vstv %s2678_s27  ;;  %s2680_s27 = sld [smem:[#allocation4 + $0xa]] }
  0xdb   : > { %v709_v34 = vmul.f32 %v708_v33, %v3119_v60 }
  0xde   : > { %677 = vrot.lane.b32.xlu1 %v669_v36, %s2936_s16  ;;  %848 = vrot.lane.b32.xlu0 %v842_v37, %s2931_s30  ;;  %v711_v36 = vmul.f32 %v708_v33, %v3127_v4  ;;  %v710_v37 = vmul.f32 %v708_v33, %v3131_v7 }
  0xe2   : > { %850 = vrot.lane.b32.xlu1 %v843_v38, %s2931_s30  ;;  %852 = vrot.lane.b32.xlu0 %v844_v39, %s2931_s30  ;;  %v729_v38 = vstv %s2685_s28  ;;  %s2687_s28 = sld [smem:[#allocation4 + $0x11]] }
  0xe3   : > { %v731_v40 = vmul.f32 %v729_v38, %v3131_v7 }
  0xe6   : > { %869 = vrot.lane.b32.xlu1 %v863_v41, %s2932_s4  ;;  %871 = vrot.lane.b32.xlu0 %v864_v42, %s2932_s4  ;;  %v730_v41 = vmul.f32 %v729_v38, %v3119_v60  ;;  %v750_v42 = vstv %s2692_s29  ;;  %s2937_s29 = smov 2  }
  0xea   : > { %873 = vrot.lane.b32.xlu1 %v865_v44, %s2932_s4  ;;  %890 = vrot.lane.b32.xlu0 %v884_v45, %s2933_s6  ;;  %v751_v45 = vmul.f32 %v750_v42, %v3119_v60 }
  0xee   : > { %892 = vrot.lane.b32.xlu1 %v885_v47, %s2933_s6  ;;  %894 = vrot.lane.b32.xlu0 %v886_v48, %s2933_s6  ;;  %v732_v47 = vmul.f32 %v729_v38, %v3127_v4 }
  0xf2   : > { %911 = vrot.lane.b32.xlu1 %v905_v50, %s2934_s8  ;;  %913 = vrot.lane.b32.xlu0 %v906_v51, %s2934_s8  ;;  %v753_v50 = vmul.f32 %v750_v42, %v3127_v4  ;;  %v752_v51 = vmul.f32 %v750_v42, %v3131_v7  ;;  %v1079_v42 = vstv %s2700_s18  ;;  %s3443_s18 = sld [smem:[#allocation4 + $0x42]] }
  0xf6   : > { %915 = vrot.lane.b32.xlu1 %v907_v54, %s2934_s8  ;;  %932 = vrot.lane.b32.xlu0 %v926_v55, %s2935_s14 }
  0xfa   : > { %934 = vrot.lane.b32.xlu1 %v927_v56, %s2935_s14  ;;  %936 = vrot.lane.b32.xlu0 %v928_v57, %s2935_s14  ;;  %v773_v56 = vmul.f32 %v771_v52, %v3131_v7  ;;  %v772_v57 = vmul.f32 %v771_v52, %v3119_v60 }
  0xfe   : > { %953 = vrot.lane.b32.xlu1 %v947_v62, %s2936_s16  ;;  %955 = vrot.lane.b32.xlu0 %v948_v63, %s2936_s16  ;;  %v793_v62 = vmul.f32 %v792_v58, %v3119_v60  ;;  %v774_v63 = vmul.f32 %v771_v52, %v3127_v4  ;;  %v1100_v52 = vstv %s2707_s19  ;;  %s2720_s19 = sld [smem:[#allocation4 + $0x32]] }
 0x102   : > { %957 = vrot.lane.b32.xlu1 %v949_v5, %s2936_s16  ;;  %453 = vrot.lane.b32.xlu0 %v447_v2, %s2931_s30  ;;  %v795_v5 = vmul.f32 %v792_v58, %v3127_v4 }
 0x106   : > { %457 = vrot.lane.b32.xlu0 %v449_v10, %s2931_s30  ;;  %455 = vrot.lane.b32.xlu1 %v448_v11, %s2931_s30  ;;  %v794_v10 = vmul.f32 %v792_v58, %v3131_v7  ;;  %v813_v11 = vstv %s2713_s7  ;;  %v1101_v58 = vmul.f32 %v1100_v52, %v3119_v60  ;;  %s2708_s7 = sld [smem:[#allocation4 + $0x26]] }
 0x107   : > { %v814_v17 = vmul.f32 %v813_v11, %v3119_v60  ;;  %v816_v22 = vmul.f32 %v813_v11, %v3127_v4 }
 0x10a   : > { %475 = vrot.lane.b32.xlu0 %v468_v15, %s2932_s4  ;;  %473 = vrot.lane.b32.xlu1 %v467_v16, %s2932_s4  ;;  %v815_v16 = vmul.f32 %v813_v11, %v3131_v7  ;;  %v1102_v11 = vmul.f32 %v1100_v52, %v3131_v7 }
 0x10e   : > { %493 = vrot.lane.b32.xlu0 %v487_v18, %s2933_s6  ;;  %477 = vrot.lane.b32.xlu1 %v469_v19, %s2932_s4  ;;  %v1016_v18 = vstv %s2679_s12  ;;  %s2715_s12 = sld [smem:[#allocation4 + $0x2d]] }
 0x10f   : > { %v1019_v25 = vmul.f32 %v1016_v18, %v3127_v4 }
 0x112   : > { %497 = vrot.lane.b32.xlu0 %v489_v20, %s2933_s6  ;;  %495 = vrot.lane.b32.xlu1 %v488_v21, %s2933_s6  ;;  %v1017_v21 = vmul.f32 %v1016_v18, %v3119_v60 }
 0x116   : > { %515 = vrot.lane.b32.xlu0 %v508_v23, %s2934_s8  ;;  %513 = vrot.lane.b32.xlu1 %v507_v24, %s2934_s8 }
 0x11a   : > { %533 = vrot.lane.b32.xlu0 %v527_v26, %s2935_s14  ;;  %517 = vrot.lane.b32.xlu1 %v509_v27, %s2934_s8  ;;  %v1018_v26 = vmul.f32 %v1016_v18, %v3131_v7  ;;  %v1037_v27 = vstv %s2686_s15  ;;  %s2671_s15 = sld [smem:[#allocation4 + $0x1]] }
 0x11b   : > { %v1039_v30 = vmul.f32 %v1037_v27, %v3131_v7 }
 0x11e   : > { %537 = vrot.lane.b32.xlu0 %v529_v28, %s2935_s14  ;;  %535 = vrot.lane.b32.xlu1 %v528_v29, %s2935_s14 }
 0x122   : > { %555 = vrot.lane.b32.xlu0 %v548_v31, %s2936_s16  ;;  %553 = vrot.lane.b32.xlu1 %v547_v32, %s2936_s16  ;;  %v1038_v31 = vmul.f32 %v1037_v27, %v3119_v60  ;;  %v1058_v32 = vstv %s2693_s17  ;;  %s2729_s17 = sld [smem:[#allocation4 + $0x3b]] }
 0x126   : > { %715 = vrot.lane.b32.xlu0 %v709_v34, %s2931_s30  ;;  %557 = vrot.lane.b32.xlu1 %v549_v35, %s2936_s16  ;;  %v1059_v35 = vmul.f32 %v1058_v32, %v3119_v60 }
 0x12a   : > { %719 = vrot.lane.b32.xlu0 %v711_v36, %s2931_s30  ;;  %717 = vrot.lane.b32.xlu1 %v710_v37, %s2931_s30  ;;  %v1040_v36 = vmul.f32 %v1037_v27, %v3127_v4 }
 0x12c   : > { %v3175_v39 = vpop.permute.xlu0 %578 }
 0x12d   : > { %4315 = vst [vmem:[#allocation10_spill] sm:$0xff] %v3175_v39 }
 0x12e   : > { %738 = vrot.lane.b32.xlu0 %v731_v40, %s2932_s4  ;;  %736 = vrot.lane.b32.xlu1 %v730_v41, %s2932_s4  ;;  %v1061_v40 = vmul.f32 %v1058_v32, %v3127_v4  ;;  %v1060_v41 = vmul.f32 %v1058_v32, %v3131_v7 }
 0x130   : > { %v3181_v43 = vpop.permute.xlu1 %580  ;;  %v3183_v44 = vpop.permute.xlu0 %582 }
 0x131   : > { %4316 = vst [vmem:[#allocation11_spill] sm:$0xff] %v3181_v43  ;;  %4317 = vst [vmem:[#allocation12_spill] sm:$0xff] %v3183_v44  ;;  %v1408_v44 = vstv %s2708_s7  ;;  %v1429_v43 = vstv %s2715_s12  ;;  %s2688_s7 = sld [smem:[#allocation4 + $0x12]]  ;;  %s2942_s12 = smov 125  }
 0x132   : > { %757 = vrot.lane.b32.xlu0 %v751_v45, %s2933_s6  ;;  %740 = vrot.lane.b32.xlu1 %v732_v47, %s2932_s4 }
 0x134   : > { %v3189_v48 = vpop.permute.xlu1 %597  ;;  %v3191_v49 = vpop.permute.xlu0 %599 }
 0x135   : > { %4318 = vst [vmem:[#allocation13_spill] sm:$0xff] %v3189_v48  ;;  %4319 = vst [vmem:[#allocation14_spill] sm:$0xff] %v3191_v49 }
 0x136   : > { %761 = vrot.lane.b32.xlu0 %v753_v50, %s2933_s6  ;;  %759 = vrot.lane.b32.xlu1 %v752_v51, %s2933_s6  ;;  %v1081_v50 = vmul.f32 %v1079_v42, %v3131_v7  ;;  %v1080_v51 = vmul.f32 %v1079_v42, %v3119_v60 }
 0x138   : > { %v3197_v54 = vpop.permute.xlu1 %601  ;;  %v3199_v55 = vpop.permute.xlu0 %616 }
 0x139   : > { %4320 = vst [vmem:[#allocation15_spill] sm:$0xff] %v3197_v54  ;;  %4321 = vst [vmem:[#allocation16_spill] sm:$0xff] %v3199_v55 }
 0x13a   : > { %780 = vrot.lane.b32.xlu0 %v773_v56, %s2934_s8  ;;  %778 = vrot.lane.b32.xlu1 %v772_v57, %s2934_s8 }
 0x13c   : > { %v3205_v59 = vpop.permute.xlu1 %618  ;;  %v3207_v61 = vpop.permute.xlu0 %620 }
 0x13d   : > { %4322 = vst [vmem:[#allocation17_spill] sm:$0xff] %v3205_v59  ;;  %4323 = vst [vmem:[#allocation18_spill] sm:$0xff] %v3207_v61  ;;  %v1366_v61 = vstv %s2694_s3  ;;  %v1387_v59 = vstv %s2701_s5  ;;  %s2722_s3 = sld [smem:[#allocation4 + $0x34]] }
 0x13e   : > { %799 = vrot.lane.b32.xlu0 %v793_v62, %s2935_s14  ;;  %782 = vrot.lane.b32.xlu1 %v774_v63, %s2934_s8  ;;  %v1082_v62 = vmul.f32 %v1079_v42, %v3127_v4  ;;  %s2681_s5 = sld [smem:[#allocation4 + $0xb]] }
 0x140   : > { %v3213_v0 = vpop.permute.xlu1 %635  ;;  %v3215_v2 = vpop.permute.xlu0 %637 }
 0x141   : > { %4324 = vst [vmem:[#allocation19_spill] sm:$0xff] %v3213_v0  ;;  %4325 = vst [vmem:[#allocation20_spill] sm:$0xff] %v3215_v2 }
 0x142   : > { %803 = vrot.lane.b32.xlu0 %v795_v5, %s2935_s14  ;;  %801 = vrot.lane.b32.xlu1 %v794_v10, %s2935_s14  ;;  %v1103_v10 = vmul.f32 %v1100_v52, %v3127_v4 }
 0x144   : > { %v3221_v14 = vpop.permute.xlu1 %639  ;;  %v3223_v15 = vpop.permute.xlu0 %654 }
 0x145   : > { %4326 = vst [vmem:[#allocation21_spill] sm:$0xff] %v3221_v14  ;;  %4327 = vst [vmem:[#allocation22_spill] sm:$0xff] %v3223_v15  ;;  %v1324_v15 = vstv %s2680_s27  ;;  %s2939_s27 = smov 126  }
 0x146   : > { %822 = vrot.lane.b32.xlu0 %v815_v16, %s2936_s16  ;;  %820 = vrot.lane.b32.xlu1 %v814_v17, %s2936_s16  ;;  %v1121_v16 = vstv %s2714_s20  ;;  %s2743_s20 = sld [smem:[#allocation4 + $0x49]] }
 0x148   : > { %v3229_v19 = vpop.permute.xlu1 %656  ;;  %v3231_v20 = vpop.permute.xlu0 %658 }
 0x149   : > { %4328 = vst [vmem:[#allocation23_spill] sm:$0xff] %v3229_v19  ;;  %4329 = vst [vmem:[#allocation24_spill] sm:$0xff] %v3231_v20 }
 0x14a   : > { %1023 = vrot.lane.b32.xlu0 %v1017_v21, %s2931_s30  ;;  %824 = vrot.lane.b32.xlu1 %v816_v22, %s2936_s16  ;;  %v1123_v21 = vmul.f32 %v1121_v16, %v3131_v7  ;;  %v1122_v22 = vmul.f32 %v1121_v16, %v3119_v60 }
 0x14c   : > { %v3237_v23 = vpop.permute.xlu1 %673  ;;  %v3239_v24 = vpop.permute.xlu0 %675 }
 0x14d   : > { %4330 = vst [vmem:[#allocation25_spill] sm:$0xff] %v3237_v23  ;;  %4331 = vst [vmem:[#allocation26_spill] sm:$0xff] %v3239_v24 }
 0x14e   : > { %1027 = vrot.lane.b32.xlu0 %v1019_v25, %s2931_s30  ;;  %1025 = vrot.lane.b32.xlu1 %v1018_v26, %s2931_s30  ;;  %v1149_v25 = vstv %s2728_s21  ;;  %s2750_s21 = sld [smem:[#allocation4 + $0x50]] }
 0x150   : > { %v3245_v28 = vpop.permute.xlu1 %677  ;;  %v3247_v29 = vpop.permute.xlu0 %848 }
 0x151   : > { %4332 = vst [vmem:[#allocation27_spill] sm:$0xff] %v3245_v28  ;;  %v4344_v28 = vmov 0.0  }
 0x152   : > { %1046 = vrot.lane.b32.xlu0 %v1039_v30, %s2932_s4  ;;  %1044 = vrot.lane.b32.xlu1 %v1038_v31, %s2932_s4  ;;  %v1150_v30 = vmul.f32 %v1149_v25, %v3042_v9  ;;  %v1124_v31 = vmul.f32 %v1121_v16, %v3127_v4 }
 0x154   : > { %v3253_v33 = vpop.permute.xlu1 %850  ;;  %v3255_v34 = vpop.permute.xlu0 %852 }
 0x156   : > { %1065 = vrot.lane.b32.xlu0 %v1059_v35, %s2933_s6  ;;  %1048 = vrot.lane.b32.xlu1 %v1040_v36, %s2932_s4  ;;  %v1152_v36 = vmul.f32 %v1149_v25, %v3050_v13 }
 0x158   : > { %v3261_v37 = vpop.permute.xlu1 %869  ;;  %v3263_v38 = vpop.permute.xlu0 %871 }
 0x15a   : > { %1069 = vrot.lane.b32.xlu0 %v1061_v40, %s2933_s6  ;;  %1067 = vrot.lane.b32.xlu1 %v1060_v41, %s2933_s6  ;;  %v1151_v40 = vmul.f32 %v1149_v25, %v3047_v12  ;;  %v1170_v41 = vstv %s2735_s22  ;;  %s2757_s22 = sld [smem:[#allocation4 + $0x57]] }
 0x15b   : > { %v1171_v52 = vmul.f32 %v1170_v41, %v3042_v9  ;;  %v1173_v16 = vmul.f32 %v1170_v41, %v3050_v13 }
 0x15c   : > { %v3269_v45 = vpop.permute.xlu1 %873  ;;  %v3271_v47 = vpop.permute.xlu0 %890 }
 0x15e   : > { %1088 = vrot.lane.b32.xlu0 %v1081_v50, %s2934_s8  ;;  %1086 = vrot.lane.b32.xlu1 %v1080_v51, %s2934_s8  ;;  %v1172_v51 = vmul.f32 %v1170_v41, %v3047_v12 }
 0x160   : > { %v3277_v56 = vpop.permute.xlu1 %892  ;;  %v3279_v57 = vpop.permute.xlu0 %894 }
 0x162   : > { %1107 = vrot.lane.b32.xlu0 %v1101_v58, %s2935_s14  ;;  %1090 = vrot.lane.b32.xlu1 %v1082_v62, %s2934_s8  ;;  %v1191_v58 = vstv %s2742_s23  ;;  %s2764_s23 = sld [smem:[#allocation4 + $0x5e]] }
 0x163   : > { %v1193_v25 = vmul.f32 %v1191_v58, %v3047_v12 }
 0x164   : > { %v3285_v63 = vpop.permute.xlu1 %911  ;;  %v3287_v5 = vpop.permute.xlu0 %913 }
 0x166   : > { %1111 = vrot.lane.b32.xlu0 %v1103_v10, %s2935_s14  ;;  %1109 = vrot.lane.b32.xlu1 %v1102_v11, %s2935_s14  ;;  %v1192_v11 = vmul.f32 %v1191_v58, %v3042_v9 }
 0x168   : > { %v3293_v17 = vpop.permute.xlu1 %915  ;;  %v3295_v18 = vpop.permute.xlu0 %932 }
 0x16a   : > { %1130 = vrot.lane.b32.xlu0 %v1123_v21, %s2936_s16  ;;  %1128 = vrot.lane.b32.xlu1 %v1122_v22, %s2936_s16 }
 0x16c   : > { %v3301_v26 = vpop.permute.xlu1 %934  ;;  %v3303_v27 = vpop.permute.xlu0 %936 }
 0x16e   : > { %1156 = vrot.lane.b32.xlu0 %v1150_v30, %s2931_s30  ;;  %1132 = vrot.lane.b32.xlu1 %v1124_v31, %s2936_s16  ;;  %v1194_v30 = vmul.f32 %v1191_v58, %v3050_v13  ;;  %v1212_v31 = vstv %s2749_s24  ;;  %s2938_s24 = smov 127  }
 0x16f   : > { %v1213_v41 = vmul.f32 %v1212_v31, %v3042_v9 }
 0x170   : > { %v3309_v32 = vpop.permute.xlu1 %953  ;;  %v3311_v35 = vpop.permute.xlu0 %955 }
 0x172   : > { %1160 = vrot.lane.b32.xlu0 %v1152_v36, %s2931_s30  ;;  %1158 = vrot.lane.b32.xlu1 %v1151_v40, %s2931_s30 }
 0x174   : > { %v3317_v42 = vpop.permute.xlu1 %957  ;;  %v3319_v50 = vpop.permute.xlu0 %453 }
 0x175   : > { %4333 = vst [vmem:[#allocation28_spill] sm:$0xff] %v3319_v50 }
 0x176   : > { %1179 = vrot.lane.b32.xlu0 %v1172_v51, %s2932_s4  ;;  %1177 = vrot.lane.b32.xlu1 %v1171_v52, %s2932_s4  ;;  %v1214_v51 = vmul.f32 %v1212_v31, %v3047_v12  ;;  %v1233_v52 = vstv %s2756_s25  ;;  %s2672_s25 = sld [smem:[#allocation4 + $0x2]] }
 0x177   : > { %v1236_v46 = vmul.f32 %v1233_v52, %v3050_v13 }
 0x178   : > { %v3325_v62 = vpop.permute.xlu1 %455  ;;  %v3327_v10 = vpop.permute.xlu0 %457 }
 0x179   : > { %4334 = vst [vmem:[#allocation29_spill] sm:$0xff] %v3325_v62  ;;  %4335 = vst [vmem:[#allocation30_spill] sm:$0xff] %v3327_v10 }
 0x17a   : > { %1198 = vrot.lane.b32.xlu0 %v1192_v11, %s2933_s6  ;;  %1181 = vrot.lane.b32.xlu1 %v1173_v16, %s2932_s4  ;;  %v1215_v16 = vmul.f32 %v1212_v31, %v3050_v13  ;;  %v1254_v31 = vstv %s2763_s26  ;;  %s2721_s26 = sld [smem:[#allocation4 + $0x33]] }
 0x17b   : > { %v1255_v20 = vmul.f32 %v1254_v31, %v3042_v9 }
 0x17c   : > { %v3333_v21 = vpop.permute.xlu1 %473  ;;  %v3335_v22 = vpop.permute.xlu0 %475 }
 0x17d   : > { %4336 = vst [vmem:[#allocation31_spill] sm:$0xff] %v3333_v21  ;;  %4337 = vst [vmem:[#allocation32_spill] sm:$0xff] %v3335_v22 }
 0x17e   : > { %1200 = vrot.lane.b32.xlu1 %v1193_v25, %s2933_s6  ;;  %1202 = vrot.lane.b32.xlu0 %v1194_v30, %s2933_s6  ;;  %v1234_v25 = vmul.f32 %v1233_v52, %v3042_v9  ;;  %v1275_v30 = vadd.s32 4294967295, %v3023_v6 }
 0x180   : > { %v3341_v36 = vpop.permute.xlu1 %477  ;;  %v3343_v40 = vpop.permute.xlu0 %493  ;;  %vm1277_vm5 = vcmp.ge.s32.totalorder %v1275_v30, 0 }
 0x181   : > { %4338 = vst [vmem:[#allocation33_spill] sm:$0xff] %v3341_v36  ;;  %4339 = vst [vmem:[#allocation34_spill] sm:$0xff] %v3343_v40 }
 0x182   : > { %1219 = vrot.lane.b32.xlu1 %v1213_v41, %s2934_s8  ;;  %1221 = vrot.lane.b32.xlu0 %v1214_v51, %s2934_s8  ;;  %v1235_v51 = vmul.f32 %v1233_v52, %v3047_v12  ;;  %v1256_v52 = vmul.f32 %v1254_v31, %v3047_v12 }
 0x184   : > { %v3349_v58 = vpop.permute.xlu1 %495  ;;  %v3351_v11 = vpop.permute.xlu0 %497 }
 0x185   : > { %4340 = vst [vmem:[#allocation35_spill] sm:$0xff] %v3349_v58  ;;  %4341 = vst [vmem:[#allocation36_spill] sm:$0xff] %v3351_v11 }
 0x186   : > { %1223 = vrot.lane.b32.xlu1 %v1215_v16, %s2934_s8  ;;  %1240 = vrot.lane.b32.xlu0 %v1234_v25, %s2935_s14  ;;  %v2772_v16 = vsel %vm1277_vm5, 1.0, %v4344_v28  ;;  %v2773_v25 = vsel %vm1278_vm6, 1.0, %v4344_v28 }
 0x187   : > { %v2848_v3 = vpack.i.bf16 %v2773_v25, %v2772_v16  ;;  %v1345_v16 = vstv %s2687_s28  ;;  %s2941_s28 = smov 3  }
 0x188   : > { %v3359_v1 = vpop.permute.xlu1 %513  ;;  %v3361_v41 = vpop.permute.xlu0 %515 }
 0x189   : > { %4342 = vst [vmem:[#allocation37_spill] sm:$0xff] %v3359_v1  ;;  %4343 = vst [vmem:[#allocation38_spill] sm:$0xff] %v3361_v41 }
 0x18a   : > { %1242 = vrot.lane.b32.xlu1 %v1235_v51, %s2935_s14  ;;  %1244 = vrot.lane.b32.xlu0 %v1236_v46, %s2935_s14  ;;  %v1257_v51 = vmul.f32 %v1254_v31, %v3050_v13 }
 0x18c   : > { %v3369_v23 = vpop.permute.xlu1 %517  ;;  %v3371_v24 = vpop.permute.xlu0 %533 }
 0x18d   : > { %4345 = vst [vmem:[#allocation39_spill] sm:$0xff] %v3369_v23  ;;  %4346 = vst [vmem:[#allocation40_spill] sm:$0xff] %v3371_v24 }
 0x18e   : > { %1261 = vrot.lane.b32.xlu1 %v1255_v20, %s2936_s16  ;;  %1263 = vrot.lane.b32.xlu0 %v1256_v52, %s2936_s16  ;;  %v1326_v20 = vmul.f32 %v1324_v15, %v3131_v7  ;;  %v1325_v52 = vmul.f32 %v1324_v15, %v3119_v60 }
 0x190   : > { %v3377_v30 = vpop.permute.xlu1 %535  ;;  %v3379_v46 = vpop.permute.xlu0 %537 }
 0x191   : > { %4347 = vst [vmem:[#allocation41_spill] sm:$0xff] %v3377_v30  ;;  %4348 = vst [vmem:[#allocation42_spill] sm:$0xff] %v3379_v46 }
 0x192   : > { %1265 = vrot.lane.b32.xlu1 %v1257_v51, %s2936_s16  ;;  %2849 = vrot.lane.b32.xlu0 %v2848_v3, %s2937_s29  ;;  %v1346_v3 = vmul.f32 %v1345_v16, %v3119_v60  ;;  %v1327_v51 = vmul.f32 %v1324_v15, %v3127_v4  ;;  %s2673_s29 = sld [smem:[#allocation4 + $0x3]] }
 0x194   : > { %v3383_v19 = vpop.permute.xlu1 %553  ;;  %v3385_v14 = vpop.permute.xlu0 %555 }
 0x195   : > { %4349 = vst [vmem:[#allocation43_spill] sm:$0xff] %v3383_v19  ;;  %4350 = vst [vmem:[#allocation44_spill] sm:$0xff] %v3385_v14  ;;  %v1411_v14 = vmul.f32 %v1408_v44, %v3127_v4 }
 0x196   : > { %1333 = vrot.lane.b32.xlu1 %v1326_v20, %s2931_s30  ;;  %1331 = vrot.lane.b32.xlu0 %v1325_v52, %s2931_s30  ;;  %v1348_v20 = vmul.f32 %v1345_v16, %v3127_v4  ;;  %v1347_v52 = vmul.f32 %v1345_v16, %v3131_v7 }
 0x198   : > { %v3391_v31 = vpop.permute.xlu1 %557  ;;  %v3393_v25 = vpop.permute.xlu0 %715 }
 0x199   : > { %4351 = vst [vmem:[#allocation45_spill] sm:$0xff] %v3391_v31  ;;  %v3432_v31 = vstv %s2671_s15  ;;  %s2695_s15 = sld [smem:[#allocation4 + $0x19]] }
 0x19a   : > { %1352 = vrot.lane.b32.xlu1 %v1346_v3, %s2932_s4  ;;  %1335 = vrot.lane.b32.xlu0 %v1327_v51, %s2931_s30  ;;  %v1368_v3 = vmul.f32 %v1366_v61, %v3131_v7  ;;  %v1367_v51 = vmul.f32 %v1366_v61, %v3119_v60  ;;  %v704_v46 = vmul.f32 %v3432_v31, %v3127_v4 }
 0x19c   : > { %v3399_v0 = vpop.permute.xlu1 %717  ;;  %v720_v2 = vpop.permute.xlu0 %719 }
 0x19d   : > { %v722_v19 = vsel %vm459_vm7, %v3399_v0, %v720_v2 }
 0x19e   : > { %1356 = vrot.lane.b32.xlu1 %v1348_v20, %s2932_s4  ;;  %1354 = vrot.lane.b32.xlu0 %v1347_v52, %s2932_s4  ;;  %v1388_v20 = vmul.f32 %v1387_v59, %v3119_v60  ;;  %v1369_v52 = vmul.f32 %v1366_v61, %v3127_v4 }
 0x1a0   : > { %v3405_v55 = vpop.permute.xlu1 %736  ;;  %v3407_v15 = vpop.permute.xlu0 %738 }
 0x1a2   : > { %1375 = vrot.lane.b32.xlu1 %v1368_v3, %s2933_s6  ;;  %1373 = vrot.lane.b32.xlu0 %v1367_v51, %s2933_s6  ;;  %v1390_v3 = vmul.f32 %v1387_v59, %v3127_v4  ;;  %v1389_v51 = vmul.f32 %v1387_v59, %v3131_v7 }
 0x1a4   : > { %v741_v16 = vpop.permute.xlu1 %740  ;;  %v3413_v54 = vpop.permute.xlu0 %757 }
 0x1a5   : > { %v743_v23 = vsel %vm479_vm8, %v3407_v15, %v741_v16 }
 0x1a6   : > { %1394 = vrot.lane.b32.xlu1 %v1388_v20, %s2934_s8  ;;  %1377 = vrot.lane.b32.xlu0 %v1369_v52, %s2933_s6  ;;  %v1410_v20 = vmul.f32 %v1408_v44, %v3131_v7  ;;  %v1409_v52 = vmul.f32 %v1408_v44, %v3119_v60  ;;  %v1432_v44 = vmul.f32 %v1429_v43, %v3127_v4 }
 0x1a8   : > { %v3419_v48 = vpop.permute.xlu1 %759  ;;  %v762_v49 = vpop.permute.xlu0 %761 }
 0x1a9   : > { %v764_v41 = vsel %vm499_vm9, %v3419_v48, %v762_v49 }
 0x1aa   : > { %1398 = vrot.lane.b32.xlu1 %v1390_v3, %s2934_s8  ;;  %1396 = vrot.lane.b32.xlu0 %v1389_v51, %s2934_s8  ;;  %v1430_v51 = vmul.f32 %v1429_v43, %v3119_v60 }
 0x1ac   : > { %v3425_v39 = vpop.permute.xlu1 %778  ;;  %v3427_v61 = vpop.permute.xlu0 %780 }
 0x1ae   : > { %1417 = vrot.lane.b32.xlu1 %v1410_v20, %s2935_s14  ;;  %1415 = vrot.lane.b32.xlu0 %v1409_v52, %s2935_s14  ;;  %v703_v20 = vmul.f32 %v3432_v31, %v3131_v7  ;;  %v728_v52 = vadd.f32 %v720_v2, %v704_v46 }
 0x1b0   : > { %v783_v59 = vpop.permute.xlu1 %782  ;;  %v3435_v3 = vpop.permute.xlu0 %799  ;;  %v727_v24 = vadd.f32 %v722_v19, %v703_v20  ;;  %v749_v1 = vadd.f32 %v741_v16, %v728_v52 }
 0x1b1   : > { %v785_v19 = vsel %vm519_vm10, %v3427_v61, %v783_v59 }
 0x1b2   : > { %1436 = vrot.lane.b32.xlu1 %v1430_v51, %s2936_s16  ;;  %1419 = vrot.lane.b32.xlu0 %v1411_v14, %s2935_s14  ;;  %v1431_v51 = vmul.f32 %v1429_v43, %v3131_v7  ;;  %v748_v2 = vadd.f32 %v743_v23, %v727_v24  ;;  %v1457_v14 = vstv %s2729_s17  ;;  %v770_v46 = vadd.f32 %v762_v49, %v749_v1  ;;  %s2702_s17 = sld [smem:[#allocation4 + $0x20]] }
 0x1b3   : > { %v1459_v43 = vmul.f32 %v1457_v14, %v3047_v12  ;;  %v1458_v24 = vmul.f32 %v1457_v14, %v3042_v9  ;;  %v1478_v1 = vstv %s3443_s18  ;;  %s2709_s18 = sld [smem:[#allocation4 + $0x27]] }
 0x1b4   : > { %v3451_v30 = vpop.permute.xlu1 %801  ;;  %v804_v11 = vpop.permute.xlu0 %803  ;;  %v769_v20 = vadd.f32 %v764_v41, %v748_v2  ;;  %v791_v36 = vadd.f32 %v783_v59, %v770_v46  ;;  %v1479_v59 = vmul.f32 %v1478_v1, %v3042_v9  ;;  %v1481_v10 = vmul.f32 %v1478_v1, %v3050_v13 }
 0x1b5   : > { %v806_v23 = vsel %vm539_vm11, %v3451_v30, %v804_v11 }
 0x1b6   : > { %1440 = vrot.lane.b32.xlu1 %v1432_v44, %s2936_s16  ;;  %1438 = vrot.lane.b32.xlu0 %v1431_v51, %s2936_s16  ;;  %v790_v49 = vadd.f32 %v785_v19, %v769_v20  ;;  %v812_v44 = vadd.f32 %v804_v11, %v791_v36  ;;  %v3472_v51 = vstv %s2720_s19  ;;  %v1460_v36 = vmul.f32 %v1457_v14, %v3050_v13  ;;  %s2716_s19 = sld [smem:[#allocation4 + $0x2e]] }
 0x1b7   : > { %v837_v46 = vmul.f32 %v3472_v51, %v3050_v13  ;;  %v836_v11 = vmul.f32 %v3472_v51, %v3047_v12  ;;  %v855_v14 = vsel %vm459_vm7, %v3253_v33, %v3255_v34 }
 0x1b8   : > { %v3461_v16 = vpop.permute.xlu1 %820  ;;  %v3463_v52 = vpop.permute.xlu0 %822  ;;  %v811_v41 = vadd.f32 %v806_v23, %v790_v49 }
 0x1ba   : > { %1466 = vrot.lane.b32.xlu1 %v1459_v43, %s2931_s30  ;;  %1464 = vrot.lane.b32.xlu0 %v1458_v24, %s2931_s30 }
 0x1bc   : > { %v825_v2 = vpop.permute.xlu1 %824  ;;  %v3474_v40 = vpop.permute.xlu0 %1023 }
 0x1bd   : > { %v827_v19 = vsel %vm559_vm12, %v3463_v52, %v825_v2  ;;  %v833_v20 = vadd.f32 %v825_v2, %v812_v44 }
 0x1be   : > { %v832_v43 = vadd.f32 %v827_v19, %v811_v41  ;;  %1485 = vrot.lane.b32.xlu1 %v1479_v59, %s2932_s4  ;;  %1468 = vrot.lane.b32.xlu0 %v1460_v36, %s2931_s30  ;;  %v1480_v41 = vmul.f32 %v1478_v1, %v3047_v12  ;;  %v1499_v59 = vstv %s2743_s20  ;;  %s2730_s20 = sld [smem:[#allocation4 + $0x3c]] }
 0x1bf   : > { %v840_v23 = vadd.f32 %v837_v46, %v833_v20  ;;  %v876_v46 = vsel %vm479_vm8, %v3263_v38, %v3269_v45  ;;  %v1500_v1 = vmul.f32 %v1499_v59, %v3042_v9 }
 0x1c0   : > { %v839_v24 = vadd.f32 %v836_v11, %v832_v43  ;;  %v3486_v49 = vpop.permute.xlu1 %1025  ;;  %v3488_v58 = vpop.permute.xlu0 %1027  ;;  %v1520_v43 = vstv %s2750_s21  ;;  %s2737_s21 = sld [smem:[#allocation4 + $0x43]] }
 0x1c1   : > { %v861_v44 = vadd.f32 %v3255_v34, %v840_v23  ;;  %v1501_v34 = vmul.f32 %v1499_v59, %v3047_v12 }
 0x1c2   : > { %v860_v2 = vadd.f32 %v855_v14, %v839_v24  ;;  %1489 = vrot.lane.b32.xlu1 %v1481_v10, %s2932_s4  ;;  %1487 = vrot.lane.b32.xlu0 %v1480_v41, %s2932_s4  ;;  %v897_v10 = vsel %vm499_vm9, %v3277_v56, %v3279_v57  ;;  %v1521_v14 = vmul.f32 %v1520_v43, %v3042_v9 }
 0x1c3   : > { %v882_v19 = vadd.f32 %v3269_v45, %v861_v44  ;;  %v1502_v41 = vmul.f32 %v1499_v59, %v3050_v13 }
 0x1c4   : > { %v3502_v20 = vpop.permute.xlu1 %1044  ;;  %v3504_v36 = vpop.permute.xlu0 %1046  ;;  %v881_v11 = vadd.f32 %v876_v46, %v860_v2  ;;  %v918_v2 = vsel %vm519_vm10, %v3287_v5, %v3293_v17 }
 0x1c5   : > { %v903_v45 = vadd.f32 %v3279_v57, %v882_v19  ;;  %v1523_v19 = vmul.f32 %v1520_v43, %v3050_v13 }
 0x1c6   : > { %1508 = vrot.lane.b32.xlu1 %v1501_v34, %s2933_s6  ;;  %1506 = vrot.lane.b32.xlu0 %v1500_v1, %s2933_s6  ;;  %v902_v44 = vadd.f32 %v897_v10, %v881_v11  ;;  %v1522_v11 = vmul.f32 %v1520_v43, %v3047_v12  ;;  %v1541_v1 = vstv %s2757_s22  ;;  %v939_v10 = vsel %vm539_vm11, %v3301_v26, %v3303_v27  ;;  %s2744_s22 = sld [smem:[#allocation4 + $0x4a]] }
 0x1c7   : > { %v924_v34 = vadd.f32 %v3293_v17, %v903_v45  ;;  %v1543_v21 = vmul.f32 %v1541_v1, %v3047_v12  ;;  %v1542_v43 = vmul.f32 %v1541_v1, %v3042_v9  ;;  %v3544_v45 = vstv %s2764_s23  ;;  %s2751_s23 = sld [smem:[#allocation4 + $0x51]] }
 0x1c8   : > { %v3514_v23 = vpop.permute.xlu1 %1048  ;;  %v3516_v24 = vpop.permute.xlu0 %1065  ;;  %v923_v59 = vadd.f32 %v918_v2, %v902_v44  ;;  %v2847_v2 = vunpack.i.h.bf16 %v3108_v53 }
 0x1c9   : > { %v945_v17 = vadd.f32 %v3303_v27, %v924_v34  ;;  %v1563_v27 = vmul.f32 %v3544_v45, %v3042_v9 }
 0x1ca   : > { %1527 = vrot.lane.b32.xlu1 %v1521_v14, %s2934_s8  ;;  %1510 = vrot.lane.b32.xlu0 %v1502_v41, %s2933_s6  ;;  %v944_v44 = vadd.f32 %v939_v10, %v923_v59 }
 0x1cb   : > { %v966_v34 = vadd.f32 %v3317_v42, %v945_v17  ;;  %v721_v17 = vsel %vm459_vm7, %v3393_v25, %v3399_v0  ;;  %v784_v0 = vsel %vm519_vm10, %v3425_v39, %v3427_v61  ;;  %v826_v39 = vsel %vm559_vm12, %v3461_v16, %v3463_v52 }
 0x1cc   : > { %v3525_v46 = vpop.permute.xlu1 %1067  ;;  %v3527_v57 = vpop.permute.xlu0 %1069 }
 0x1cd   : > { %v992_v28 = vmul.f32 %v2847_v2, %v966_v34  ;;  %v1072_v16 = vsel %vm499_vm9, %v3525_v46, %v3527_v57 }
 0x1ce   : > { %1531 = vrot.lane.b32.xlu1 %v1523_v19, %s2934_s8  ;;  %1529 = vrot.lane.b32.xlu0 %v1522_v11, %s2934_s8  ;;  %v2846_v19 = vunpack.i.l.bf16 %v3108_v53  ;;  %v960_v11 = vsel %vm559_vm12, %v3311_v35, %v3317_v42 }
 0x1cf   : > { %v965_v59 = vadd.f32 %v960_v11, %v944_v44  ;;  %v702_v44 = vmul.f32 %v3432_v31, %v3119_v60 }
 0x1d0   : > { %v3537_v14 = vpop.permute.xlu1 %1086  ;;  %v3539_v41 = vpop.permute.xlu0 %1088  ;;  %v986_v10 = vsel %vm985_vm13, %v2846_v19, %v2847_v2  ;;  %v742_v2 = vsel %vm479_vm8, %v3405_v55, %v3407_v15  ;;  %v805_v55 = vsel %vm539_vm11, %v3435_v3, %v3451_v30  ;;  %v1051_v3 = vsel %vm479_vm8, %v3504_v36, %v3514_v23 }
 0x1d1   : > { %v991_v8 = vmul.f32 %v986_v10, %v965_v59  ;;  %v1009_v59 = vstv %s2672_s25  ;;  %s2689_s25 = sld [smem:[#allocation4 + $0x13]]  ;;  %vm1907_vm13 = vcmask 31744  }
 0x1d2   : > { %1550 = vrot.lane.b32.xlu1 %v1543_v21, %s2935_s14  ;;  %1548 = vrot.lane.b32.xlu0 %v1542_v43, %s2935_s14  ;;  %v1544_v21 = vmul.f32 %v1541_v1, %v3050_v13  ;;  %v1012_v10 = vmul.f32 %v1009_v59, %v3127_v4 }
 0x1d4   : > { %v1091_v22 = vpop.permute.xlu1 %1090  ;;  %v3553_v50 = vpop.permute.xlu0 %1107  ;;  %v1036_v30 = vadd.f32 %v3488_v58, %v1012_v10 }
 0x1d6   : > { %1569 = vrot.lane.b32.xlu1 %v1563_v27, %s2936_s16  ;;  %1552 = vrot.lane.b32.xlu0 %v1544_v21, %s2935_s14  ;;  %v763_v27 = vsel %vm499_vm9, %v3413_v54, %v3419_v48  ;;  %v1030_v48 = vsel %vm459_vm7, %v3486_v49, %v3488_v58  ;;  %v1011_v54 = vmul.f32 %v1009_v59, %v3131_v7 }
 0x1d7   : > { %v835_v58 = vmul.f32 %v3472_v51, %v3042_v9 }
 0x1d8   : > { %v3563_v43 = vpop.permute.xlu1 %1109  ;;  %v1112_v62 = vpop.permute.xlu0 %1111 }
 0x1da   : > { %1000 = vrot.lane.b32.xlu1 %v992_v28, %s2938_s24  ;;  %998 = vrot.lane.b32.xlu0 %v991_v8, %s2938_s24  ;;  %v726_v8 = vadd.f32 %v721_v17, %v702_v44 }
 0x1dc   : > { %v3567_v42 = vpop.permute.xlu1 %1128  ;;  %v3569_v1 = vpop.permute.xlu0 %1130  ;;  %v747_v34 = vadd.f32 %v742_v2, %v726_v8  ;;  %v1035_v2 = vadd.f32 %v1030_v48, %v1011_v54  ;;  %v1010_v54 = vmul.f32 %v1009_v59, %v3119_v60  ;;  %v1071_v59 = vsel %vm499_vm9, %v3516_v24, %v3525_v46 }
 0x1dd   : > { %v1113_v46 = vsel %vm539_vm11, %v3553_v50, %v3563_v43 }
 0x1de   : > { %v768_v21 = vadd.f32 %v763_v27, %v747_v34  ;;  %v1057_v27 = vadd.f32 %v3514_v23, %v1036_v30  ;;  %v1056_v52 = vadd.f32 %v1051_v3, %v1035_v2  ;;  %v1029_v23 = vsel %vm459_vm7, %v3474_v40, %v3486_v49 }
 0x1df   : > { %v1034_v40 = vadd.f32 %v1029_v23, %v1010_v54 }
 0x1e0   : > { %v1133_v11 = vpop.permute.xlu1 %1132  ;;  %v3579_v28 = vpop.permute.xlu0 %1156  ;;  %v789_v15 = vadd.f32 %v784_v0, %v768_v21  ;;  %v1078_v21 = vadd.f32 %v3527_v57, %v1057_v27  ;;  %v1050_v57 = vsel %vm479_vm8, %v3502_v20, %v3504_v36  ;;  %v1092_v36 = vsel %vm519_vm10, %v3537_v14, %v3539_v41 }
 0x1e1   : > { %v1135_v2 = vsel %vm559_vm12, %v3569_v1, %v1133_v11  ;;  %v1134_v14 = vsel %vm559_vm12, %v3567_v42, %v3569_v1 }
 0x1e2   : > { %v810_v44 = vadd.f32 %v805_v55, %v789_v15  ;;  %v1093_v55 = vsel %vm519_vm10, %v3539_v41, %v1091_v22  ;;  %v1077_v15 = vadd.f32 %v1072_v16, %v1056_v52  ;;  %v1099_v48 = vadd.f32 %v1091_v22, %v1078_v21 }
 0x1e3   : > { %v854_v22 = vsel %vm459_vm7, %v3247_v29, %v3253_v33  ;;  %v1055_v16 = vadd.f32 %v1050_v57, %v1034_v40  ;;  %v875_v29 = vsel %vm479_vm8, %v3261_v37, %v3263_v38  ;;  %v896_v38 = vsel %vm499_vm9, %v3271_v47, %v3277_v56 }
 0x1e4   : > { %v3587_v25 = vpop.permute.xlu1 %1158  ;;  %v3589_v31 = vpop.permute.xlu0 %1160  ;;  %v831_v8 = vadd.f32 %v826_v39, %v810_v44  ;;  %v1114_v39 = vsel %vm539_vm11, %v3563_v43, %v1112_v62  ;;  %v1098_v44 = vadd.f32 %v1093_v55, %v1077_v15  ;;  %v1120_v3 = vadd.f32 %v1112_v62, %v1099_v48 }
 0x1e5   : > { %v1076_v33 = vadd.f32 %v1071_v59, %v1055_v16  ;;  %v1163_v37 = vsel %vm459_vm7, %v3587_v25, %v3589_v31 }
 0x1e6   : > { %v838_v10 = vadd.f32 %v835_v58, %v831_v8  ;;  %v1119_v49 = vadd.f32 %v1114_v39, %v1098_v44  ;;  %v1141_v27 = vadd.f32 %v1133_v11, %v1120_v3  ;;  %v1142_v58 = vstv %s2721_s26  ;;  %s2683_s26 = sld [smem:[#allocation4 + $0xd]] }
 0x1e7   : > { %v1145_v21 = vmul.f32 %v1142_v58, %v3050_v13  ;;  %v1144_v55 = vmul.f32 %v1142_v58, %v3047_v12  ;;  %v1097_v15 = vadd.f32 %v1092_v36, %v1076_v33  ;;  %v1143_v47 = vmul.f32 %v1142_v58, %v3042_v9 }
 0x1e8   : > { %v3602_v61 = vpop.permute.xlu1 %1177  ;;  %v3604_v17 = vpop.permute.xlu0 %1179  ;;  %v859_v8 = vadd.f32 %v854_v22, %v838_v10  ;;  %v1140_v52 = vadd.f32 %v1135_v2, %v1119_v49  ;;  %v917_v2 = vsel %vm519_vm10, %v3285_v63, %v3287_v5 }
 0x1e9   : > { %v1148_v11 = vadd.f32 %v1145_v21, %v1141_v27  ;;  %v1118_v41 = vadd.f32 %v1113_v46, %v1097_v15  ;;  %v1183_v16 = vsel %vm479_vm8, %v3602_v61, %v3604_v17 }
 0x1ea   : > { %v880_v24 = vadd.f32 %v875_v29, %v859_v8  ;;  %v1147_v10 = vadd.f32 %v1144_v55, %v1140_v52  ;;  %v938_v52 = vsel %vm539_vm11, %v3295_v18, %v3301_v26  ;;  %v959_v18 = vsel %vm559_vm12, %v3309_v32, %v3311_v35 }
 0x1eb   : > { %v1169_v50 = vadd.f32 %v3589_v31, %v1148_v11  ;;  %v1139_v54 = vadd.f32 %v1134_v14, %v1118_v41  ;;  %v1162_v31 = vsel %vm459_vm7, %v3579_v28, %v3587_v25  ;;  %v1564_v35 = vmul.f32 %v3544_v45, %v3047_v12 }
 0x1ec   : > { %v1182_v34 = vpop.permute.xlu1 %1181  ;;  %v3614_v0 = vpop.permute.xlu0 %1198  ;;  %v901_v39 = vadd.f32 %v896_v38, %v880_v24  ;;  %v1168_v44 = vadd.f32 %v1163_v37, %v1147_v10 }
 0x1ed   : > { %v1184_v43 = vsel %vm479_vm8, %v3604_v17, %v1182_v34  ;;  %v1190_v42 = vadd.f32 %v1182_v34, %v1169_v50  ;;  %v1146_v8 = vadd.f32 %v1143_v47, %v1139_v54  ;;  %v2940_v50 = vmov 1.0|1.0  }
 0x1ee   : > { %v1189_v56 = vadd.f32 %v1184_v43, %v1168_v44  ;;  %v922_v49 = vadd.f32 %v917_v2, %v901_v39  ;;  %v1565_v43 = vmul.f32 %v3544_v45, %v3050_v13 }
 0x1ef   : > { %v1167_v28 = vadd.f32 %v1162_v31, %v1146_v8 }
 0x1f0   : > { %v1201_v30 = vpop.permute.xlu1 %1200  ;;  %v1203_v51 = vpop.permute.xlu0 %1202  ;;  %v943_v58 = vadd.f32 %v938_v52, %v922_v49 }
 0x1f1   : > { %v1205_v1 = vsel %vm499_vm9, %v1201_v30, %v1203_v51  ;;  %v1211_v22 = vadd.f32 %v1203_v51, %v1190_v42  ;;  %v1188_v36 = vadd.f32 %v1183_v16, %v1167_v28  ;;  %v1204_v21 = vsel %vm499_vm9, %v3614_v0, %v1201_v30 }
 0x1f2   : > { %v1210_v59 = vadd.f32 %v1205_v1, %v1189_v56  ;;  %v964_v0 = vadd.f32 %v959_v18, %v943_v58 }
 0x1f3   : > { %v1209_v15 = vadd.f32 %v1204_v21, %v1188_v36 }
 0x1f4   : > { %v1220_v20 = vpop.permute.xlu1 %1219  ;;  %v1222_v62 = vpop.permute.xlu0 %1221  ;;  %v990_v32 = vmul.f32 %v2846_v19, %v964_v0 }
 0x1f5   : > { %v1225_v26 = vsel %vm519_vm10, %v1220_v20, %v1222_v62 }
 0x1f6   : > { %v1230_v37 = vadd.f32 %v1225_v26, %v1209_v15 }
 0x1f8   : > { %v1224_v23 = vpop.permute.xlu1 %1223  ;;  %v1241_v48 = vpop.permute.xlu0 %1240 }
 0x1f9   : > { %v1226_v40 = vsel %vm519_vm10, %v1222_v62, %v1224_v23  ;;  %v1232_v63 = vadd.f32 %v1224_v23, %v1211_v22 }
 0x1fa   : > { %v1231_v25 = vadd.f32 %v1226_v40, %v1210_v59 }
 0x1fc   : > { %v1243_v57 = vpop.permute.xlu1 %1242  ;;  %v1245_v3 = vpop.permute.xlu0 %1244 }
 0x1fd   : > { %v1247_v5 = vsel %vm539_vm11, %v1243_v57, %v1245_v3  ;;  %v1253_v51 = vadd.f32 %v1245_v3, %v1232_v63  ;;  %v1246_v30 = vsel %vm539_vm11, %v1241_v48, %v1243_v57 }
 0x1fe   : > { %v1252_v29 = vadd.f32 %v1247_v5, %v1231_v25  ;;  %v1251_v41 = vadd.f32 %v1246_v30, %v1230_v37 }
 0x200   : > { %v1262_v34 = vpop.permute.xlu1 %1261  ;;  %v1264_v27 = vpop.permute.xlu0 %1263 }
 0x201   : > { %v1267_v38 = vsel %vm559_vm12, %v1262_v34, %v1264_v27 }
 0x202   : > { %v1272_v20 = vadd.f32 %v1267_v38, %v1251_v41 }
 0x204   : > { %v1266_v33 = vpop.permute.xlu1 %1265  ;;  %v2850_v55 = vpop.permute.xlu0 %2849 }
 0x205   : > { %v1268_v61 = vsel %vm559_vm12, %v1264_v27, %v1266_v33  ;;  %v1274_v17 = vadd.f32 %v1266_v33, %v1253_v51  ;;  %v2852_v24 = vunpack.i.h.bf16 %v2850_v55  ;;  %v2851_v46 = vunpack.i.l.bf16 %v2850_v55 }
 0x206   : > { %v1273_v11 = vadd.f32 %v1268_v61, %v1252_v29  ;;  %v1317_v51 = vstv %s2673_s29  ;;  %s2703_s29 = sld [smem:[#allocation4 + $0x21]] }
 0x207   : > { %v1300_v10 = vmul.f32 %v2852_v24, %v1274_v17  ;;  %v1294_v23 = vsel %vm1293_vm14, %v2851_v46, %v2852_v24  ;;  %v1298_v62 = vmul.f32 %v2851_v46, %v1272_v20  ;;  %v1318_v29 = vmul.f32 %v1317_v51, %v3119_v60 }
 0x208   : > { %v1299_v14 = vmul.f32 %v1294_v23, %v1273_v11  ;;  %v1334_v48 = vpop.permute.xlu1 %1333  ;;  %v1332_v39 = vpop.permute.xlu0 %1331  ;;  %v1320_v46 = vmul.f32 %v1317_v51, %v3127_v4  ;;  %v1319_v15 = vmul.f32 %v1317_v51, %v3131_v7  ;;  %vm2215_vm14 = vcmask 39936  }
 0x209   : > { %1308 = vrot.lane.b32.xlu1 %v1300_v10, %s2939_s27  ;;  %v1337_v36 = vsel %vm459_vm7, %v1332_v39, %v1334_v48 }
 0x20a   : > { %1306 = vrot.lane.b32.xlu0 %v1299_v14, %s2939_s27  ;;  %v1342_v55 = vadd.f32 %v1337_v36, %v1318_v29 }
 0x20c   : > { %v1353_v53 = vpop.permute.xlu1 %1352  ;;  %v1336_v19 = vpop.permute.xlu0 %1335 }
 0x20d   : > { %996 = vrot.lane.b32.xlu1 %v990_v32, %s2938_s24  ;;  %v1338_v18 = vsel %vm459_vm7, %v1334_v48, %v1336_v19  ;;  %v1344_v23 = vadd.f32 %v1336_v19, %v1320_v46  ;;  %s2682_s24 = sld [smem:[#allocation4 + $0xc]] }
 0x20e   : > { %1571 = vrot.lane.b32.xlu0 %v1564_v35, %s2936_s16  ;;  %v1343_v14 = vadd.f32 %v1338_v18, %v1319_v15 }
 0x210   : > { %v1357_v54 = vpop.permute.xlu1 %1356  ;;  %v1355_v44 = vpop.permute.xlu0 %1354 }
 0x211   : > { %1304 = vrot.lane.b32.xlu1 %v1298_v62, %s2939_s27  ;;  %v1358_v33 = vsel %vm479_vm8, %v1353_v53, %v1355_v44  ;;  %v1359_v0 = vsel %vm479_vm8, %v1355_v44, %v1357_v54  ;;  %v1365_v38 = vadd.f32 %v1357_v54, %v1344_v23  ;;  %s2696_s27 = sld [smem:[#allocation4 + $0x1a]] }
 0x212   : > { %2854 = vrot.lane.b32.xlu0 %v2940_v50, %s2941_s28  ;;  %v1363_v17 = vadd.f32 %v1358_v33, %v1342_v55  ;;  %v1364_v35 = vadd.f32 %v1359_v0, %v1343_v14  ;;  %v1450_v50 = vstv %s2722_s3  ;;  %s2690_s28 = sld [smem:[#allocation4 + $0x14]] }
 0x213   : > { %v1451_v54 = vmul.f32 %v1450_v50, %v3042_v9  ;;  %s2697_s3 = sld [smem:[#allocation4 + $0x1b]] }
 0x214   : > { %v1376_v57 = vpop.permute.xlu1 %1375  ;;  %v1374_v3 = vpop.permute.xlu0 %1373 }
 0x215   : > { %1573 = vrot.lane.b32.xlu1 %v1565_v43, %s2936_s16  ;;  %v1379_v61 = vsel %vm499_vm9, %v1374_v3, %v1376_v57 }
 0x216   : > { %v1384_v10 = vadd.f32 %v1379_v61, %v1363_v17 }
 0x218   : > { %v1395_v42 = vpop.permute.xlu1 %1394  ;;  %v1378_v1 = vpop.permute.xlu0 %1377 }
 0x219   : > { %v1380_v41 = vsel %vm499_vm9, %v1376_v57, %v1378_v1  ;;  %v1386_v48 = vadd.f32 %v1378_v1, %v1365_v38 }
 0x21a   : > { %v1385_v53 = vadd.f32 %v1380_v41, %v1364_v35 }
 0x21c   : > { %v1399_v2 = vpop.permute.xlu1 %1398  ;;  %v1397_v47 = vpop.permute.xlu0 %1396 }
 0x21d   : > { %v1400_v26 = vsel %vm519_vm10, %v1395_v42, %v1397_v47  ;;  %v1401_v39 = vsel %vm519_vm10, %v1397_v47, %v1399_v2  ;;  %v1407_v44 = vadd.f32 %v1399_v2, %v1386_v48  ;;  %v1453_v2 = vmul.f32 %v1450_v50, %v3050_v13 }
 0x21e   : > { %v1405_v37 = vadd.f32 %v1400_v26, %v1384_v10  ;;  %v1406_v42 = vadd.f32 %v1401_v39, %v1385_v53 }
 0x220   : > { %v1418_v56 = vpop.permute.xlu1 %1417  ;;  %v1416_v31 = vpop.permute.xlu0 %1415 }
 0x221   : > { %v1421_v30 = vsel %vm539_vm11, %v1416_v31, %v1418_v56 }
 0x222   : > { %v1426_v20 = vadd.f32 %v1421_v30, %v1405_v37 }
 0x224   : > { %v1437_v22 = vpop.permute.xlu1 %1436  ;;  %v1420_v40 = vpop.permute.xlu0 %1419 }
 0x225   : > { %v1422_v3 = vsel %vm539_vm11, %v1418_v56, %v1420_v40  ;;  %v1428_v31 = vadd.f32 %v1420_v40, %v1407_v44  ;;  %v1452_v40 = vmul.f32 %v1450_v50, %v3047_v12 }
 0x228   : > { %v1441_v49 = vpop.permute.xlu1 %1440  ;;  %v1439_v8 = vpop.permute.xlu0 %1438 }
 0x229   : > { %v1442_v32 = vsel %vm559_vm12, %v1437_v22, %v1439_v8  ;;  %v1443_v57 = vsel %vm559_vm12, %v1439_v8, %v1441_v49  ;;  %v1427_v22 = vadd.f32 %v1422_v3, %v1406_v42  ;;  %v1449_v1 = vadd.f32 %v1441_v49, %v1428_v31 }
 0x22a   : > { %v1447_v19 = vadd.f32 %v1442_v32, %v1426_v20 }
 0x22b   : > { %v1448_v33 = vadd.f32 %v1443_v57, %v1427_v22  ;;  %v1456_v61 = vadd.f32 %v1453_v2, %v1449_v1  ;;  %v1651_v57 = vstv %s2688_s7  ;;  %s2704_s7 = sld [smem:[#allocation4 + $0x22]] }
 0x22c   : > { %v3695_v59 = vpop.permute.xlu1 %1466  ;;  %v1465_v45 = vpop.permute.xlu0 %1464  ;;  %v1454_v51 = vadd.f32 %v1451_v54, %v1447_v19  ;;  %v1630_v54 = vstv %s2681_s5  ;;  %v1652_v22 = vmul.f32 %v1651_v57, %v3119_v60  ;;  %v1654_v1 = vmul.f32 %v1651_v57, %v3127_v4  ;;  %s2710_s5 = sld [smem:[#allocation4 + $0x28]] }
 0x22d   : > { %v1470_v47 = vsel %vm459_vm7, %v1465_v45, %v3695_v59  ;;  %v1455_v46 = vadd.f32 %v1452_v40, %v1448_v33  ;;  %v1632_v31 = vmul.f32 %v1630_v54, %v3131_v7  ;;  %v1672_v33 = vstv %s2695_s15  ;;  %s2711_s15 = sld [smem:[#allocation4 + $0x29]] }
 0x22e   : > { %v1475_v55 = vadd.f32 %v1470_v47, %v1454_v51  ;;  %v1633_v51 = vmul.f32 %v1630_v54, %v3127_v4  ;;  %v1653_v47 = vmul.f32 %v1651_v57, %v3131_v7  ;;  %v1674_v2 = vmul.f32 %v1672_v33, %v3131_v7 }
 0x22f   : > { %v2267_v57 = vstv %s2690_s28  ;;  %s2759_s28 = sld [smem:[#allocation4 + $0x59]] }
 0x230   : > { %v1486_v34 = vpop.permute.xlu1 %1485  ;;  %v3697_v27 = vpop.permute.xlu0 %1468 }
 0x231   : > { %v1471_v49 = vsel %vm459_vm7, %v3695_v59, %v3697_v27  ;;  %v1477_v26 = vadd.f32 %v3697_v27, %v1456_v61  ;;  %v1675_v61 = vmul.f32 %v1672_v33, %v3127_v4 }
 0x232   : > { %v1476_v10 = vadd.f32 %v1471_v49, %v1455_v46  ;;  %v1714_v46 = vstv %s2709_s18  ;;  %s2731_s18 = sld [smem:[#allocation4 + $0x3d]] }
 0x234   : > { %v3699_v16 = vpop.permute.xlu1 %1489  ;;  %v3701_v63 = vpop.permute.xlu0 %1487 }
 0x235   : > { %v1491_v56 = vsel %vm479_vm8, %v1486_v34, %v3701_v63  ;;  %v1492_v34 = vsel %vm479_vm8, %v3701_v63, %v3699_v16 }
 0x236   : > { %v1496_v18 = vadd.f32 %v1491_v56, %v1475_v55  ;;  %v1497_v14 = vadd.f32 %v1492_v34, %v1476_v10  ;;  %v1673_v56 = vmul.f32 %v1672_v33, %v3119_v60  ;;  %v1693_v55 = vstv %s2702_s17  ;;  %s2718_s17 = sld [smem:[#allocation4 + $0x30]] }
 0x237   : > { %v1694_v40 = vmul.f32 %v1693_v55, %v3119_v60  ;;  %v1696_v49 = vmul.f32 %v1693_v55, %v3127_v4  ;;  %v1735_v34 = vstv %s2716_s19  ;;  %v1717_v10 = vmul.f32 %v1714_v46, %v3127_v4  ;;  %s2738_s19 = sld [smem:[#allocation4 + $0x44]] }
 0x238   : > { %v3703_v5 = vpop.permute.xlu1 %1508  ;;  %v1507_v52 = vpop.permute.xlu0 %1506  ;;  %v2001_v33 = vstv %s2703_s29  ;;  %s2676_s29 = sld [smem:[#allocation4 + $0x6]] }
 0x239   : > { %v1512_v45 = vsel %vm499_vm9, %v1507_v52, %v3703_v5  ;;  %v1498_v52 = vadd.f32 %v3699_v16, %v1477_v26  ;;  %v1715_v26 = vmul.f32 %v1714_v46, %v3119_v60 }
 0x23a   : > { %v1517_v23 = vadd.f32 %v1512_v45, %v1496_v18  ;;  %v1695_v45 = vmul.f32 %v1693_v55, %v3131_v7  ;;  %v1716_v18 = vmul.f32 %v1714_v46, %v3131_v7  ;;  %v2288_v55 = vstv %s2697_s3  ;;  %s2753_s3 = sld [smem:[#allocation4 + $0x53]] }
 0x23b   : > { %v2022_v46 = vstv %s2710_s5  ;;  %s2760_s5 = sld [smem:[#allocation4 + $0x5a]] }
 0x23c   : > { %v3705_v28 = vpop.permute.xlu1 %1527  ;;  %v3707_v25 = vpop.permute.xlu0 %1510 }
 0x23d   : > { %v1513_v0 = vsel %vm499_vm9, %v3703_v5, %v3707_v25  ;;  %v1519_v37 = vadd.f32 %v3707_v25, %v1498_v52  ;;  %v1737_v52 = vmul.f32 %v1735_v34, %v3131_v7 }
 0x23e   : > { %v1518_v41 = vadd.f32 %v1513_v0, %v1497_v14  ;;  %v1763_v0 = vstv %s2730_s20  ;;  %v1784_v14 = vstv %s2737_s21  ;;  %s2732_s20 = sld [smem:[#allocation4 + $0x3e]] }
 0x23f   : > { %s2674_s21 = sld [smem:[#allocation4 + $0x4]] }
 0x240   : > { %v3709_v58 = vpop.permute.xlu1 %1531  ;;  %v3712_v21 = vpop.permute.xlu0 %1529 }
 0x241   : > { %v1533_v15 = vsel %vm519_vm10, %v3705_v28, %v3712_v21  ;;  %v1534_v28 = vsel %vm519_vm10, %v3712_v21, %v3709_v58  ;;  %v1540_v5 = vadd.f32 %v3709_v58, %v1519_v37  ;;  %v1766_v37 = vmul.f32 %v1763_v0, %v3050_v13 }
 0x242   : > { %v1538_v63 = vadd.f32 %v1533_v15, %v1517_v23  ;;  %v1539_v20 = vadd.f32 %v1534_v28, %v1518_v41  ;;  %v1736_v15 = vmul.f32 %v1735_v34, %v3119_v60  ;;  %v1738_v23 = vmul.f32 %v1735_v34, %v3127_v4 }
 0x243   : > { %v1787_v28 = vmul.f32 %v1784_v14, %v3050_v13  ;;  %v1805_v41 = vstv %s2744_s22  ;;  %v2309_v34 = vstv %s2704_s7  ;;  %s2745_s22 = sld [smem:[#allocation4 + $0x4b]]  ;;  %s2943_s7 = smov 4  }
 0x244   : > { %v3717_v24 = vpop.permute.xlu1 %1550  ;;  %v1549_v11 = vpop.permute.xlu0 %1548 }
 0x245   : > { %v1554_v27 = vsel %vm539_vm11, %v1549_v11, %v3717_v24 }
 0x246   : > { %v1559_v16 = vadd.f32 %v1554_v27, %v1538_v63  ;;  %v1765_v27 = vmul.f32 %v1763_v0, %v3047_v12  ;;  %v1785_v63 = vmul.f32 %v1784_v14, %v3042_v9 }
 0x248   : > { %v1570_v62 = vpop.permute.xlu1 %1569  ;;  %v1553_v43 = vpop.permute.xlu0 %1552 }
 0x249   : > { %v1555_v11 = vsel %vm539_vm11, %v3717_v24, %v1553_v43  ;;  %v1561_v50 = vadd.f32 %v1553_v43, %v1540_v5  ;;  %v1631_v43 = vmul.f32 %v1630_v54, %v3119_v60  ;;  %v1806_v5 = vmul.f32 %v1805_v41, %v3042_v9 }
 0x24a   : > { %v1560_v21 = vadd.f32 %v1555_v11, %v1539_v20  ;;  %v3826_v11 = vstv %s2751_s23  ;;  %v1808_v20 = vmul.f32 %v1805_v41, %v3050_v13  ;;  %v1980_v54 = vstv %s2696_s27  ;;  %s3939_s23 = sld [smem:[#allocation4 + $0x35]] }
 0x24b   : > { %s2675_s27 = sld [smem:[#allocation4 + $0x5]] }
 0x24c   : > { %v3731_v36 = vpop.permute.xlu1 %1000  ;;  %v3735_v29 = vpop.permute.xlu0 %998 }
 0x27b   : > { %v3741_v8 = vpop.permute.xlu1 %1308 }
 0x27c   : > { %v3748_v17 = vpop.permute.xlu0 %1306 }
 0x27f   : > { %v3757_v59 = vpop.permute.xlu1 %996 }
 0x280   : > { %v1572_v30 = vpop.permute.xlu0 %1571 }
 0x281   : > { %v1575_v38 = vsel %vm559_vm12, %v1570_v62, %v1572_v30 }
 0x282   : > { %v1580_v25 = vadd.f32 %v1575_v38, %v1559_v16  ;;  %v1786_v38 = vmul.f32 %v1784_v14, %v3047_v12  ;;  %v1807_v16 = vmul.f32 %v1805_v41, %v3047_v12 }
 0x283   : > { %v3770_v32 = vpop.permute.xlu1 %1304 }
 0x284   : > { %v2855_v35 = vpop.permute.xlu0 %2854 }
 0x285   : > { %v2857_v48 = vunpack.i.h.bf16 %v2855_v35  ;;  %v2856_v39 = vunpack.i.l.bf16 %v2855_v35  ;;  %v1827_v35 = vmul.f32 %v3826_v11, %v3042_v9 }
 0x287   : > { %v1604_v53 = vmul.f32 %v2856_v39, %v1580_v25  ;;  %v1574_v62 = vpop.permute.xlu1 %1573  ;;  %v1600_v3 = vsel %vm1599_vm15, %v2856_v39, %v2857_v48  ;;  %v1938_v25 = vstv %s2682_s24  ;;  %v1828_v39 = vmul.f32 %v3826_v11, %v3047_v12  ;;  %s3943_s24 = sld [smem:[#allocation4 + $0x45]] }
 0x288   : > { %v1576_v19 = vsel %vm559_vm12, %v1572_v30, %v1574_v62  ;;  %v1582_v44 = vadd.f32 %v1574_v62, %v1561_v50  ;;  %v1764_v30 = vmul.f32 %v1763_v0, %v3042_v9  ;;  %v1941_v50 = vmul.f32 %v1938_v25, %v3127_v4 }
 0x289   : > { %v1581_v58 = vadd.f32 %v1576_v19, %v1560_v21  ;;  %1610 = vrot.lane.b32.xlu1 %v1604_v53, %s2942_s12  ;;  %v1940_v21 = vmul.f32 %v1938_v25, %v3131_v7  ;;  %v1959_v53 = vstv %s2689_s25  ;;  %v2311_v0 = vmul.f32 %v2309_v34, %v3131_v7  ;;  %s2752_s25 = sld [smem:[#allocation4 + $0x52]] }
 0x28a   : > { %v1606_v24 = vmul.f32 %v2857_v48, %v1582_v44  ;;  %v1939_v48 = vmul.f32 %v1938_v25, %v3119_v60  ;;  %v1961_v62 = vmul.f32 %v1959_v53, %v3131_v7  ;;  %v1960_v19 = vmul.f32 %v1959_v53, %v3119_v60 }
 0x28b   : > { %v1605_v42 = vmul.f32 %v1600_v3, %v1581_v58  ;;  %v2246_v44 = vstv %s2683_s26  ;;  %v1962_v58 = vmul.f32 %v1959_v53, %v3127_v4  ;;  %s2746_s26 = sld [smem:[#allocation4 + $0x4c]]  ;;  %vm2523_vm15 = vcmask 48128  }
 0x28c   : > { %v2247_v3 = vmul.f32 %v2246_v44, %v3119_v60 }
 0x28d   : > { %1614 = vrot.lane.b32.xlu1 %v1606_v24, %s2942_s12  ;;  %1612 = vrot.lane.b32.xlu0 %v1605_v42, %s2942_s12  ;;  %v2249_v24 = vmul.f32 %v2246_v44, %v3127_v4  ;;  %v2248_v42 = vmul.f32 %v2246_v44, %v3131_v7  ;;  %s2717_s12 = sld [smem:[#allocation4 + $0x2f]] }
 0x291   : > { %1639 = vrot.lane.b32.xlu1 %v1632_v31, %s2931_s30  ;;  %1637 = vrot.lane.b32.xlu0 %v1631_v43, %s2931_s30  ;;  %v1982_v31 = vmul.f32 %v1980_v54, %v3131_v7  ;;  %v1981_v43 = vmul.f32 %v1980_v54, %v3119_v60 }
 0x295   : > { %1658 = vrot.lane.b32.xlu1 %v1652_v22, %s2932_s4  ;;  %1641 = vrot.lane.b32.xlu0 %v1633_v51, %s2931_s30  ;;  %v2268_v22 = vmul.f32 %v2267_v57, %v3119_v60  ;;  %v1983_v51 = vmul.f32 %v1980_v54, %v3127_v4 }
 0x299   : > { %1662 = vrot.lane.b32.xlu1 %v1654_v1, %s2932_s4  ;;  %1660 = vrot.lane.b32.xlu0 %v1653_v47, %s2932_s4  ;;  %v2270_v1 = vmul.f32 %v2267_v57, %v3127_v4  ;;  %v2269_v47 = vmul.f32 %v2267_v57, %v3131_v7  ;;  %v2092_v57 = vstv %s2738_s19  ;;  %s2948_s19 = smov 122  }
 0x29d   : > { %1681 = vrot.lane.b32.xlu1 %v1674_v2, %s2933_s6  ;;  %1679 = vrot.lane.b32.xlu0 %v1673_v56, %s2933_s6  ;;  %v2003_v2 = vmul.f32 %v2001_v33, %v3131_v7  ;;  %v2002_v56 = vmul.f32 %v2001_v33, %v3119_v60 }
 0x2a1   : > { %1700 = vrot.lane.b32.xlu1 %v1694_v40, %s2934_s8  ;;  %1683 = vrot.lane.b32.xlu0 %v1675_v61, %s2933_s6  ;;  %v2289_v40 = vmul.f32 %v2288_v55, %v3119_v60  ;;  %v2004_v61 = vmul.f32 %v2001_v33, %v3127_v4  ;;  %v2379_v33 = vstv %s2732_s20  ;;  %s277_s20 = sld [smem:[#allocation4]] }
 0x2a5   : > { %1704 = vrot.lane.b32.xlu1 %v1696_v49, %s2934_s8  ;;  %1702 = vrot.lane.b32.xlu0 %v1695_v45, %s2934_s8  ;;  %v2291_v49 = vmul.f32 %v2288_v55, %v3127_v4  ;;  %v2290_v45 = vmul.f32 %v2288_v55, %v3131_v7 }
 0x2a9   : > { %1723 = vrot.lane.b32.xlu1 %v1716_v18, %s2935_s14  ;;  %1721 = vrot.lane.b32.xlu0 %v1715_v26, %s2935_s14  ;;  %v2024_v18 = vmul.f32 %v2022_v46, %v3131_v7  ;;  %v2023_v26 = vmul.f32 %v2022_v46, %v3119_v60 }
 0x2ad   : > { %1742 = vrot.lane.b32.xlu1 %v1736_v15, %s2936_s16  ;;  %1725 = vrot.lane.b32.xlu0 %v1717_v10, %s2935_s14  ;;  %v2310_v15 = vmul.f32 %v2309_v34, %v3119_v60  ;;  %v2025_v10 = vmul.f32 %v2022_v46, %v3127_v4 }
 0x2b1   : > { %1746 = vrot.lane.b32.xlu1 %v1738_v23, %s2936_s16  ;;  %1744 = vrot.lane.b32.xlu0 %v1737_v52, %s2936_s16  ;;  %v2312_v52 = vmul.f32 %v2309_v34, %v3127_v4 }
 0x2b5   : > { %1772 = vrot.lane.b32.xlu1 %v1765_v27, %s2931_s30  ;;  %1770 = vrot.lane.b32.xlu0 %v1764_v30, %s2931_s30  ;;  %v2043_v27 = vstv %s2717_s12  ;;  %s2767_s12 = sld [smem:[#allocation4 + $0x61]] }
 0x2b9   : > { %1791 = vrot.lane.b32.xlu1 %v1785_v63, %s2932_s4  ;;  %1774 = vrot.lane.b32.xlu0 %v1766_v37, %s2931_s30  ;;  %v2045_v63 = vmul.f32 %v2043_v27, %v3131_v7  ;;  %v2044_v37 = vmul.f32 %v2043_v27, %v3119_v60 }
 0x2bd   : > { %1795 = vrot.lane.b32.xlu1 %v1787_v28, %s2932_s4  ;;  %1793 = vrot.lane.b32.xlu0 %v1786_v38, %s2932_s4  ;;  %v2330_v28 = vstv %s2711_s15  ;;  %s2725_s15 = sld [smem:[#allocation4 + $0x37]] }
 0x2be   : > { %v2333_v25 = vmul.f32 %v2330_v28, %v3127_v4 }
 0x2c1   : > { %1814 = vrot.lane.b32.xlu1 %v1807_v16, %s2933_s6  ;;  %1812 = vrot.lane.b32.xlu0 %v1806_v5, %s2933_s6  ;;  %v2331_v16 = vmul.f32 %v2330_v28, %v3119_v60  ;;  %v2046_v5 = vmul.f32 %v2043_v27, %v3127_v4 }
 0x2c5   : > { %1833 = vrot.lane.b32.xlu1 %v1827_v35, %s2934_s8  ;;  %1816 = vrot.lane.b32.xlu0 %v1808_v20, %s2933_s6 }
 0x2c9   : > { %1945 = vrot.lane.b32.xlu1 %v1939_v48, %s2931_s30  ;;  %1835 = vrot.lane.b32.xlu0 %v1828_v39, %s2934_s8  ;;  %v2332_v48 = vmul.f32 %v2330_v28, %v3131_v7  ;;  %v2351_v39 = vstv %s2718_s17  ;;  %v2381_v28 = vmul.f32 %v2379_v33, %v3047_v12  ;;  %s2946_s17 = smov 124  }
 0x2ca   : > { %v2353_v53 = vmul.f32 %v2351_v39, %v3131_v7 }
 0x2cd   : > { %1949 = vrot.lane.b32.xlu1 %v1941_v50, %s2931_s30  ;;  %1947 = vrot.lane.b32.xlu0 %v1940_v21, %s2931_s30 }
 0x2d1   : > { %1968 = vrot.lane.b32.xlu1 %v1961_v62, %s2932_s4  ;;  %1966 = vrot.lane.b32.xlu0 %v1960_v19, %s2932_s4  ;;  %v2352_v62 = vmul.f32 %v2351_v39, %v3119_v60  ;;  %v2071_v19 = vstv %s2731_s18  ;;  %s2947_s18 = smov 123  }
 0x2d5   : > { %2253 = vrot.lane.b32.xlu1 %v2247_v3, %s2931_s30  ;;  %1970 = vrot.lane.b32.xlu0 %v1962_v58, %s2932_s4  ;;  %v2072_v58 = vmul.f32 %v2071_v19, %v3042_v9 }
 0x2d9   : > { %2257 = vrot.lane.b32.xlu1 %v2249_v24, %s2931_s30  ;;  %2255 = vrot.lane.b32.xlu0 %v2248_v42, %s2931_s30  ;;  %v2354_v24 = vmul.f32 %v2351_v39, %v3127_v4 }
 0x2dd   : > { %1989 = vrot.lane.b32.xlu1 %v1982_v31, %s2933_s6  ;;  %1987 = vrot.lane.b32.xlu0 %v1981_v43, %s2933_s6  ;;  %v2074_v31 = vmul.f32 %v2071_v19, %v3050_v13  ;;  %v2073_v43 = vmul.f32 %v2071_v19, %v3047_v12 }
 0x2e1   : > { %2274 = vrot.lane.b32.xlu1 %v2268_v22, %s2932_s4  ;;  %1991 = vrot.lane.b32.xlu0 %v1983_v51, %s2933_s6 }
 0x2e5   : > { %2278 = vrot.lane.b32.xlu1 %v2270_v1, %s2932_s4  ;;  %2276 = vrot.lane.b32.xlu0 %v2269_v47, %s2932_s4  ;;  %v2094_v1 = vmul.f32 %v2092_v57, %v3047_v12  ;;  %v2093_v47 = vmul.f32 %v2092_v57, %v3042_v9 }
 0x2e9   : > { %2010 = vrot.lane.b32.xlu1 %v2003_v2, %s2934_s8  ;;  %2008 = vrot.lane.b32.xlu0 %v2002_v56, %s2934_s8  ;;  %v1623_v2 = vstv %s2674_s21  ;;  %s2719_s21 = sld [smem:[#allocation4 + $0x31]] }
 0x2ed   : > { %2295 = vrot.lane.b32.xlu1 %v2289_v40, %s2933_s6  ;;  %2012 = vrot.lane.b32.xlu0 %v2004_v61, %s2934_s8  ;;  %v2380_v40 = vmul.f32 %v2379_v33, %v3042_v9  ;;  %v2095_v61 = vmul.f32 %v2092_v57, %v3050_v13 }
 0x2f1   : > { %2299 = vrot.lane.b32.xlu1 %v2291_v49, %s2933_s6  ;;  %2297 = vrot.lane.b32.xlu0 %v2290_v45, %s2933_s6  ;;  %v1626_v45 = vmul.f32 %v1623_v2, %v3127_v4 }
 0x2f5   : > { %2031 = vrot.lane.b32.xlu1 %v2024_v18, %s2935_s14  ;;  %2029 = vrot.lane.b32.xlu0 %v2023_v26, %s2935_s14  ;;  %v1624_v18 = vmul.f32 %v1623_v2, %v3119_v60  ;;  %v1625_v26 = vmul.f32 %v1623_v2, %v3131_v7 }
 0x2f9   : > { %2316 = vrot.lane.b32.xlu1 %v2310_v15, %s2934_s8  ;;  %2033 = vrot.lane.b32.xlu0 %v2025_v10, %s2935_s14 }
 0x2fb   : > { %v3888_v23 = vpop.permute.xlu1 %1610 }
 0x2fd   : > { %2320 = vrot.lane.b32.xlu1 %v2312_v52, %s2934_s8  ;;  %2318 = vrot.lane.b32.xlu0 %v2311_v0, %s2934_s8 }
 0x2ff   : > { %v3894_v30 = vpop.permute.xlu1 %1614  ;;  %v3896_v14 = vpop.permute.xlu0 %1612 }
 0x300   : > { %4352 = vst [vmem:[#allocation46_spill] sm:$0xff] %v3894_v30 }
 0x301   : > { %2052 = vrot.lane.b32.xlu1 %v2045_v63, %s2936_s16  ;;  %2050 = vrot.lane.b32.xlu0 %v2044_v37, %s2936_s16  ;;  %v2382_v37 = vmul.f32 %v2379_v33, %v3050_v13 }
 0x303   : > { %v1640_v38 = vpop.permute.xlu1 %1639  ;;  %v1638_v41 = vpop.permute.xlu0 %1637 }
 0x304   : > { %v1643_v49 = vsel %vm459_vm7, %v1638_v41, %v1640_v38 }
 0x305   : > { %2337 = vrot.lane.b32.xlu1 %v2331_v16, %s2935_s14  ;;  %2054 = vrot.lane.b32.xlu0 %v2046_v5, %s2936_s16  ;;  %v1648_v52 = vadd.f32 %v1643_v49, %v1624_v18  ;;  %v2113_v5 = vstv %s2745_s22  ;;  %s2670_s22 = sshll.u32 %s4399_s9, 1 }
 0x306   : > { %v2114_v19 = vmul.f32 %v2113_v5, %v3042_v9  ;;  %v2115_v33 = vmul.f32 %v2113_v5, %v3047_v12 }
 0x307   : > { %v1659_v35 = vpop.permute.xlu1 %1658  ;;  %v1642_v20 = vpop.permute.xlu0 %1641 }
 0x308   : > { %v1644_v46 = vsel %vm459_vm7, %v1640_v38, %v1642_v20  ;;  %v1650_v34 = vadd.f32 %v1642_v20, %v1626_v45 }
 0x309   : > { %2341 = vrot.lane.b32.xlu1 %v2333_v25, %s2935_s14  ;;  %2339 = vrot.lane.b32.xlu0 %v2332_v48, %s2935_s14  ;;  %v1649_v0 = vadd.f32 %v1644_v46, %v1625_v26 }
 0x30b   : > { %v1663_v50 = vpop.permute.xlu1 %1662  ;;  %v1661_v21 = vpop.permute.xlu0 %1660 }
 0x30c   : > { %v1664_v15 = vsel %vm479_vm8, %v1659_v35, %v1661_v21  ;;  %v1665_v10 = vsel %vm479_vm8, %v1661_v21, %v1663_v50  ;;  %v1671_v38 = vadd.f32 %v1663_v50, %v1650_v34 }
 0x30d   : > { %2360 = vrot.lane.b32.xlu1 %v2353_v53, %s2936_s16  ;;  %2358 = vrot.lane.b32.xlu0 %v2352_v62, %s2936_s16  ;;  %v1669_v35 = vadd.f32 %v1664_v15, %v1648_v52  ;;  %v1670_v20 = vadd.f32 %v1665_v10, %v1649_v0 }
 0x30f   : > { %v1682_v44 = vpop.permute.xlu1 %1681  ;;  %v1680_v3 = vpop.permute.xlu0 %1679 }
 0x310   : > { %v1685_v41 = vsel %vm499_vm9, %v1680_v3, %v1682_v44 }
 0x311   : > { %2078 = vrot.lane.b32.xlu1 %v2072_v58, %s2931_s30  ;;  %2362 = vrot.lane.b32.xlu0 %v2354_v24, %s2936_s16  ;;  %v1690_v21 = vadd.f32 %v1685_v41, %v1669_v35 }
 0x313   : > { %v1701_v42 = vpop.permute.xlu1 %1700  ;;  %v1684_v54 = vpop.permute.xlu0 %1683 }
 0x314   : > { %v1686_v16 = vsel %vm499_vm9, %v1682_v44, %v1684_v54  ;;  %v1692_v25 = vadd.f32 %v1684_v54, %v1671_v38  ;;  %v1829_v44 = vmul.f32 %v3826_v11, %v3050_v13 }
 0x315   : > { %2082 = vrot.lane.b32.xlu1 %v2074_v31, %s2931_s30  ;;  %2080 = vrot.lane.b32.xlu0 %v2073_v43, %s2931_s30  ;;  %v1691_v50 = vadd.f32 %v1686_v16, %v1670_v20 }
 0x317   : > { %v1705_v22 = vpop.permute.xlu1 %1704  ;;  %v1703_v51 = vpop.permute.xlu0 %1702 }
 0x318   : > { %v1706_v48 = vsel %vm519_vm10, %v1701_v42, %v1703_v51  ;;  %v1707_v39 = vsel %vm519_vm10, %v1703_v51, %v1705_v22  ;;  %v1713_v3 = vadd.f32 %v1705_v22, %v1692_v25 }
 0x319   : > { %2101 = vrot.lane.b32.xlu1 %v2094_v1, %s2932_s4  ;;  %2099 = vrot.lane.b32.xlu0 %v2093_v47, %s2932_s4  ;;  %v1711_v42 = vadd.f32 %v1706_v48, %v1690_v21  ;;  %v1712_v54 = vadd.f32 %v1707_v39, %v1691_v50  ;;  %v2116_v47 = vmul.f32 %v2113_v5, %v3050_v13 }
 0x31b   : > { %v1724_v56 = vpop.permute.xlu1 %1723  ;;  %v1722_v55 = vpop.permute.xlu0 %1721 }
 0x31c   : > { %v1727_v58 = vsel %vm539_vm11, %v1722_v55, %v1724_v56  ;;  %v2400_v55 = vstv %s3943_s24 }
 0x31d   : > { %2386 = vrot.lane.b32.xlu1 %v2380_v40, %s2931_s30  ;;  %2103 = vrot.lane.b32.xlu0 %v2095_v61, %s2932_s4  ;;  %v1732_v11 = vadd.f32 %v1727_v58, %v1711_v42  ;;  %v2402_v34 = vmul.f32 %v2400_v55, %v3047_v12  ;;  %v2401_v15 = vmul.f32 %v2400_v55, %v3042_v9  ;;  %v2134_v58 = vstv %s2752_s25 }
 0x31e   : > { %v2403_v35 = vmul.f32 %v2400_v55, %v3050_v13  ;;  %v1931_v55 = vstv %s2675_s27 }
 0x31f   : > { %v1743_v27 = vpop.permute.xlu1 %1742  ;;  %v1726_v63 = vpop.permute.xlu0 %1725 }
 0x320   : > { %v1728_v24 = vsel %vm539_vm11, %v1724_v56, %v1726_v63  ;;  %v1734_v31 = vadd.f32 %v1726_v63, %v1713_v3  ;;  %v1756_v56 = vstv %s3939_s23 }
 0x321   : > { %2390 = vrot.lane.b32.xlu1 %v2382_v37, %s2931_s30  ;;  %2388 = vrot.lane.b32.xlu0 %v2381_v28, %s2931_s30  ;;  %s2758_s30 = sld [smem:[#allocation4 + $0x58]]  ;;  %v1733_v22 = vadd.f32 %v1728_v24, %v1712_v54  ;;  %v1759_v49 = vmul.f32 %v1756_v56, %v3050_v13  ;;  %v1757_v45 = vmul.f32 %v1756_v56, %v3042_v9 }
 0x322   : > { %v1758_v18 = vmul.f32 %v1756_v56, %v3047_v12 }
 0x323   : > { %v1747_v53 = vpop.permute.xlu1 %1746  ;;  %v1745_v62 = vpop.permute.xlu0 %1744 }
 0x324   : > { %v1748_v43 = vsel %vm559_vm12, %v1743_v27, %v1745_v62  ;;  %v1749_v57 = vsel %vm559_vm12, %v1745_v62, %v1747_v53  ;;  %v1755_v2 = vadd.f32 %v1747_v53, %v1734_v31  ;;  %v2136_v31 = vmul.f32 %v2134_v58, %v3047_v12 }
 0x325   : > { %2120 = vrot.lane.b32.xlu1 %v2114_v19, %s2933_s6  ;;  %1837 = vrot.lane.b32.xlu0 %v1829_v44, %s2934_s8  ;;  %v1753_v40 = vadd.f32 %v1748_v43, %v1732_v11  ;;  %v1754_v61 = vadd.f32 %v1749_v57, %v1733_v22  ;;  %v2135_v43 = vmul.f32 %v2134_v58, %v3042_v9  ;;  %v2421_v22 = vstv %s2746_s26 }
 0x326   : > { %v1762_v10 = vadd.f32 %v1759_v49, %v1755_v2  ;;  %v2137_v2 = vmul.f32 %v2134_v58, %v3050_v13 }
 0x327   : > { %v1773_v51 = vpop.permute.xlu1 %1772  ;;  %v1771_v1 = vpop.permute.xlu0 %1770  ;;  %v1847_v0 = vstv %s2758_s30  ;;  %v1760_v27 = vadd.f32 %v1757_v45, %v1753_v40  ;;  %v1761_v63 = vadd.f32 %v1758_v18, %v1754_v61  ;;  %v1934_v61 = vmul.f32 %v1931_v55, %v3127_v4  ;;  %s181_s30 = scalar_lea.vmem %s4287_s2, %s2670_s22 }
 0x328   : > { %v1776_v37 = vsel %vm459_vm7, %v1771_v1, %v1773_v51  ;;  %v1848_v5 = vmul.f32 %v1847_v0, %v3042_v9  ;;  %v1850_v19 = vmul.f32 %v1847_v0, %v3050_v13  ;;  %v1849_v44 = vmul.f32 %v1847_v0, %v3047_v12 }
 0x329   : > { %2124 = vrot.lane.b32.xlu1 %v2116_v47, %s2933_s6  ;;  %2122 = vrot.lane.b32.xlu0 %v2115_v33, %s2933_s6  ;;  %v1781_v39 = vadd.f32 %v1776_v37, %v1760_v27  ;;  %v2422_v33 = vmul.f32 %v2421_v22, %v3042_v9  ;;  %v1933_v45 = vmul.f32 %v1931_v55, %v3131_v7 }
 0x32a   : > { %v2424_v18 = vmul.f32 %v2421_v22, %v3050_v13  ;;  %v1932_v0 = vmul.f32 %v1931_v55, %v3119_v60 }
 0x32b   : > { %v1792_v46 = vpop.permute.xlu1 %1791  ;;  %v1775_v26 = vpop.permute.xlu0 %1774 }
 0x32c   : > { %v1777_v52 = vsel %vm459_vm7, %v1773_v51, %v1775_v26  ;;  %v1783_v28 = vadd.f32 %v1775_v26, %v1762_v10  ;;  %v2423_v26 = vmul.f32 %v2421_v22, %v3047_v12 }
 0x32d   : > { %2409 = vrot.lane.b32.xlu1 %v2402_v34, %s2932_s4  ;;  %2407 = vrot.lane.b32.xlu0 %v2401_v15, %s2932_s4  ;;  %v1782_v38 = vadd.f32 %v1777_v52, %v1761_v63 }
 0x32f   : > { %v1796_v41 = vpop.permute.xlu1 %1795  ;;  %v1794_v16 = vpop.permute.xlu0 %1793 }
 0x330   : > { %v1804_v20 = vadd.f32 %v1796_v41, %v1783_v28  ;;  %v1797_v25 = vsel %vm479_vm8, %v1792_v46, %v1794_v16  ;;  %v1798_v48 = vsel %vm479_vm8, %v1794_v16, %v1796_v41 }
 0x331   : > { %v1803_v21 = vadd.f32 %v1798_v48, %v1782_v38  ;;  %1854 = vrot.lane.b32.xlu1 %v1848_v5, %s2935_s14  ;;  %2411 = vrot.lane.b32.xlu0 %v2403_v35, %s2932_s4  ;;  %v1802_v50 = vadd.f32 %v1797_v25, %v1781_v39  ;;  %s2765_s4 = sld [smem:[#allocation4 + $0x5f]]  ;;  %v2155_v5 = vstv %s2759_s28 }
 0x332   : > { %v2156_v39 = vmul.f32 %v2155_v5, %v3042_v9 }
 0x333   : > { %v1815_v53 = vpop.permute.xlu1 %1814  ;;  %v1813_v62 = vpop.permute.xlu0 %1812 }
 0x334   : > { %v1818_v3 = vsel %vm499_vm9, %v1813_v62, %v1815_v53 }
 0x335   : > { %v1823_v24 = vadd.f32 %v1818_v3, %v1802_v50  ;;  %1858 = vrot.lane.b32.xlu1 %v1850_v19, %s2935_s14  ;;  %1856 = vrot.lane.b32.xlu0 %v1849_v44, %s2935_s14  ;;  %v1889_v50 = vadd.s32 1, %v3023_v6 }
 0x337   : > { %v1834_v42 = vpop.permute.xlu1 %1833  ;;  %v1817_v54 = vpop.permute.xlu0 %1816  ;;  %v1868_v52 = vstv %s2765_s4  ;;  %vm1893_vm1 = vcmp.lt.s32.totalorder %v1889_v50, 16  ;;  %v2463_v50 = vstv %s2760_s5 }
 0x338   : > { %v1819_v57 = vsel %vm499_vm9, %v1815_v53, %v1817_v54  ;;  %v3987_v11 = vadd.f32 %v1817_v54, %v1804_v20  ;;  %v1870_v38 = vmul.f32 %v1868_v52, %v3047_v12  ;;  %v1869_v41 = vmul.f32 %v1868_v52, %v3042_v9  ;;  %v4353_v53 = vld [vmem:[#allocation8_spill] sm:$0xff] }
 0x339   : > { %v3989_v51 = vadd.f32 %v1819_v57, %v1803_v21  ;;  %2143 = vrot.lane.b32.xlu1 %v2136_v31, %s2934_s8  ;;  %2141 = vrot.lane.b32.xlu0 %v2135_v43, %s2934_s8  ;;  %v2239_v20 = vstv %s2676_s29  ;;  %v1871_v21 = vmul.f32 %v1868_v52, %v3050_v13  ;;  %v1890_v62 = vadd.s32 1, %v4353_v53 }
 0x33a   : > { %v2242_v58 = vmul.f32 %v2239_v20, %v3127_v4  ;;  %v2158_v31 = vmul.f32 %v2155_v5, %v3050_v13  ;;  %v2157_v43 = vmul.f32 %v2155_v5, %v3047_v12  ;;  %v4354_v4 = vmov 0.0  }
 0x33b   : > { %v1946_v1 = vpop.permute.xlu1 %1945  ;;  %v3993_v47 = vpop.permute.xlu0 %1835  ;;  %vm1894_vm2 = vcmp.lt.s32.totalorder %v1890_v62, 16 }
 0x33c   : > { %v1839_v56 = vsel %vm519_vm10, %v1834_v42, %v3993_v47  ;;  %v2775_v55 = vsel %vm1894_vm2, 1.0, %v4354_v4  ;;  %vm2540_vm2 = vcmask 998400  }
 0x33d   : > { %v3999_v40 = vadd.f32 %v1839_v56, %v1823_v24  ;;  %2428 = vrot.lane.b32.xlu1 %v2422_v33, %s2933_s6  ;;  %2145 = vrot.lane.b32.xlu0 %v2137_v2, %s2934_s8  ;;  %v2241_v24 = vmul.f32 %v2239_v20, %v3131_v7  ;;  %v2442_v33 = vstv %s2753_s3  ;;  %v2774_v56 = vsel %vm1893_vm1, 1.0, %v4354_v4 }
 0x33e   : > { %v2445_v52 = vmul.f32 %v2442_v33, %v3050_v13  ;;  %vm2232_vm1 = vcmask 1006592  }
 0x33f   : > { %v1950_v49 = vpop.permute.xlu1 %1949  ;;  %v1948_v46 = vpop.permute.xlu0 %1947 }
 0x340   : > { %v1958_v34 = vadd.f32 %v1950_v49, %v1934_v61  ;;  %v1951_v15 = vsel %vm459_vm7, %v1946_v1, %v1948_v46  ;;  %v1952_v10 = vsel %vm459_vm7, %v1948_v46, %v1950_v49  ;;  %v2443_v46 = vmul.f32 %v2442_v33, %v3042_v9 }
 0x341   : > { %v1957_v27 = vadd.f32 %v1952_v10, %v1933_v45  ;;  %2432 = vrot.lane.b32.xlu1 %v2424_v18, %s2933_s6  ;;  %2430 = vrot.lane.b32.xlu0 %v2423_v26, %s2933_s6  ;;  %v1956_v63 = vadd.f32 %v1951_v15, %v1932_v0  ;;  %s2766_s6 = sld [smem:[#allocation4 + $0x60]]  ;;  %v2444_v45 = vmul.f32 %v2442_v33, %v3047_v12 }
 0x342   : > { %v2465_v33 = vmul.f32 %v2463_v50, %v3047_v12 }
 0x343   : > { %v1969_v37 = vpop.permute.xlu1 %1968  ;;  %v1967_v28 = vpop.permute.xlu0 %1966 }
 0x344   : > { %v1972_v16 = vsel %vm479_vm8, %v1967_v28, %v1969_v37 }
 0x345   : > { %v1977_v35 = vadd.f32 %v1972_v16, %v1956_v63  ;;  %1877 = vrot.lane.b32.xlu1 %v1870_v38, %s2936_s16  ;;  %1875 = vrot.lane.b32.xlu0 %v1869_v41, %s2936_s16 }
 0x347   : > { %v2254_v25 = vpop.permute.xlu1 %2253  ;;  %v1971_v48 = vpop.permute.xlu0 %1970  ;;  %v2176_v63 = vstv %s2766_s6 }
 0x348   : > { %v1973_v19 = vsel %vm479_vm8, %v1969_v37, %v1971_v48  ;;  %v1979_v44 = vadd.f32 %v1971_v48, %v1958_v34  ;;  %v2858_v34 = vpack.i.bf16 %v2775_v55, %v2774_v56  ;;  %v2240_v37 = vmul.f32 %v2239_v20, %v3119_v60 }
 0x349   : > { %v1978_v3 = vadd.f32 %v1973_v19, %v1957_v27  ;;  %2162 = vrot.lane.b32.xlu1 %v2156_v39, %s2935_s14  ;;  %1879 = vrot.lane.b32.xlu0 %v1871_v21, %s2936_s16  ;;  %v2178_v38 = vmul.f32 %v2176_v63, %v3047_v12  ;;  %v2198_v48 = vadd.s32 2, %v4353_v53  ;;  %v2506_v56 = vadd.s32 3, %v4353_v53 }
 0x34b   : > { %v2258_v42 = vpop.permute.xlu1 %2257  ;;  %v2256_v54 = vpop.permute.xlu0 %2255  ;;  %vm2202_vm4 = vcmp.lt.s32.totalorder %v2198_v48, 16  ;;  %vm2510_vm6 = vcmp.lt.s32.totalorder %v2506_v56, 16 }
 0x34c   : > { %v2266_v57 = vadd.f32 %v2258_v42, %v2242_v58  ;;  %v2259_v22 = vsel %vm459_vm7, %v2254_v25, %v2256_v54  ;;  %v2260_v1 = vsel %vm459_vm7, %v2256_v54, %v2258_v42  ;;  %v2197_v25 = vadd.s32 2, %v3023_v6 }
 0x34d   : > { %v2265_v2 = vadd.f32 %v2260_v1, %v2241_v24  ;;  %2166 = vrot.lane.b32.xlu1 %v2158_v31, %s2935_s14  ;;  %2164 = vrot.lane.b32.xlu0 %v2157_v43, %s2935_s14  ;;  %v2264_v41 = vadd.f32 %v2259_v22, %v2240_v37  ;;  %v2464_v58 = vmul.f32 %v2463_v50, %v3042_v9  ;;  %v2777_v43 = vsel %vm2202_vm4, 1.0, %v4354_v4 }
 0x34e   : > { %v2179_v24 = vmul.f32 %v2176_v63, %v3050_v13  ;;  %vm2201_vm3 = vcmp.lt.s32.totalorder %v2197_v25, 16  ;;  %v2466_v1 = vmul.f32 %v2463_v50, %v3050_v13  ;;  %v2779_v37 = vsel %vm2510_vm6, 1.0, %v4354_v4 }
 0x34f   : > { %v1990_v61 = vpop.permute.xlu1 %1989  ;;  %v1988_v49 = vpop.permute.xlu0 %1987  ;;  %v2776_v31 = vsel %vm2201_vm3, 1.0, %v4354_v4 }
 0x350   : > { %v1993_v18 = vsel %vm499_vm9, %v1988_v49, %v1990_v61  ;;  %v2484_v49 = vstv %s2767_s12 }
 0x351   : > { %v1998_v26 = vadd.f32 %v1993_v18, %v1977_v35  ;;  %2451 = vrot.lane.b32.xlu1 %v2444_v45, %s2934_s8  ;;  %2449 = vrot.lane.b32.xlu0 %v2443_v46, %s2934_s8  ;;  %v2177_v35 = vmul.f32 %v2176_v63, %v3042_v9  ;;  %v2863_v46 = vpack.i.bf16 %v2777_v43, %v2776_v31 }
 0x353   : > { %v2275_v15 = vpop.permute.xlu1 %2274  ;;  %v1992_v10 = vpop.permute.xlu0 %1991 }
 0x354   : > { %v1994_v0 = vsel %vm499_vm9, %v1990_v61, %v1992_v10  ;;  %v2000_v27 = vadd.f32 %v1992_v10, %v1979_v44 }
 0x355   : > { %v1999_v28 = vadd.f32 %v1994_v0, %v1978_v3  ;;  %2859 = vrot.lane.b32.xlu1 %v2858_v34, %s2943_s7  ;;  %2453 = vrot.lane.b32.xlu0 %v2445_v52, %s2934_s8  ;;  %v2485_v34 = vmul.f32 %v2484_v49, %v3042_v9  ;;  %s2944_s8 = smov 5  }
 0x357   : > { %v2279_v16 = vpop.permute.xlu1 %2278  ;;  %v2277_v5 = vpop.permute.xlu0 %2276 }
 0x358   : > { %v2287_v39 = vadd.f32 %v2279_v16, %v2266_v57  ;;  %v2280_v21 = vsel %vm479_vm8, %v2275_v15, %v2277_v5  ;;  %v2281_v20 = vsel %vm479_vm8, %v2277_v5, %v2279_v16  ;;  %v2486_v16 = vmul.f32 %v2484_v49, %v3047_v12 }
 0x359   : > { %v2285_v62 = vadd.f32 %v2280_v21, %v2264_v41  ;;  %v2286_v19 = vadd.f32 %v2281_v20, %v2265_v2  ;;  %2185 = vrot.lane.b32.xlu1 %v2178_v38, %s2936_s16  ;;  %2183 = vrot.lane.b32.xlu0 %v2177_v35, %s2936_s16  ;;  %v2505_v2 = vadd.s32 3, %v3023_v6  ;;  %v2487_v41 = vmul.f32 %v2484_v49, %v3050_v13 }
 0x35b   : > { %v2011_v44 = vpop.permute.xlu1 %2010  ;;  %v2009_v3 = vpop.permute.xlu0 %2008  ;;  %vm2509_vm5 = vcmp.lt.s32.totalorder %v2505_v2, 16 }
 0x35c   : > { %v2014_v42 = vsel %vm519_vm10, %v2009_v3, %v2011_v44  ;;  %v2778_v63 = vsel %vm2509_vm5, 1.0, %v4354_v4 }
 0x35d   : > { %v2019_v54 = vadd.f32 %v2014_v42, %v1998_v26  ;;  %2470 = vrot.lane.b32.xlu1 %v2464_v58, %s2935_s14  ;;  %2187 = vrot.lane.b32.xlu0 %v2179_v24, %s2936_s16  ;;  %v2868_v25 = vpack.i.bf16 %v2779_v37, %v2778_v63 }
 0x35f   : > { %v2296_v57 = vpop.permute.xlu1 %2295  ;;  %v2013_v22 = vpop.permute.xlu0 %2012 }
 0x360   : > { %v2015_v55 = vsel %vm519_vm10, %v2011_v44, %v2013_v22  ;;  %v2021_v61 = vadd.f32 %v2013_v22, %v2000_v27 }
 0x361   : > { %v2020_v45 = vadd.f32 %v2015_v55, %v1999_v28  ;;  %2474 = vrot.lane.b32.xlu1 %v2466_v1, %s2935_s14  ;;  %2472 = vrot.lane.b32.xlu0 %v2465_v33, %s2935_s14  ;;  %s2945_s14 = smov 6  }
 0x363   : > { %v2300_v18 = vpop.permute.xlu1 %2299  ;;  %v2298_v26 = vpop.permute.xlu0 %2297 }
 0x364   : > { %v2308_v15 = vadd.f32 %v2300_v18, %v2287_v39  ;;  %v2301_v10 = vsel %vm499_vm9, %v2296_v57, %v2298_v26  ;;  %v2302_v52 = vsel %vm499_vm9, %v2298_v26, %v2300_v18 }
 0x365   : > { %v2306_v0 = vadd.f32 %v2301_v10, %v2285_v62  ;;  %v2307_v27 = vadd.f32 %v2302_v52, %v2286_v19  ;;  %2491 = vrot.lane.b32.xlu1 %v2485_v34, %s2936_s16  ;;  %2864 = vrot.lane.b32.xlu0 %v2863_v46, %s2944_s8 }
 0x367   : > { %v2032_v28 = vpop.permute.xlu1 %2031  ;;  %v2030_v38 = vpop.permute.xlu0 %2029 }
 0x368   : > { %v2035_v5 = vsel %vm539_vm11, %v2030_v38, %v2032_v28 }
 0x369   : > { %v2040_v35 = vadd.f32 %v2035_v5, %v2019_v54  ;;  %2495 = vrot.lane.b32.xlu1 %v2487_v41, %s2936_s16  ;;  %2493 = vrot.lane.b32.xlu0 %v2486_v16, %s2936_s16  ;;  %s2724_s16 = sld [smem:[#allocation4 + $0x36]] }
 0x36b   : > { %v2317_v48 = vpop.permute.xlu1 %2316  ;;  %v2034_v39 = vpop.permute.xlu0 %2033 }
 0x36c   : > { %v2036_v21 = vsel %vm539_vm11, %v2032_v28, %v2034_v39  ;;  %v2042_v20 = vadd.f32 %v2034_v39, %v2021_v61 }
 0x36d   : > { %v2041_v50 = vadd.f32 %v2036_v21, %v2020_v45  ;;  %2869 = vrot.lane.b32.xlu0 %v2868_v25, %s2945_s14 }
 0x36f   : > { %v2321_v62 = vpop.permute.xlu1 %2320  ;;  %v2319_v19 = vpop.permute.xlu0 %2318 }
 0x370   : > { %v2329_v44 = vadd.f32 %v2321_v62, %v2308_v15  ;;  %v2322_v3 = vsel %vm519_vm10, %v2317_v48, %v2319_v19  ;;  %v2323_v58 = vsel %vm519_vm10, %v2319_v19, %v2321_v62 }
 0x371   : > { %v2327_v24 = vadd.f32 %v2322_v3, %v2306_v0  ;;  %v2328_v42 = vadd.f32 %v2323_v58, %v2307_v27  ;;  %v2064_v0 = vstv %s2724_s16 }
 0x372   : > { %v2067_v38 = vmul.f32 %v2064_v0, %v3050_v13  ;;  %v2065_v16 = vmul.f32 %v2064_v0, %v3042_v9  ;;  %v2066_v5 = vmul.f32 %v2064_v0, %v3047_v12 }
 0x373   : > { %v2053_v54 = vpop.permute.xlu1 %2052  ;;  %v2051_v31 = vpop.permute.xlu0 %2050 }
 0x374   : > { %v2056_v43 = vsel %vm559_vm12, %v2051_v31, %v2053_v54 }
 0x375   : > { %v2061_v57 = vadd.f32 %v2056_v43, %v2040_v35 }
 0x377   : > { %v2338_v22 = vpop.permute.xlu1 %2337  ;;  %v2055_v1 = vpop.permute.xlu0 %2054  ;;  %v2068_v48 = vadd.f32 %v2065_v16, %v2061_v57 }
 0x378   : > { %v2057_v33 = vsel %vm559_vm12, %v2053_v54, %v2055_v1  ;;  %v2063_v2 = vadd.f32 %v2055_v1, %v2042_v20  ;;  %v2372_v54 = vstv %s2725_s15 }
 0x379   : > { %v2062_v56 = vadd.f32 %v2057_v33, %v2041_v50  ;;  %v2375_v1 = vmul.f32 %v2372_v54, %v3050_v13 }
 0x37a   : > { %v2070_v35 = vadd.f32 %v2067_v38, %v2063_v2  ;;  %v2373_v2 = vmul.f32 %v2372_v54, %v3042_v9 }
 0x37b   : > { %v2342_v55 = vpop.permute.xlu1 %2341  ;;  %v2340_v61 = vpop.permute.xlu0 %2339  ;;  %v2069_v39 = vadd.f32 %v2066_v5, %v2062_v56  ;;  %v2374_v56 = vmul.f32 %v2372_v54, %v3047_v12 }
 0x37c   : > { %v2350_v49 = vadd.f32 %v2342_v55, %v2329_v44  ;;  %v2343_v45 = vsel %vm539_vm11, %v2338_v22, %v2340_v61  ;;  %v2344_v46 = vsel %vm539_vm11, %v2340_v61, %v2342_v55 }
 0x37d   : > { %v2348_v18 = vadd.f32 %v2343_v45, %v2327_v24  ;;  %v2349_v26 = vadd.f32 %v2344_v46, %v2328_v42 }
 0x37f   : > { %v2361_v34 = vpop.permute.xlu1 %2360  ;;  %v2359_v15 = vpop.permute.xlu0 %2358 }
 0x380   : > { %v2364_v10 = vsel %vm559_vm12, %v2359_v15, %v2361_v34 }
 0x381   : > { %v2369_v52 = vadd.f32 %v2364_v10, %v2348_v18 }
 0x383   : > { %v2079_v27 = vpop.permute.xlu1 %2078  ;;  %v2363_v63 = vpop.permute.xlu0 %2362 }
 0x384   : > { %v2365_v37 = vsel %vm559_vm12, %v2361_v34, %v2363_v63  ;;  %v2371_v28 = vadd.f32 %v2363_v63, %v2350_v49  ;;  %v2376_v49 = vadd.f32 %v2373_v2, %v2369_v52 }
 0x385   : > { %v2370_v41 = vadd.f32 %v2365_v37, %v2349_v26 }
 0x386   : > { %v2378_v55 = vadd.f32 %v2375_v1, %v2371_v28 }
 0x387   : > { %v2083_v25 = vpop.permute.xlu1 %2082  ;;  %v2081_v21 = vpop.permute.xlu0 %2080  ;;  %v2377_v45 = vadd.f32 %v2374_v56, %v2370_v41 }
 0x388   : > { %v2091_v20 = vadd.f32 %v2083_v25, %v2070_v35  ;;  %v2084_v50 = vsel %vm459_vm7, %v2079_v27, %v2081_v21  ;;  %v2085_v62 = vsel %vm459_vm7, %v2081_v21, %v2083_v25 }
 0x389   : > { %v2089_v19 = vadd.f32 %v2084_v50, %v2068_v48  ;;  %v2090_v44 = vadd.f32 %v2085_v62, %v2069_v39 }
 0x38b   : > { %v2102_v3 = vpop.permute.xlu1 %2101  ;;  %v2100_v58 = vpop.permute.xlu0 %2099 }
 0x38c   : > { %v2105_v24 = vsel %vm479_vm8, %v2100_v58, %v2102_v3 }
 0x38d   : > { %v4091_v42 = vadd.f32 %v2105_v24, %v2089_v19 }
 0x38f   : > { %v2387_v31 = vpop.permute.xlu1 %2386  ;;  %v2104_v43 = vpop.permute.xlu0 %2103 }
 0x390   : > { %v2106_v57 = vsel %vm479_vm8, %v2102_v3, %v2104_v43  ;;  %v4094_v22 = vadd.f32 %v2104_v43, %v2091_v20 }
 0x391   : > { %v4097_v33 = vadd.f32 %v2106_v57, %v2090_v44 }
 0x393   : > { %v2391_v61 = vpop.permute.xlu1 %2390  ;;  %v2389_v46 = vpop.permute.xlu0 %2388 }
 0x394   : > { %v4101_v18 = vadd.f32 %v2391_v61, %v2378_v55  ;;  %v2392_v26 = vsel %vm459_vm7, %v2387_v31, %v2389_v46  ;;  %v2393_v34 = vsel %vm459_vm7, %v2389_v46, %v2391_v61 }
 0x395   : > { %v4105_v15 = vadd.f32 %v2392_v26, %v2376_v49  ;;  %v4107_v13 = vadd.f32 %v2393_v34, %v2377_v45 }
 0x397   : > { %v2121_v10 = vpop.permute.xlu1 %2120  ;;  %v1838_v0 = vpop.permute.xlu0 %1837 }
 0x398   : > { %v1840_v58 = vsel %vm519_vm10, %v3993_v47, %v1838_v0  ;;  %v1846_v47 = vadd.f32 %v1838_v0, %v3987_v11 }
 0x399   : > { %v1845_v57 = vadd.f32 %v1840_v58, %v3989_v51 }
 0x39b   : > { %v4109_v27 = vpop.permute.xlu1 %2124  ;;  %v2123_v63 = vpop.permute.xlu0 %2122 }
 0x39c   : > { %v2127_v11 = vsel %vm499_vm9, %v2123_v63, %v4109_v27 }
 0x39f   : > { %v4111_v37 = vpop.permute.xlu1 %2409  ;;  %v2408_v52 = vpop.permute.xlu0 %2407 }
 0x3a3   : > { %v1855_v28 = vpop.permute.xlu1 %1854  ;;  %v4113_v38 = vpop.permute.xlu0 %2411 }
 0x3a7   : > { %v1859_v41 = vpop.permute.xlu1 %1858  ;;  %v1857_v16 = vpop.permute.xlu0 %1856 }
 0x3a8   : > { %v1860_v24 = vsel %vm539_vm11, %v1855_v28, %v1857_v16  ;;  %v1861_v43 = vsel %vm539_vm11, %v1857_v16, %v1859_v41  ;;  %v1867_v28 = vadd.f32 %v1859_v41, %v1846_v47 }
 0x3a9   : > { %v1865_v2 = vadd.f32 %v1860_v24, %v3999_v40  ;;  %v1866_v55 = vadd.f32 %v1861_v43, %v1845_v57  ;;  %v2126_v24 = vsel %vm499_vm9, %v2121_v10, %v2123_v63  ;;  %v2413_v10 = vsel %vm479_vm8, %v2408_v52, %v4111_v37 }
 0x3aa   : > { %v2131_v41 = vadd.f32 %v2126_v24, %v4091_v42 }
 0x3ab   : > { %v2144_v5 = vpop.permute.xlu1 %2143  ;;  %v2142_v35 = vpop.permute.xlu0 %2141 }
 0x3ac   : > { %v2147_v0 = vsel %vm519_vm10, %v2142_v35, %v2144_v5  ;;  %v2133_v35 = vadd.f32 %v4109_v27, %v4094_v22 }
 0x3af   : > { %v2429_v25 = vpop.permute.xlu1 %2428  ;;  %v2146_v48 = vpop.permute.xlu0 %2145 }
 0x3b3   : > { %v4115_v39 = vpop.permute.xlu1 %2432  ;;  %v4117_v21 = vpop.permute.xlu0 %2430 }
 0x3b7   : > { %v1878_v20 = vpop.permute.xlu1 %1877  ;;  %v1876_v50 = vpop.permute.xlu0 %1875 }
 0x3b8   : > { %v1881_v1 = vsel %vm559_vm12, %v1876_v50, %v1878_v20 }
 0x3b9   : > { %v1886_v45 = vadd.f32 %v1881_v1, %v1865_v2  ;;  %v2148_v1 = vsel %vm519_vm10, %v2144_v5, %v2146_v48  ;;  %v2434_v5 = vsel %vm499_vm9, %v2429_v25, %v4117_v21 }
 0x3bb   : > { %v2163_v62 = vpop.permute.xlu1 %2162  ;;  %v1880_v19 = vpop.permute.xlu0 %1879 }
 0x3bc   : > { %v1882_v56 = vsel %vm559_vm12, %v1878_v20, %v1880_v19  ;;  %v1888_v40 = vadd.f32 %v1880_v19, %v1867_v28  ;;  %v2132_v19 = vadd.f32 %v2127_v11, %v4097_v33  ;;  %v2414_v33 = vsel %vm479_vm8, %v4111_v37, %v4113_v38 }
 0x3bd   : > { %v1887_v34 = vadd.f32 %v1882_v56, %v1866_v55  ;;  %v2419_v28 = vadd.f32 %v2414_v33, %v4107_v13  ;;  %v2420_v13 = vadd.f32 %v4113_v38, %v4101_v18 }
 0x3be   : > { %v2153_v47 = vadd.f32 %v2148_v1, %v2132_v19 }
 0x3bf   : > { %v4119_v44 = vpop.permute.xlu1 %2166  ;;  %v2165_v3 = vpop.permute.xlu0 %2164  ;;  %v2441_v1 = vadd.f32 %v4115_v39, %v2420_v13 }
 0x3c0   : > { %v2168_v2 = vsel %vm539_vm11, %v2163_v62, %v2165_v3  ;;  %v2169_v63 = vsel %vm539_vm11, %v2165_v3, %v4119_v44 }
 0x3c1   : > { %v2174_v3 = vadd.f32 %v2169_v63, %v2153_v47 }
 0x3c3   : > { %v4124_v54 = vpop.permute.xlu1 %2451  ;;  %v2450_v31 = vpop.permute.xlu0 %2449 }
 0x3c7   : > { %v2860_v61 = vpop.permute.xlu1 %2859  ;;  %v4131_v49 = vpop.permute.xlu0 %2453 }
 0x3c8   : > { %v2862_v46 = vunpack.i.h.bf16 %v2860_v61  ;;  %v2861_v26 = vunpack.i.l.bf16 %v2860_v61  ;;  %v2152_v61 = vadd.f32 %v2147_v0, %v2131_v41  ;;  %v2462_v18 = vadd.f32 %v4131_v49, %v2441_v1  ;;  %v4370_v1 = vld [vmem:[#allocation43_spill] sm:$0xff] }
 0x3ca   : > { %v1908_v16 = vsel %vm1907_vm13, %v2861_v26, %v2862_v46  ;;  %v1912_v51 = vmul.f32 %v2861_v26, %v1886_v45  ;;  %v1914_v20 = vmul.f32 %v2862_v46, %v1888_v40  ;;  %v2173_v62 = vadd.f32 %v2168_v2, %v2152_v61 }
 0x3cb   : > { %v1913_v58 = vmul.f32 %v1908_v16, %v1887_v34  ;;  %v2186_v50 = vpop.permute.xlu1 %2185  ;;  %v2184_v30 = vpop.permute.xlu0 %2183  ;;  %v2418_v45 = vadd.f32 %v2413_v10, %v4105_v15  ;;  %v2154_v46 = vadd.f32 %v2146_v48, %v2133_v35  ;;  %v2455_v16 = vsel %vm519_vm10, %v2450_v31, %v4124_v54 }
 0x3cc   : > { %1918 = vrot.lane.b32.xlu1 %v1912_v51, %s2946_s17  ;;  %v2189_v42 = vsel %vm559_vm12, %v2184_v30, %v2186_v50  ;;  %v2435_v30 = vsel %vm499_vm9, %v4117_v21, %v4115_v39  ;;  %v2456_v48 = vsel %vm519_vm10, %v4124_v54, %v4131_v49 }
 0x3cd   : > { %1920 = vrot.lane.b32.xlu0 %v1913_v58, %s2946_s17  ;;  %v2194_v27 = vadd.f32 %v2189_v42, %v2173_v62  ;;  %v2439_v25 = vadd.f32 %v2434_v5, %v2418_v45  ;;  %v2175_v15 = vadd.f32 %v4119_v44, %v2154_v46  ;;  %v2440_v40 = vadd.f32 %v2435_v30, %v2419_v28  ;;  %v4356_v45 = vld [vmem:[#allocation28_spill] sm:$0xff]  ;;  %v4359_v30 = vld [vmem:[#allocation30_spill] sm:$0xff] }
 0x3ce   : > { %v441_v62 = vstv %s277_s20  ;;  %v4361_v28 = vld [vmem:[#allocation34_spill] sm:$0xff] }
 0x3cf   : > { %v2471_v43 = vpop.permute.xlu1 %2470  ;;  %v2188_v57 = vpop.permute.xlu0 %2187  ;;  %v2460_v0 = vadd.f32 %v2455_v16, %v2439_v25  ;;  %v2461_v44 = vadd.f32 %v2456_v48, %v2440_v40  ;;  %v442_v46 = vmul.f32 %v441_v62, %v3119_v60  ;;  %v4363_v48 = vld [vmem:[#allocation38_spill] sm:$0xff] }
 0x3d0   : > { %1922 = vrot.lane.b32.xlu1 %v1914_v20, %s2946_s17  ;;  %v2190_v52 = vsel %vm559_vm12, %v2186_v50, %v2188_v57  ;;  %v2196_v31 = vadd.f32 %v2188_v57, %v2175_v15 }
 0x3d1   : > { %v2195_v51 = vadd.f32 %v2190_v52, %v2174_v3  ;;  %v4355_v52 = vld [vmem:[#allocation29_spill] sm:$0xff]  ;;  %v4357_v3 = vld [vmem:[#allocation32_spill] sm:$0xff] }
 0x3d2   : > { %v460_v49 = vsel %vm459_vm7, %v4356_v45, %v4355_v52 }
 0x3d3   : > { %v2475_v56 = vpop.permute.xlu1 %2474  ;;  %v2473_v55 = vpop.permute.xlu0 %2472 }
 0x3d4   : > { %v2476_v21 = vsel %vm539_vm11, %v2471_v43, %v2473_v55  ;;  %v2477_v41 = vsel %vm539_vm11, %v2473_v55, %v2475_v56  ;;  %v2483_v35 = vadd.f32 %v2475_v56, %v2462_v18  ;;  %v566_v18 = vstv %s2719_s21 }
 0x3d5   : > { %v2481_v19 = vadd.f32 %v2476_v21, %v2460_v0  ;;  %v2482_v10 = vadd.f32 %v2477_v41, %v2461_v44  ;;  %v4365_v21 = vld [vmem:[#allocation36_spill] sm:$0xff] }
 0x3d7   : > { %v2492_v26 = vpop.permute.xlu1 %2491  ;;  %v2865_v22 = vpop.permute.xlu0 %2864 }
 0x3d8   : > { %v2867_v34 = vunpack.i.h.bf16 %v2865_v22  ;;  %v2866_v37 = vunpack.i.l.bf16 %v2865_v22  ;;  %v464_v22 = vadd.f32 %v460_v49, %v442_v46  ;;  %v4375_v49 = vld [vmem:[#allocation12_spill] sm:$0xff] }
 0x3da   : > { %v2216_v58 = vsel %vm2215_vm14, %v2866_v37, %v2867_v34  ;;  %v2220_v50 = vmul.f32 %v2866_v37, %v2194_v27  ;;  %v2222_v43 = vmul.f32 %v2867_v34, %v2196_v31  ;;  %v461_v27 = vsel %vm459_vm7, %v4355_v52, %v4359_v30  ;;  %v4360_v37 = vld [vmem:[#allocation35_spill] sm:$0xff] }
 0x3db   : > { %v2221_v20 = vmul.f32 %v2216_v58, %v2195_v51  ;;  %v2496_v24 = vpop.permute.xlu1 %2495  ;;  %v2494_v11 = vpop.permute.xlu0 %2493  ;;  %v443_v34 = vmul.f32 %v441_v62, %v3131_v7  ;;  %v500_v25 = vsel %vm499_vm9, %v4361_v28, %v4360_v37  ;;  %v4362_v51 = vld [vmem:[#allocation33_spill] sm:$0xff]  ;;  %v501_v7 = vsel %vm499_vm9, %v4360_v37, %v4365_v21  ;;  %v4368_v31 = vld [vmem:[#allocation39_spill] sm:$0xff] }
 0x3dc   : > { %2226 = vrot.lane.b32.xlu0 %v2220_v50, %s2947_s18  ;;  %v2497_v54 = vsel %vm559_vm12, %v2492_v26, %v2494_v11  ;;  %v2498_v2 = vsel %vm559_vm12, %v2494_v11, %v2496_v24  ;;  %v2504_v5 = vadd.f32 %v2496_v24, %v2483_v35  ;;  %v4358_v26 = vld [vmem:[#allocation31_spill] sm:$0xff]  ;;  %v481_v60 = vsel %vm479_vm8, %v4357_v3, %v4362_v51  ;;  %v4364_v58 = vld [vmem:[#allocation37_spill] sm:$0xff]  ;;  %v4367_v11 = vld [vmem:[#allocation40_spill] sm:$0xff] }
 0x3dd   : > { %2228 = vrot.lane.b32.xlu1 %v2221_v20, %s2947_s18  ;;  %v2502_v38 = vadd.f32 %v2497_v54, %v2481_v19  ;;  %v2503_v63 = vadd.f32 %v2498_v2, %v2482_v10  ;;  %v480_v56 = vsel %vm479_vm8, %v4358_v26, %v4357_v3  ;;  %v465_v15 = vadd.f32 %v461_v27, %v443_v34  ;;  %v4366_v24 = vld [vmem:[#allocation41_spill] sm:$0xff]  ;;  %v4369_v54 = vld [vmem:[#allocation44_spill] sm:$0xff]  ;;  %v4371_v2 = vld [vmem:[#allocation42_spill] sm:$0xff] }
 0x3de   : > { %v484_v16 = vadd.f32 %v480_v56, %v464_v22  ;;  %v520_v50 = vsel %vm519_vm10, %v4364_v58, %v4363_v48  ;;  %v540_v13 = vsel %vm539_vm11, %v4367_v11, %v4366_v24  ;;  %v521_v41 = vsel %vm519_vm10, %v4363_v48, %v4368_v31  ;;  %v4376_v3 = vld [vmem:[#allocation14_spill] sm:$0xff]  ;;  %v4377_v26 = vld [vmem:[#allocation13_spill] sm:$0xff]  ;;  %v4378_v30 = vld [vmem:[#allocation15_spill] sm:$0xff] }
 0x3df   : > { %v2870_v61 = vpop.permute.xlu0 %2869  ;;  %v485_v20 = vadd.f32 %v481_v60, %v465_v15  ;;  %v560_v19 = vsel %vm559_vm12, %v4370_v1, %v4369_v54  ;;  %v541_v10 = vsel %vm539_vm11, %v4366_v24, %v4371_v2  ;;  %v567_v35 = vmul.f32 %v566_v18, %v3042_v9  ;;  %v4379_v27 = vld [vmem:[#allocation17_spill] sm:$0xff]  ;;  %v4380_v34 = vld [vmem:[#allocation16_spill] sm:$0xff]  ;;  %v4383_v15 = vld [vmem:[#allocation19_spill] sm:$0xff] }
 0x3e0   : > { %v2872_v57 = vunpack.i.h.bf16 %v2870_v61  ;;  %v2871_v55 = vunpack.i.l.bf16 %v2870_v61  ;;  %2230 = vrot.lane.b32.xlu0 %v2222_v43, %s2947_s18  ;;  %v504_v40 = vadd.f32 %v500_v25, %v484_v16  ;;  %v603_v56 = vsel %vm479_vm8, %v4377_v26, %v4376_v3  ;;  %v4381_v16 = vld [vmem:[#allocation18_spill] sm:$0xff]  ;;  %v4382_v60 = vld [vmem:[#allocation20_spill] sm:$0xff] }
 0x3e1   : > { %v505_v44 = vadd.f32 %v501_v7, %v485_v20  ;;  %v622_v37 = vsel %vm499_vm9, %v4380_v34, %v4379_v27  ;;  %v623_v51 = vsel %vm499_vm9, %v4379_v27, %v4381_v16  ;;  %v641_v48 = vsel %vm519_vm10, %v4383_v15, %v4382_v60  ;;  %v4385_v20 = vld [vmem:[#allocation23_spill] sm:$0xff]  ;;  %v4386_v24 = vld [vmem:[#allocation22_spill] sm:$0xff] }
 0x3e2   : > { %v2524_v47 = vsel %vm2523_vm15, %v2871_v55, %v2872_v57  ;;  %v2528_v42 = vmul.f32 %v2871_v55, %v2502_v38  ;;  %v2530_v39 = vmul.f32 %v2872_v57, %v2504_v5  ;;  %v524_v0 = vadd.f32 %v520_v50, %v504_v40  ;;  %v4372_v57 = vld [vmem:[#allocation45_spill] sm:$0xff]  ;;  %v4373_v5 = vld [vmem:[#allocation11_spill] sm:$0xff]  ;;  %v4388_v1 = vld [vmem:[#allocation26_spill] sm:$0xff] }
 0x3e3   : > { %v2529_v33 = vmul.f32 %v2524_v47, %v2503_v63  ;;  %v525_v61 = vadd.f32 %v521_v41, %v505_v44  ;;  %v561_v55 = vsel %vm559_vm12, %v4369_v54, %v4372_v57  ;;  %v585_v46 = vsel %vm459_vm7, %v4373_v5, %v4375_v49  ;;  %v4384_v40 = vld [vmem:[#allocation21_spill] sm:$0xff]  ;;  %v4387_v41 = vld [vmem:[#allocation24_spill] sm:$0xff] }
 0x3e4   : > { %2534 = vrot.lane.b32.xlu1 %v2528_v42, %s2948_s19  ;;  %v544_v43 = vadd.f32 %v540_v13, %v524_v0  ;;  %v642_v21 = vsel %vm519_vm10, %v4382_v60, %v4384_v40  ;;  %v685_v7 = vadd.s32 4294967293, %v3023_v6  ;;  %v660_v11 = vsel %vm539_vm11, %v4386_v24, %v4385_v20 }
 0x3e5   : > { %2536 = vrot.lane.b32.xlu0 %v2529_v33, %s2948_s19  ;;  %v545_v63 = vadd.f32 %v541_v10, %v525_v61  ;;  %v568_v33 = vmul.f32 %v566_v18, %v3047_v12  ;;  %v604_v12 = vsel %vm479_vm8, %v4376_v3, %v4378_v30  ;;  %v686_v31 = vadd.s32 4294967293, %v4353_v53  ;;  %v4390_v18 = vld [vmem:[#allocation27_spill] sm:$0xff] }
 0x3e6   : > { %v564_v38 = vadd.f32 %v560_v19, %v544_v43  ;;  %v661_v44 = vsel %vm539_vm11, %v4385_v20, %v4387_v41  ;;  %v4389_v19 = vld [vmem:[#allocation25_spill] sm:$0xff]  ;;  %v680_v53 = vsel %vm559_vm12, %v4388_v1, %v4390_v18  ;;  %vm1002_vm9 = vcmask 1039360  }
 0x3e7   : > { %v565_v47 = vadd.f32 %v561_v55, %v545_v63  ;;  %v679_v43 = vsel %vm559_vm12, %v4389_v19, %v4388_v1  ;;  %vm688_vm8 = vcmp.ge.s32.totalorder %v686_v31, 0  ;;  %v1003_v57 = vsel %vm1002_vm9, %v3757_v59, %v3735_v29 }
 0x3e8   : > { %2538 = vrot.lane.b32.xlu1 %v2530_v39, %s2948_s19  ;;  %v569_v42 = vadd.f32 %v567_v35, %v564_v38  ;;  %v4374_v39 = vld [vmem:[#allocation10_spill] sm:$0xff]  ;;  %v2769_v55 = vsel %vm688_vm8, 1.0, %v4354_v4  ;;  %vm1310_vm10 = vcmask 1031168   ;;  %vm1616_vm11 = vcmask 1022976  }
 0x3e9   : > { %v584_v62 = vsel %vm459_vm7, %v4374_v39, %v4373_v5  ;;  %v570_v52 = vadd.f32 %v568_v33, %v565_v47  ;;  %vm687_vm7 = vcmp.ge.s32.totalorder %v685_v7, 0  ;;  %v1311_v47 = vsel %vm1310_vm10, %v3770_v32, %v3748_v17  ;;  %v4392_v7 = vld [vmem:[#allocation9_spill] sm:$0xff] }
 0x3ea   : > { %v588_v45 = vadd.f32 %v584_v62, %v569_v42  ;;  %v2768_v10 = vsel %vm687_vm7, 1.0, %v4354_v4  ;;  %v1004_v33 = vsel %vm1002_vm9, %v3735_v29, %v3731_v36  ;;  %vm1924_vm12 = vcmask 1014784  }
 0x3eb   : > { %v589_v22 = vadd.f32 %v585_v46, %v570_v52  ;;  %v1617_v59 = vsel %vm1616_vm11, %v3888_v23, %v3896_v14  ;;  %v1312_v4 = vsel %vm1310_vm10, %v3748_v17, %v3741_v8  ;;  %v4391_v46 = vld [vmem:[#allocation46_spill] sm:$0xff] }
 0x3ec   : > { %v607_v9 = vadd.f32 %v603_v56, %v588_v45  ;;  %v1618_v36 = vsel %vm1616_vm11, %v3896_v14, %v4391_v46 }
 0x3ed   : > { %v608_v28 = vadd.f32 %v604_v12, %v589_v22 }
 0x3ee   : > { %v626_v25 = vadd.f32 %v622_v37, %v607_v9 }
 0x3ef   : > { %v627_v58 = vadd.f32 %v623_v51, %v608_v28 }
 0x3f0   : > { %v645_v50 = vadd.f32 %v641_v48, %v626_v25 }
 0x3f1   : > { %v646_v13 = vadd.f32 %v642_v21, %v627_v58 }
 0x3f2   : > { %v664_v0 = vadd.f32 %v660_v11, %v645_v50 }
 0x3f3   : > { %v665_v2 = vadd.f32 %v661_v44, %v646_v13 }
 0x3f4   : > { %v683_v6 = vadd.f32 %v679_v43, %v664_v0 }
 0x3f5   : > { %v684_v38 = vadd.f32 %v680_v53, %v665_v2 }
 0x3f6   : > { %v697_v63 = vmul.f32 %v2768_v10, %v683_v6 }
 0x3f7   : > { %v698_v39 = vmul.f32 %v2769_v55, %v684_v38 }
 0x3f8   : > { %v1007_v5 = vadd.f32 %v1003_v57, %v697_v63 }
 0x3f9   : > { %v1008_v45 = vadd.f32 %v1004_v33, %v698_v39 }
 0x3fa   : > { %v1315_v62 = vadd.f32 %v1311_v47, %v1007_v5 }
 0x3fb   : > { %v1316_v3 = vadd.f32 %v1312_v4, %v1008_v45 }
 0x3fc   : > { %v1621_v29 = vadd.f32 %v1617_v59, %v1315_v62 }
 0x3fd   : > { %v1622_v23 = vadd.f32 %v1618_v36, %v1316_v3 }
 0x43e   : > { %v1919_v54 = vpop.permute.xlu1 %1918 }
 0x43f   : > { %v1921_v61 = vpop.permute.xlu0 %1920 }
 0x440   : > { %v1925_v49 = vsel %vm1924_vm12, %v1919_v54, %v1921_v61 }
 0x441   : > { %v1929_v56 = vadd.f32 %v1925_v49, %v1621_v29 }
 0x442   : > { %v1923_v35 = vpop.permute.xlu1 %1922 }
 0x443   : > { %v1926_v22 = vsel %vm1924_vm12, %v1921_v61, %v1923_v35 }
 0x444   : > { %v1930_v12 = vadd.f32 %v1926_v22, %v1622_v23 }
 0x44e   : > { %v2227_v42 = vpop.permute.xlu0 %2226 }
 0x44f   : > { %v2229_v52 = vpop.permute.xlu1 %2228 }
 0x450   : > { %v2233_v26 = vsel %vm2232_vm1, %v2227_v42, %v2229_v52 }
 0x451   : > { %v2237_v30 = vadd.f32 %v2233_v26, %v1929_v56 }
 0x452   : > { %v2231_v32 = vpop.permute.xlu0 %2230 }
 0x453   : > { %v2234_v8 = vsel %vm2232_vm1, %v2229_v52, %v2231_v32 }
 0x454   : > { %v2238_v37 = vadd.f32 %v2234_v8, %v1930_v12 }
 0x456   : > { %v2535_v9 = vpop.permute.xlu1 %2534 }
 0x457   : > { %v2537_v17 = vpop.permute.xlu0 %2536 }
 0x458   : > { %v2541_v27 = vsel %vm2540_vm2, %v2535_v9, %v2537_v17 }
 0x459   : > { %v2545_v34 = vadd.f32 %v2541_v27, %v2237_v30 }
 0x45a   : > { %v2539_v28 = vpop.permute.xlu1 %2538 }
 0x45b   : > { %v2780_v25 = vmul.f32 -1.442695, %v2545_v34  ;;  %v2542_v16 = vsel %vm2540_vm2, %v2537_v17, %v2539_v28 }
 0x45c   : > { %v2546_v14 = vadd.f32 %v2542_v16, %v2238_v37 }
 0x45d   : > { %2874 = vpow2.f32 %v2780_v25 }
 0x45e   : > { %v2781_v51 = vmul.f32 -1.442695, %v2546_v14 }
 0x460   : > { %2876 = vpow2.f32 %v2781_v51 }
 0x46a   : > { %v2875_v60 = vpop.eup %2874 }
 0x46b   : > { %v2553_v15 = vadd.f32 1.0, %v2875_v60 }
 0x46d   : > { %v2877_v48 = vpop.eup %2876  ;;  %2878 = vrcp.f32 %v2553_v15 }
 0x46e   : > { %v2554_v58 = vadd.f32 1.0, %v2877_v48 }
 0x470   : > { %2880 = vrcp.f32 %v2554_v58 }
 0x47a   : > { %v2879_v50 = vpop.eup %2878 }
 0x47d   : > { %v2881_v40 = vpop.eup %2880 }
 0x47e   : > { %v2561_v21 = vcombine.low %v2879_v50, %v2881_v40 }
 0x480   : > { %v2568_v20 = vrot.slane %v2561_v21, %v4392_v7 }
 0x482   : > { %v2575_v24 = vrot.slane %v2568_v20, %v4392_v7 }
 0x484   : > { %2577 = vst.msk [vmem:[%s181_s30] sm:$0x3] %vm3010_vm0, %v2575_v24 }
 0x485 PF: > { %s13_s11 = sadd.s32 1, %s2923_s11   ;;  %s4394_s9 = smov %s2919_s10 }
 0x486   : > { %p10_p2 = scmp.ge.s32.totalorder %s13_s11, 4   ;;  %s4395_s10 = smov %s4397_s13 }
 0x488   :  { %12 = sbr.rel (!%p10_p2) target bundleno = 2 (0x2), region = 71 }
 0x48d   :  { %2597 = vsyncpa [#allocation5], 1 }
 0x48e   :  { %2599 = vsyncpa [#allocation5 + $0x1], 1 }

</bundles_post_ra>
